<compile_context>
chip_gen: v7x
topology: tpu7x:2x2x1
jax: 0.10.0
libtpu: 0.0.40
codegen_flags: <defaults>
</compile_context>

<pallas_src>
import jax
import jax.numpy as jnp
import numpy as np
from jax.experimental import pallas as pl
from jax.experimental.pallas import tpu as pltpu

_TILE_B = 128  # batch lanes per grid step (one full vreg lane-width)


def _dtw_kernel(s1_ref, s2_ref, out_ref):
    """s1_ref: (L1, D, TB), s2_ref: (L2, D, TB), out_ref: (1, 1, TB)."""
    s1 = s1_ref[...]
    s2 = s2_ref[...]
    L1, D, TB = s1.shape
    L2 = s2.shape[0]
    inf = jnp.float32(jnp.inf)

    # ---- Cost matrix in one batched pass (batch on the lane axis). ---------
    # cost[i, j, b] = sum_d (s1[i, d, b] - s2[j, d, b])**2
    # TODO(synk): for large D (>=128) route the -2*<s1,s2> cross term through
    # the MXU (||a||^2 + ||b||^2 - 2 a.b) instead of the broadcasted reduce.
    diff = s1[:, None, :, :] - s2[None, :, :, :]           # (L1, L2, D, TB)
    cost = jnp.sum(diff * diff, axis=2)                    # (L1, L2, TB)

    # ---- Skew the costs onto anti-diagonals. --------------------------------
    # skew[i, k, :] == cost[i, k - i, :] where 0 <= k - i < L2, +inf elsewhere.
    ndiag = L1 + L2 - 1
    skew_rows = []
    for i in range(L1):
        pieces = []
        if i > 0:
            pieces.append(jnp.full((i, TB), inf, dtype=jnp.float32))
        pieces.append(cost[i])
        if L1 - 1 - i > 0:
            pieces.append(jnp.full((L1 - 1 - i, TB), inf, dtype=jnp.float32))
        row = pieces[0] if len(pieces) == 1 else jnp.concatenate(pieces, axis=0)
        skew_rows.append(row)                              # (ndiag, TB)
    skew = jnp.stack(skew_rows, axis=0)                    # (L1, ndiag, TB)

    def diag_cost(k):
        return skew[:, k, :]                               # (L1, TB)

    def shift_down(x):
        # out[0] = +inf ; out[i] = x[i - 1]   (shift along the sublane axis)
        if x.shape[0] == 1:
            return jnp.full_like(x, inf)
        return jnp.concatenate(
            [jnp.full((1, TB), inf, dtype=jnp.float32), x[:-1, :]], axis=0)

    # ---- Anti-diagonal DTW dynamic program: L1+L2-1 serial steps. -----------
    # diag_k[i, :] = DTW[i, k - i, :]   (+inf where (i, k-i) is out of range)
    prev2 = jnp.full((L1, TB), inf, dtype=jnp.float32)     # diagonal k-2
    prev1 = diag_cost(0)                                   # diagonal k = 0
    for k in range(1, ndiag):
        up = shift_down(prev1)        # DTW[i-1, j  ]
        left = prev1                  # DTW[i,   j-1]
        dg = shift_down(prev2)        # DTW[i-1, j-1]
        best = jnp.minimum(jnp.minimum(up, left), dg)
        curr = diag_cost(k) + best
        prev2, prev1 = prev1, curr

    final = prev1[L1 - 1:, :]                              # (1, TB) = DTW[L1-1, L2-1]
    out_ref[0] = jnp.sqrt(final)


@jax.jit
def dtw_loss(s1, s2):
    """Pallas DTW loss. s1: (B, L1, D), s2: (B, L2, D) -> scalar f32."""
    s1 = s1.astype(jnp.float32)
    s2 = s2.astype(jnp.float32)
    B, L1, D = s1.shape
    _, L2, _ = s2.shape

    tb = _TILE_B
    bp = ((B + tb - 1) // tb) * tb          # batch padded to a lane multiple
    g = bp // tb                            # number of batch tiles (grid size)

    # Lane-major batch layout: (L, D, B_pad). Zero-padded lanes give DTW == 0
    # and are sliced away before the mean.
    s1t = jnp.pad(jnp.transpose(s1, (1, 2, 0)), ((0, 0), (0, 0), (0, bp - B)))
    s2t = jnp.pad(jnp.transpose(s2, (1, 2, 0)), ((0, 0), (0, 0), (0, bp - B)))

    per_batch = pl.pallas_call(
        _dtw_kernel,
        out_shape=jax.ShapeDtypeStruct((g, 1, tb), jnp.float32),
        grid=(g,),
        in_specs=[
            pl.BlockSpec((L1, D, tb), lambda i: (0, 0, i)),
            pl.BlockSpec((L2, D, tb), lambda i: (0, 0, i)),
        ],
        out_specs=pl.BlockSpec((1, 1, tb), lambda i: (i, 0, 0)),
        compiler_params=pltpu.CompilerParams(
            dimension_semantics=("parallel",)),
    )(s1t, s2t)

    # Final mean over the real (unpadded) batch entries, done in the wrapper
    # so the kernel's output stays lane-dense.
    return jnp.mean(per_batch.reshape(-1)[:B])


def _dtw_loss_ref(s1, s2):
    """NumPy reference mirroring the PyTorch module exactly."""
    s1 = np.asarray(s1, dtype=np.float32)
    s2 = np.asarray(s2, dtype=np.float32)
    B, L1, D = s1.shape
    L2 = s2.shape[1]
    DTW = np.full((B, L1, L2), np.inf, dtype=np.float32)
    DTW[:, 0, 0] = np.sum((s1[:, 0] - s2[:, 0]) ** 2, axis=1)
    for i in range(L1):
        for j in range(L2):
            if i > 0 or j > 0:
                c = np.sum((s1[:, i] - s2[:, j]) ** 2, axis=1)
                prev = []
                if i > 0:
                    prev.append(DTW[:, i - 1, j])
                if j > 0:
                    prev.append(DTW[:, i, j - 1])
                if i > 0 and j > 0:
                    prev.append(DTW[:, i - 1, j - 1])
                DTW[:, i, j] = c + np.min(np.stack(prev, axis=1), axis=1)
    return float(np.mean(np.sqrt(DTW[:, L1 - 1, L2 - 1])))


if __name__ == "__main__":
    key = jax.random.PRNGKey(0)
    k1, k2 = jax.random.split(key)
    B, L1, L2, D = 2, 8, 8, 32
    s1 = jax.random.normal(k1, (B, L1, D), dtype=jnp.float32)
    s2 = jax.random.normal(k2, (B, L2, D), dtype=jnp.float32)

    out = dtw_loss(s1, s2)
    out = jax.block_until_ready(out)

    ref = _dtw_loss_ref(np.asarray(s1), np.asarray(s2))
    assert np.allclose(float(out), ref, rtol=1e-4, atol=1e-4), (float(out), ref)

    print("KERNEL_OK")
</pallas_src>

<mosaic_0001>
module attributes {stable_mosaic.version = 11 : i64} {
  func.func @_dtw_kernel(%arg0: i32, %arg1: memref<8x32x128xf32, #tpu.memory_space<vmem>>, %arg2: memref<8x32x128xf32, #tpu.memory_space<vmem>>, %arg3: memref<1x1x128xf32, #tpu.memory_space<vmem>>) attributes {dimension_semantics = [#tpu.dimension_semantics<parallel>], iteration_bounds = array<i64: 1>, scalar_prefetch = 0 : i64, scratch_operands = 0 : i64, tpu.core_type = #tpu.core_type<tc>, window_params = [{transform_indices = @transform_0, window_bounds = array<i64: 8, 32, 128>}, {transform_indices = @transform_1, window_bounds = array<i64: 8, 32, 128>}, {transform_indices = @transform_2, window_bounds = array<i64: 1, 1, 128>}]} {
    %c0 = arith.constant 0 : index
    %c0_0 = arith.constant 0 : index
    %c0_1 = arith.constant 0 : index
    %0 = vector.load %arg1[%c0, %c0_0, %c0_1] : memref<8x32x128xf32, #tpu.memory_space<vmem>>, vector<8x32x128xf32>
    %c0_2 = arith.constant 0 : index
    %c0_3 = arith.constant 0 : index
    %c0_4 = arith.constant 0 : index
    %1 = vector.load %arg2[%c0_2, %c0_3, %c0_4] : memref<8x32x128xf32, #tpu.memory_space<vmem>>, vector<8x32x128xf32>
    %2 = vector.shape_cast %0 : vector<8x32x128xf32> to vector<8x1x32x128xf32>
    %3 = vector.shape_cast %1 : vector<8x32x128xf32> to vector<1x8x32x128xf32>
    %4 = vector.broadcast %2 : vector<8x1x32x128xf32> to vector<8x8x32x128xf32>
    %5 = vector.broadcast %3 : vector<1x8x32x128xf32> to vector<8x8x32x128xf32>
    %6 = arith.subf %4, %5 : vector<8x8x32x128xf32>
    %7 = arith.mulf %6, %6 : vector<8x8x32x128xf32>
    %cst = arith.constant dense<0.000000e+00> : vector<8x8x128xf32>
    %8 = vector.multi_reduction <add>, %7, %cst [2] : vector<8x8x32x128xf32> to vector<8x8x128xf32>
    %9 = vector.extract_strided_slice %8 {offsets = [0, 0, 0], sizes = [1, 8, 128], strides = [1, 1, 1]} : vector<8x8x128xf32> to vector<1x8x128xf32>
    %10 = vector.shape_cast %9 : vector<1x8x128xf32> to vector<8x128xf32>
    %cst_5 = arith.constant 0x7F800000 : f32
    %11 = vector.broadcast %cst_5 : f32 to vector<7x128xf32>
    %12 = tpu.concatenate %10, %11 in 0 : vector<8x128xf32>, vector<7x128xf32> -> vector<15x128xf32>
    %cst_6 = arith.constant 0x7F800000 : f32
    %13 = vector.broadcast %cst_6 : f32 to vector<1x128xf32>
    %14 = vector.extract_strided_slice %8 {offsets = [1, 0, 0], sizes = [1, 8, 128], strides = [1, 1, 1]} : vector<8x8x128xf32> to vector<1x8x128xf32>
    %15 = vector.shape_cast %14 : vector<1x8x128xf32> to vector<8x128xf32>
    %cst_7 = arith.constant 0x7F800000 : f32
    %16 = vector.broadcast %cst_7 : f32 to vector<6x128xf32>
    %17 = tpu.concatenate %13, %15, %16 in 0 : vector<1x128xf32>, vector<8x128xf32>, vector<6x128xf32> -> vector<15x128xf32>
    %cst_8 = arith.constant 0x7F800000 : f32
    %18 = vector.broadcast %cst_8 : f32 to vector<2x128xf32>
    %19 = vector.extract_strided_slice %8 {offsets = [2, 0, 0], sizes = [1, 8, 128], strides = [1, 1, 1]} : vector<8x8x128xf32> to vector<1x8x128xf32>
    %20 = vector.shape_cast %19 : vector<1x8x128xf32> to vector<8x128xf32>
    %cst_9 = arith.constant 0x7F800000 : f32
    %21 = vector.broadcast %cst_9 : f32 to vector<5x128xf32>
    %22 = tpu.concatenate %18, %20, %21 in 0 : vector<2x128xf32>, vector<8x128xf32>, vector<5x128xf32> -> vector<15x128xf32>
    %cst_10 = arith.constant 0x7F800000 : f32
    %23 = vector.broadcast %cst_10 : f32 to vector<3x128xf32>
    %24 = vector.extract_strided_slice %8 {offsets = [3, 0, 0], sizes = [1, 8, 128], strides = [1, 1, 1]} : vector<8x8x128xf32> to vector<1x8x128xf32>
    %25 = vector.shape_cast %24 : vector<1x8x128xf32> to vector<8x128xf32>
    %cst_11 = arith.constant 0x7F800000 : f32
    %26 = vector.broadcast %cst_11 : f32 to vector<4x128xf32>
    %27 = tpu.concatenate %23, %25, %26 in 0 : vector<3x128xf32>, vector<8x128xf32>, vector<4x128xf32> -> vector<15x128xf32>
    %cst_12 = arith.constant 0x7F800000 : f32
    %28 = vector.broadcast %cst_12 : f32 to vector<4x128xf32>
    %29 = vector.extract_strided_slice %8 {offsets = [4, 0, 0], sizes = [1, 8, 128], strides = [1, 1, 1]} : vector<8x8x128xf32> to vector<1x8x128xf32>
    %30 = vector.shape_cast %29 : vector<1x8x128xf32> to vector<8x128xf32>
    %cst_13 = arith.constant 0x7F800000 : f32
    %31 = vector.broadcast %cst_13 : f32 to vector<3x128xf32>
    %32 = tpu.concatenate %28, %30, %31 in 0 : vector<4x128xf32>, vector<8x128xf32>, vector<3x128xf32> -> vector<15x128xf32>
    %cst_14 = arith.constant 0x7F800000 : f32
    %33 = vector.broadcast %cst_14 : f32 to vector<5x128xf32>
    %34 = vector.extract_strided_slice %8 {offsets = [5, 0, 0], sizes = [1, 8, 128], strides = [1, 1, 1]} : vector<8x8x128xf32> to vector<1x8x128xf32>
    %35 = vector.shape_cast %34 : vector<1x8x128xf32> to vector<8x128xf32>
    %cst_15 = arith.constant 0x7F800000 : f32
    %36 = vector.broadcast %cst_15 : f32 to vector<2x128xf32>
    %37 = tpu.concatenate %33, %35, %36 in 0 : vector<5x128xf32>, vector<8x128xf32>, vector<2x128xf32> -> vector<15x128xf32>
    %cst_16 = arith.constant 0x7F800000 : f32
    %38 = vector.broadcast %cst_16 : f32 to vector<6x128xf32>
    %39 = vector.extract_strided_slice %8 {offsets = [6, 0, 0], sizes = [1, 8, 128], strides = [1, 1, 1]} : vector<8x8x128xf32> to vector<1x8x128xf32>
    %40 = vector.shape_cast %39 : vector<1x8x128xf32> to vector<8x128xf32>
    %cst_17 = arith.constant 0x7F800000 : f32
    %41 = vector.broadcast %cst_17 : f32 to vector<1x128xf32>
    %42 = tpu.concatenate %38, %40, %41 in 0 : vector<6x128xf32>, vector<8x128xf32>, vector<1x128xf32> -> vector<15x128xf32>
    %cst_18 = arith.constant 0x7F800000 : f32
    %43 = vector.broadcast %cst_18 : f32 to vector<7x128xf32>
    %44 = vector.extract_strided_slice %8 {offsets = [7, 0, 0], sizes = [1, 8, 128], strides = [1, 1, 1]} : vector<8x8x128xf32> to vector<1x8x128xf32>
    %45 = vector.shape_cast %44 : vector<1x8x128xf32> to vector<8x128xf32>
    %46 = tpu.concatenate %43, %45 in 0 : vector<7x128xf32>, vector<8x128xf32> -> vector<15x128xf32>
    %47 = vector.shape_cast %12 : vector<15x128xf32> to vector<1x15x128xf32>
    %48 = vector.shape_cast %17 : vector<15x128xf32> to vector<1x15x128xf32>
    %49 = vector.shape_cast %22 : vector<15x128xf32> to vector<1x15x128xf32>
    %50 = vector.shape_cast %27 : vector<15x128xf32> to vector<1x15x128xf32>
    %51 = vector.shape_cast %32 : vector<15x128xf32> to vector<1x15x128xf32>
    %52 = vector.shape_cast %37 : vector<15x128xf32> to vector<1x15x128xf32>
    %53 = vector.shape_cast %42 : vector<15x128xf32> to vector<1x15x128xf32>
    %54 = vector.shape_cast %46 : vector<15x128xf32> to vector<1x15x128xf32>
    %55 = tpu.concatenate %47, %48, %49, %50, %51, %52, %53, %54 in 0 : vector<1x15x128xf32>, vector<1x15x128xf32>, vector<1x15x128xf32>, vector<1x15x128xf32>, vector<1x15x128xf32>, vector<1x15x128xf32>, vector<1x15x128xf32>, vector<1x15x128xf32> -> vector<8x15x128xf32>
    %cst_19 = arith.constant 0x7F800000 : f32
    %56 = vector.broadcast %cst_19 : f32 to vector<8x128xf32>
    %57 = vector.extract_strided_slice %55 {offsets = [0, 0, 0], sizes = [8, 1, 128], strides = [1, 1, 1]} : vector<8x15x128xf32> to vector<8x1x128xf32>
    %58 = vector.shape_cast %57 : vector<8x1x128xf32> to vector<8x128xf32>
    %cst_20 = arith.constant 0x7F800000 : f32
    %59 = vector.broadcast %cst_20 : f32 to vector<1x128xf32>
    %60 = vector.extract_strided_slice %58 {offsets = [0, 0], sizes = [7, 128], strides = [1, 1]} : vector<8x128xf32> to vector<7x128xf32>
    %61 = tpu.concatenate %59, %60 in 0 : vector<1x128xf32>, vector<7x128xf32> -> vector<8x128xf32>
    %cst_21 = arith.constant 0x7F800000 : f32
    %62 = vector.broadcast %cst_21 : f32 to vector<1x128xf32>
    %63 = vector.extract_strided_slice %56 {offsets = [0, 0], sizes = [7, 128], strides = [1, 1]} : vector<8x128xf32> to vector<7x128xf32>
    %64 = tpu.concatenate %62, %63 in 0 : vector<1x128xf32>, vector<7x128xf32> -> vector<8x128xf32>
    %65 = arith.minimumf %61, %58 : vector<8x128xf32>
    %66 = arith.minimumf %65, %64 : vector<8x128xf32>
    %67 = vector.extract_strided_slice %55 {offsets = [0, 1, 0], sizes = [8, 1, 128], strides = [1, 1, 1]} : vector<8x15x128xf32> to vector<8x1x128xf32>
    %68 = vector.shape_cast %67 : vector<8x1x128xf32> to vector<8x128xf32>
    %69 = arith.addf %68, %66 : vector<8x128xf32>
    %cst_22 = arith.constant 0x7F800000 : f32
    %70 = vector.broadcast %cst_22 : f32 to vector<1x128xf32>
    %71 = vector.extract_strided_slice %69 {offsets = [0, 0], sizes = [7, 128], strides = [1, 1]} : vector<8x128xf32> to vector<7x128xf32>
    %72 = tpu.concatenate %70, %71 in 0 : vector<1x128xf32>, vector<7x128xf32> -> vector<8x128xf32>
    %cst_23 = arith.constant 0x7F800000 : f32
    %73 = vector.broadcast %cst_23 : f32 to vector<1x128xf32>
    %74 = vector.extract_strided_slice %58 {offsets = [0, 0], sizes = [7, 128], strides = [1, 1]} : vector<8x128xf32> to vector<7x128xf32>
    %75 = tpu.concatenate %73, %74 in 0 : vector<1x128xf32>, vector<7x128xf32> -> vector<8x128xf32>
    %76 = arith.minimumf %72, %69 : vector<8x128xf32>
    %77 = arith.minimumf %76, %75 : vector<8x128xf32>
    %78 = vector.extract_strided_slice %55 {offsets = [0, 2, 0], sizes = [8, 1, 128], strides = [1, 1, 1]} : vector<8x15x128xf32> to vector<8x1x128xf32>
    %79 = vector.shape_cast %78 : vector<8x1x128xf32> to vector<8x128xf32>
    %80 = arith.addf %79, %77 : vector<8x128xf32>
    %cst_24 = arith.constant 0x7F800000 : f32
    %81 = vector.broadcast %cst_24 : f32 to vector<1x128xf32>
    %82 = vector.extract_strided_slice %80 {offsets = [0, 0], sizes = [7, 128], strides = [1, 1]} : vector<8x128xf32> to vector<7x128xf32>
    %83 = tpu.concatenate %81, %82 in 0 : vector<1x128xf32>, vector<7x128xf32> -> vector<8x128xf32>
    %cst_25 = arith.constant 0x7F800000 : f32
    %84 = vector.broadcast %cst_25 : f32 to vector<1x128xf32>
    %85 = vector.extract_strided_slice %69 {offsets = [0, 0], sizes = [7, 128], strides = [1, 1]} : vector<8x128xf32> to vector<7x128xf32>
    %86 = tpu.concatenate %84, %85 in 0 : vector<1x128xf32>, vector<7x128xf32> -> vector<8x128xf32>
    %87 = arith.minimumf %83, %80 : vector<8x128xf32>
    %88 = arith.minimumf %87, %86 : vector<8x128xf32>
    %89 = vector.extract_strided_slice %55 {offsets = [0, 3, 0], sizes = [8, 1, 128], strides = [1, 1, 1]} : vector<8x15x128xf32> to vector<8x1x128xf32>
    %90 = vector.shape_cast %89 : vector<8x1x128xf32> to vector<8x128xf32>
    %91 = arith.addf %90, %88 : vector<8x128xf32>
    %cst_26 = arith.constant 0x7F800000 : f32
    %92 = vector.broadcast %cst_26 : f32 to vector<1x128xf32>
    %93 = vector.extract_strided_slice %91 {offsets = [0, 0], sizes = [7, 128], strides = [1, 1]} : vector<8x128xf32> to vector<7x128xf32>
    %94 = tpu.concatenate %92, %93 in 0 : vector<1x128xf32>, vector<7x128xf32> -> vector<8x128xf32>
    %cst_27 = arith.constant 0x7F800000 : f32
    %95 = vector.broadcast %cst_27 : f32 to vector<1x128xf32>
    %96 = vector.extract_strided_slice %80 {offsets = [0, 0], sizes = [7, 128], strides = [1, 1]} : vector<8x128xf32> to vector<7x128xf32>
    %97 = tpu.concatenate %95, %96 in 0 : vector<1x128xf32>, vector<7x128xf32> -> vector<8x128xf32>
    %98 = arith.minimumf %94, %91 : vector<8x128xf32>
    %99 = arith.minimumf %98, %97 : vector<8x128xf32>
    %100 = vector.extract_strided_slice %55 {offsets = [0, 4, 0], sizes = [8, 1, 128], strides = [1, 1, 1]} : vector<8x15x128xf32> to vector<8x1x128xf32>
    %101 = vector.shape_cast %100 : vector<8x1x128xf32> to vector<8x128xf32>
    %102 = arith.addf %101, %99 : vector<8x128xf32>
    %cst_28 = arith.constant 0x7F800000 : f32
    %103 = vector.broadcast %cst_28 : f32 to vector<1x128xf32>
    %104 = vector.extract_strided_slice %102 {offsets = [0, 0], sizes = [7, 128], strides = [1, 1]} : vector<8x128xf32> to vector<7x128xf32>
    %105 = tpu.concatenate %103, %104 in 0 : vector<1x128xf32>, vector<7x128xf32> -> vector<8x128xf32>
    %cst_29 = arith.constant 0x7F800000 : f32
    %106 = vector.broadcast %cst_29 : f32 to vector<1x128xf32>
    %107 = vector.extract_strided_slice %91 {offsets = [0, 0], sizes = [7, 128], strides = [1, 1]} : vector<8x128xf32> to vector<7x128xf32>
    %108 = tpu.concatenate %106, %107 in 0 : vector<1x128xf32>, vector<7x128xf32> -> vector<8x128xf32>
    %109 = arith.minimumf %105, %102 : vector<8x128xf32>
    %110 = arith.minimumf %109, %108 : vector<8x128xf32>
    %111 = vector.extract_strided_slice %55 {offsets = [0, 5, 0], sizes = [8, 1, 128], strides = [1, 1, 1]} : vector<8x15x128xf32> to vector<8x1x128xf32>
    %112 = vector.shape_cast %111 : vector<8x1x128xf32> to vector<8x128xf32>
    %113 = arith.addf %112, %110 : vector<8x128xf32>
    %cst_30 = arith.constant 0x7F800000 : f32
    %114 = vector.broadcast %cst_30 : f32 to vector<1x128xf32>
    %115 = vector.extract_strided_slice %113 {offsets = [0, 0], sizes = [7, 128], strides = [1, 1]} : vector<8x128xf32> to vector<7x128xf32>
    %116 = tpu.concatenate %114, %115 in 0 : vector<1x128xf32>, vector<7x128xf32> -> vector<8x128xf32>
    %cst_31 = arith.constant 0x7F800000 : f32
    %117 = vector.broadcast %cst_31 : f32 to vector<1x128xf32>
    %118 = vector.extract_strided_slice %102 {offsets = [0, 0], sizes = [7, 128], strides = [1, 1]} : vector<8x128xf32> to vector<7x128xf32>
    %119 = tpu.concatenate %117, %118 in 0 : vector<1x128xf32>, vector<7x128xf32> -> vector<8x128xf32>
    %120 = arith.minimumf %116, %113 : vector<8x128xf32>
    %121 = arith.minimumf %120, %119 : vector<8x128xf32>
    %122 = vector.extract_strided_slice %55 {offsets = [0, 6, 0], sizes = [8, 1, 128], strides = [1, 1, 1]} : vector<8x15x128xf32> to vector<8x1x128xf32>
    %123 = vector.shape_cast %122 : vector<8x1x128xf32> to vector<8x128xf32>
    %124 = arith.addf %123, %121 : vector<8x128xf32>
    %cst_32 = arith.constant 0x7F800000 : f32
    %125 = vector.broadcast %cst_32 : f32 to vector<1x128xf32>
    %126 = vector.extract_strided_slice %124 {offsets = [0, 0], sizes = [7, 128], strides = [1, 1]} : vector<8x128xf32> to vector<7x128xf32>
    %127 = tpu.concatenate %125, %126 in 0 : vector<1x128xf32>, vector<7x128xf32> -> vector<8x128xf32>
    %cst_33 = arith.constant 0x7F800000 : f32
    %128 = vector.broadcast %cst_33 : f32 to vector<1x128xf32>
    %129 = vector.extract_strided_slice %113 {offsets = [0, 0], sizes = [7, 128], strides = [1, 1]} : vector<8x128xf32> to vector<7x128xf32>
    %130 = tpu.concatenate %128, %129 in 0 : vector<1x128xf32>, vector<7x128xf32> -> vector<8x128xf32>
    %131 = arith.minimumf %127, %124 : vector<8x128xf32>
    %132 = arith.minimumf %131, %130 : vector<8x128xf32>
    %133 = vector.extract_strided_slice %55 {offsets = [0, 7, 0], sizes = [8, 1, 128], strides = [1, 1, 1]} : vector<8x15x128xf32> to vector<8x1x128xf32>
    %134 = vector.shape_cast %133 : vector<8x1x128xf32> to vector<8x128xf32>
    %135 = arith.addf %134, %132 : vector<8x128xf32>
    %cst_34 = arith.constant 0x7F800000 : f32
    %136 = vector.broadcast %cst_34 : f32 to vector<1x128xf32>
    %137 = vector.extract_strided_slice %135 {offsets = [0, 0], sizes = [7, 128], strides = [1, 1]} : vector<8x128xf32> to vector<7x128xf32>
    %138 = tpu.concatenate %136, %137 in 0 : vector<1x128xf32>, vector<7x128xf32> -> vector<8x128xf32>
    %cst_35 = arith.constant 0x7F800000 : f32
    %139 = vector.broadcast %cst_35 : f32 to vector<1x128xf32>
    %140 = vector.extract_strided_slice %124 {offsets = [0, 0], sizes = [7, 128], strides = [1, 1]} : vector<8x128xf32> to vector<7x128xf32>
    %141 = tpu.concatenate %139, %140 in 0 : vector<1x128xf32>, vector<7x128xf32> -> vector<8x128xf32>
    %142 = arith.minimumf %138, %135 : vector<8x128xf32>
    %143 = arith.minimumf %142, %141 : vector<8x128xf32>
    %144 = vector.extract_strided_slice %55 {offsets = [0, 8, 0], sizes = [8, 1, 128], strides = [1, 1, 1]} : vector<8x15x128xf32> to vector<8x1x128xf32>
    %145 = vector.shape_cast %144 : vector<8x1x128xf32> to vector<8x128xf32>
    %146 = arith.addf %145, %143 : vector<8x128xf32>
    %cst_36 = arith.constant 0x7F800000 : f32
    %147 = vector.broadcast %cst_36 : f32 to vector<1x128xf32>
    %148 = vector.extract_strided_slice %146 {offsets = [0, 0], sizes = [7, 128], strides = [1, 1]} : vector<8x128xf32> to vector<7x128xf32>
    %149 = tpu.concatenate %147, %148 in 0 : vector<1x128xf32>, vector<7x128xf32> -> vector<8x128xf32>
    %cst_37 = arith.constant 0x7F800000 : f32
    %150 = vector.broadcast %cst_37 : f32 to vector<1x128xf32>
    %151 = vector.extract_strided_slice %135 {offsets = [0, 0], sizes = [7, 128], strides = [1, 1]} : vector<8x128xf32> to vector<7x128xf32>
    %152 = tpu.concatenate %150, %151 in 0 : vector<1x128xf32>, vector<7x128xf32> -> vector<8x128xf32>
    %153 = arith.minimumf %149, %146 : vector<8x128xf32>
    %154 = arith.minimumf %153, %152 : vector<8x128xf32>
    %155 = vector.extract_strided_slice %55 {offsets = [0, 9, 0], sizes = [8, 1, 128], strides = [1, 1, 1]} : vector<8x15x128xf32> to vector<8x1x128xf32>
    %156 = vector.shape_cast %155 : vector<8x1x128xf32> to vector<8x128xf32>
    %157 = arith.addf %156, %154 : vector<8x128xf32>
    %cst_38 = arith.constant 0x7F800000 : f32
    %158 = vector.broadcast %cst_38 : f32 to vector<1x128xf32>
    %159 = vector.extract_strided_slice %157 {offsets = [0, 0], sizes = [7, 128], strides = [1, 1]} : vector<8x128xf32> to vector<7x128xf32>
    %160 = tpu.concatenate %158, %159 in 0 : vector<1x128xf32>, vector<7x128xf32> -> vector<8x128xf32>
    %cst_39 = arith.constant 0x7F800000 : f32
    %161 = vector.broadcast %cst_39 : f32 to vector<1x128xf32>
    %162 = vector.extract_strided_slice %146 {offsets = [0, 0], sizes = [7, 128], strides = [1, 1]} : vector<8x128xf32> to vector<7x128xf32>
    %163 = tpu.concatenate %161, %162 in 0 : vector<1x128xf32>, vector<7x128xf32> -> vector<8x128xf32>
    %164 = arith.minimumf %160, %157 : vector<8x128xf32>
    %165 = arith.minimumf %164, %163 : vector<8x128xf32>
    %166 = vector.extract_strided_slice %55 {offsets = [0, 10, 0], sizes = [8, 1, 128], strides = [1, 1, 1]} : vector<8x15x128xf32> to vector<8x1x128xf32>
    %167 = vector.shape_cast %166 : vector<8x1x128xf32> to vector<8x128xf32>
    %168 = arith.addf %167, %165 : vector<8x128xf32>
    %cst_40 = arith.constant 0x7F800000 : f32
    %169 = vector.broadcast %cst_40 : f32 to vector<1x128xf32>
    %170 = vector.extract_strided_slice %168 {offsets = [0, 0], sizes = [7, 128], strides = [1, 1]} : vector<8x128xf32> to vector<7x128xf32>
    %171 = tpu.concatenate %169, %170 in 0 : vector<1x128xf32>, vector<7x128xf32> -> vector<8x128xf32>
    %cst_41 = arith.constant 0x7F800000 : f32
    %172 = vector.broadcast %cst_41 : f32 to vector<1x128xf32>
    %173 = vector.extract_strided_slice %157 {offsets = [0, 0], sizes = [7, 128], strides = [1, 1]} : vector<8x128xf32> to vector<7x128xf32>
    %174 = tpu.concatenate %172, %173 in 0 : vector<1x128xf32>, vector<7x128xf32> -> vector<8x128xf32>
    %175 = arith.minimumf %171, %168 : vector<8x128xf32>
    %176 = arith.minimumf %175, %174 : vector<8x128xf32>
    %177 = vector.extract_strided_slice %55 {offsets = [0, 11, 0], sizes = [8, 1, 128], strides = [1, 1, 1]} : vector<8x15x128xf32> to vector<8x1x128xf32>
    %178 = vector.shape_cast %177 : vector<8x1x128xf32> to vector<8x128xf32>
    %179 = arith.addf %178, %176 : vector<8x128xf32>
    %cst_42 = arith.constant 0x7F800000 : f32
    %180 = vector.broadcast %cst_42 : f32 to vector<1x128xf32>
    %181 = vector.extract_strided_slice %179 {offsets = [0, 0], sizes = [7, 128], strides = [1, 1]} : vector<8x128xf32> to vector<7x128xf32>
    %182 = tpu.concatenate %180, %181 in 0 : vector<1x128xf32>, vector<7x128xf32> -> vector<8x128xf32>
    %cst_43 = arith.constant 0x7F800000 : f32
    %183 = vector.broadcast %cst_43 : f32 to vector<1x128xf32>
    %184 = vector.extract_strided_slice %168 {offsets = [0, 0], sizes = [7, 128], strides = [1, 1]} : vector<8x128xf32> to vector<7x128xf32>
    %185 = tpu.concatenate %183, %184 in 0 : vector<1x128xf32>, vector<7x128xf32> -> vector<8x128xf32>
    %186 = arith.minimumf %182, %179 : vector<8x128xf32>
    %187 = arith.minimumf %186, %185 : vector<8x128xf32>
    %188 = vector.extract_strided_slice %55 {offsets = [0, 12, 0], sizes = [8, 1, 128], strides = [1, 1, 1]} : vector<8x15x128xf32> to vector<8x1x128xf32>
    %189 = vector.shape_cast %188 : vector<8x1x128xf32> to vector<8x128xf32>
    %190 = arith.addf %189, %187 : vector<8x128xf32>
    %cst_44 = arith.constant 0x7F800000 : f32
    %191 = vector.broadcast %cst_44 : f32 to vector<1x128xf32>
    %192 = vector.extract_strided_slice %190 {offsets = [0, 0], sizes = [7, 128], strides = [1, 1]} : vector<8x128xf32> to vector<7x128xf32>
    %193 = tpu.concatenate %191, %192 in 0 : vector<1x128xf32>, vector<7x128xf32> -> vector<8x128xf32>
    %cst_45 = arith.constant 0x7F800000 : f32
    %194 = vector.broadcast %cst_45 : f32 to vector<1x128xf32>
    %195 = vector.extract_strided_slice %179 {offsets = [0, 0], sizes = [7, 128], strides = [1, 1]} : vector<8x128xf32> to vector<7x128xf32>
    %196 = tpu.concatenate %194, %195 in 0 : vector<1x128xf32>, vector<7x128xf32> -> vector<8x128xf32>
    %197 = arith.minimumf %193, %190 : vector<8x128xf32>
    %198 = arith.minimumf %197, %196 : vector<8x128xf32>
    %199 = vector.extract_strided_slice %55 {offsets = [0, 13, 0], sizes = [8, 1, 128], strides = [1, 1, 1]} : vector<8x15x128xf32> to vector<8x1x128xf32>
    %200 = vector.shape_cast %199 : vector<8x1x128xf32> to vector<8x128xf32>
    %201 = arith.addf %200, %198 : vector<8x128xf32>
    %cst_46 = arith.constant 0x7F800000 : f32
    %202 = vector.broadcast %cst_46 : f32 to vector<1x128xf32>
    %203 = vector.extract_strided_slice %201 {offsets = [0, 0], sizes = [7, 128], strides = [1, 1]} : vector<8x128xf32> to vector<7x128xf32>
    %204 = tpu.concatenate %202, %203 in 0 : vector<1x128xf32>, vector<7x128xf32> -> vector<8x128xf32>
    %cst_47 = arith.constant 0x7F800000 : f32
    %205 = vector.broadcast %cst_47 : f32 to vector<1x128xf32>
    %206 = vector.extract_strided_slice %190 {offsets = [0, 0], sizes = [7, 128], strides = [1, 1]} : vector<8x128xf32> to vector<7x128xf32>
    %207 = tpu.concatenate %205, %206 in 0 : vector<1x128xf32>, vector<7x128xf32> -> vector<8x128xf32>
    %208 = arith.minimumf %204, %201 : vector<8x128xf32>
    %209 = arith.minimumf %208, %207 : vector<8x128xf32>
    %210 = vector.extract_strided_slice %55 {offsets = [0, 14, 0], sizes = [8, 1, 128], strides = [1, 1, 1]} : vector<8x15x128xf32> to vector<8x1x128xf32>
    %211 = vector.shape_cast %210 : vector<8x1x128xf32> to vector<8x128xf32>
    %212 = arith.addf %211, %209 : vector<8x128xf32>
    %213 = vector.extract_strided_slice %212 {offsets = [7, 0], sizes = [1, 128], strides = [1, 1]} : vector<8x128xf32> to vector<1x128xf32>
    %214 = math.sqrt %213 : vector<1x128xf32>
    %c0_48 = arith.constant 0 : index
    %c0_49 = arith.constant 0 : index
    %c0_50 = arith.constant 0 : index
    %215 = vector.load %arg3[%c0_48, %c0_49, %c0_50] : memref<1x1x128xf32, #tpu.memory_space<vmem>>, vector<1x1x128xf32>
    %216 = vector.shape_cast %215 : vector<1x1x128xf32> to vector<1x128xf32>
    %217 = vector.shape_cast %214 : vector<1x128xf32> to vector<1x1x128xf32>
    tpu.vector_store %arg3[%c0_48, %c0_49, %c0_50], %217 {strides = array<i32>} : memref<1x1x128xf32, #tpu.memory_space<vmem>>, vector<1x1x128xf32>,
    return
  }
  func.func @transform_0(%arg0: i32) -> (i32, i32, i32) {
    %c0_i32 = arith.constant 0 : i32
    %c0_i32_0 = arith.constant 0 : i32
    %c0_i32_1 = arith.constant 0 : i32
    return %c0_i32, %c0_i32_0, %arg0 : i32, i32, i32
  }
  func.func @transform_1(%arg0: i32) -> (i32, i32, i32) {
    %c0_i32 = arith.constant 0 : i32
    %c0_i32_0 = arith.constant 0 : i32
    %c0_i32_1 = arith.constant 0 : i32
    return %c0_i32, %c0_i32_0, %arg0 : i32, i32, i32
  }
  func.func @transform_2(%arg0: i32) -> (i32, i32, i32) {
    %c0_i32 = arith.constant 0 : i32
    %c0_i32_0 = arith.constant 0 : i32
    %c0_i32_1 = arith.constant 0 : i32
    return %arg0, %c0_i32, %c0_i32_0 : i32, i32, i32
  }
}

</mosaic_0001>

<bundles_post_ra>
// kernel: dtw_loss.1
= control target key start
LH: loop header
LB: loop body
LE: loop exit
PB: predicated region body
PF: predicated region fallthrough
CT: control target
= control target key end

     0   :  { %vm1171_vm0 = vcmask 1041409   ;;  %vm1173_vm1 = vcmask 1042434   ;;  %vm1175_vm2 = vcmask 1043459   ;;  %vm1177_vm3 = vcmask 1044484   ;;  %s5347_s0 = inlined_call_operand.vmem [shape: f32[8,32,128], index: 0, kind: input, shape index: {}]   ;;  %s5348_s1 = inlined_call_operand.vmem [shape: f32[8,32,128], index: 1, kind: input, shape index: {}]   ;;  %s5349_s2 = inlined_call_operand.vmem [shape: f32[1,1,128], index: 2, kind: output, shape index: {}]  }
   0x1   :  { %v2212_v0 = vld [vmem:[%s5347_s0] sm:$0xff]  ;;  %v2217_v1 = vld [vmem:[%s5347_s0 + $0x8] sm:$0xff]  ;;  %v2222_v2 = vld [vmem:[%s5347_s0 + $0x10] sm:$0xff]  ;;  %vm1179_vm4 = vcmask 1045509   ;;  %vm1181_vm5 = vcmask 1046534   ;;  %vm1183_vm6 = vcmask 1047559  }
   0x2   :  { %v2227_v3 = vld [vmem:[%s5347_s0 + $0x18] sm:$0xff]  ;;  %v2232_v4 = vld [vmem:[%s5347_s0 + $0x20] sm:$0xff]  ;;  %v2237_v5 = vld [vmem:[%s5347_s0 + $0x28] sm:$0xff]  ;;  %vm1221_vm7 = vcmask 1041408   ;;  %vm1202_vm8 = vcmask 1040384   ;;  %vm1240_vm9 = vcmask 1042432  }
   0x3   :  { %v2242_v6 = vld [vmem:[%s5347_s0 + $0x30] sm:$0xff]  ;;  %v2247_v7 = vld [vmem:[%s5347_s0 + $0x40] sm:$0xff]  ;;  %v2262_v10 = vld [vmem:[%s5347_s0 + $0x38] sm:$0xff]  ;;  %vm1259_vm10 = vcmask 1043456   ;;  %vm1278_vm11 = vcmask 1044480   ;;  %vm1297_vm12 = vcmask 1045504  }
   0x4   :  { %v2252_v8 = vld [vmem:[%s5347_s0 + $0x60] sm:$0xff]  ;;  %v2267_v11 = vld [vmem:[%s5348_s1 + $0x8] sm:$0xff]  ;;  %v2272_v12 = vld [vmem:[%s5348_s1 + $0x10] sm:$0xff]  ;;  %vm1316_vm13 = vcmask 1046528  }
   0x5   :  { %v2257_v9 = vld [vmem:[%s5348_s1] sm:$0xff]  ;;  %v2277_v13 = vld [vmem:[%s5348_s1 + $0x18] sm:$0xff]  ;;  %v2287_v15 = vld [vmem:[%s5348_s1 + $0x28] sm:$0xff]  ;;  %v2342_v27 = vsub.f32 %v2217_v1, %v2267_v11  ;;  %v2346_v28 = vsub.f32 %v2222_v2, %v2272_v12  ;;  %v2354_v30 = vsub.f32 %v2237_v5, %v2267_v11  ;;  %v2385_v37 = vsub.f32 %v2242_v6, %v2272_v12 }
   0x6   :  { %v2282_v14 = vld [vmem:[%s5348_s1 + $0x20] sm:$0xff]  ;;  %v2292_v16 = vld [vmem:[%s5348_s1 + $0x30] sm:$0xff]  ;;  %v2297_v17 = vld [vmem:[%s5348_s1 + $0x38] sm:$0xff]  ;;  %v2311_v20 = vsub.f32 %v2212_v0, %v2257_v9  ;;  %v2315_v21 = vsub.f32 %v2232_v4, %v2257_v9  ;;  %v2319_v22 = vsub.f32 %v2247_v7, %v2257_v9  ;;  %v2323_v23 = vsub.f32 %v2252_v8, %v2257_v9 }
   0x7   :  { %v2302_v18 = vld [vmem:[%s5348_s1 + $0x40] sm:$0xff]  ;;  %v2307_v19 = vld [vmem:[%s5348_s1 + $0x48] sm:$0xff]  ;;  %v2328_v24 = vld [vmem:[%s5348_s1 + $0x50] sm:$0xff]  ;;  %v2350_v29 = vsub.f32 %v2227_v3, %v2277_v13  ;;  %5354 = vst [vmem:[#allocation5_spill] sm:$0xff] %v2354_v30  ;;  %v2373_v34 = vsub.f32 %v2212_v0, %v2282_v14  ;;  %v2377_v35 = vsub.f32 %v2217_v1, %v2287_v15  ;;  %v2381_v36 = vsub.f32 %v2222_v2, %v2292_v16 }
   0x8   :  { %5351 = vst [vmem:[#allocation2_spill] sm:$0xff] %v2315_v21  ;;  %5352 = vst [vmem:[#allocation3_spill] sm:$0xff] %v2319_v22  ;;  %v2333_v25 = vld [vmem:[%s5348_s1 + $0x58] sm:$0xff]  ;;  %v2338_v26 = vld [vmem:[%s5348_s1 + $0x60] sm:$0xff]  ;;  %v2404_v41 = vsub.f32 %v2227_v3, %v2297_v17  ;;  %v2408_v42 = vsub.f32 %v2212_v0, %v2302_v18  ;;  %v2412_v43 = vsub.f32 %v2217_v1, %v2307_v19 }
   0x9   :  { %5353 = vst [vmem:[#allocation4_spill] sm:$0xff] %v2323_v23  ;;  %v2359_v31 = vld [vmem:[%s5348_s1 + $0x68] sm:$0xff]  ;;  %v2364_v32 = vld [vmem:[%s5348_s1 + $0x70] sm:$0xff]  ;;  %v2369_v33 = vld [vmem:[%s5348_s1 + $0x78] sm:$0xff]  ;;  %v2416_v44 = vsub.f32 %v2262_v10, %v2277_v13  ;;  %v2435_v48 = vsub.f32 %v2222_v2, %v2328_v24  ;;  %v2439_v49 = vsub.f32 %v2227_v3, %v2333_v25  ;;  %v2443_v50 = vsub.f32 %v2212_v0, %v2338_v26 }
   0xa   :  { %5355 = vst [vmem:[#allocation6_spill] sm:$0xff] %v2385_v37  ;;  %v2390_v38 = vld [vmem:[%s5348_s1 + $0x80] sm:$0xff]  ;;  %v2395_v39 = vld [vmem:[%s5348_s1 + $0x88] sm:$0xff]  ;;  %v2400_v40 = vld [vmem:[%s5348_s1 + $0x90] sm:$0xff]  ;;  %v2447_v51 = vsub.f32 %v2232_v4, %v2282_v14  ;;  %v2466_v55 = vsub.f32 %v2217_v1, %v2359_v31  ;;  %v2470_v56 = vsub.f32 %v2222_v2, %v2364_v32  ;;  %v2474_v57 = vsub.f32 %v2227_v3, %v2369_v33 }
   0xb   :  { %5356 = vst [vmem:[#allocation7_spill] sm:$0xff] %v2416_v44  ;;  %v2421_v45 = vld [vmem:[%s5348_s1 + $0x98] sm:$0xff]  ;;  %v2426_v46 = vld [vmem:[%s5348_s1 + $0xa0] sm:$0xff]  ;;  %v2431_v47 = vld [vmem:[%s5348_s1 + $0xa8] sm:$0xff]  ;;  %v2478_v58 = vsub.f32 %v2237_v5, %v2287_v15  ;;  %v2497_v62 = vsub.f32 %v2212_v0, %v2390_v38  ;;  %v2501_v63 = vsub.f32 %v2217_v1, %v2395_v39  ;;  %v2505_v23 = vsub.f32 %v2222_v2, %v2400_v40 }
   0xc   :  { %5357 = vst [vmem:[#allocation8_spill] sm:$0xff] %v2447_v51  ;;  %v2452_v52 = vld [vmem:[%s5348_s1 + $0xb0] sm:$0xff]  ;;  %v2457_v53 = vld [vmem:[%s5348_s1 + $0xb8] sm:$0xff]  ;;  %v2462_v54 = vld [vmem:[%s5348_s1 + $0xc0] sm:$0xff]  ;;  %v2509_v22 = vsub.f32 %v2242_v6, %v2292_v16  ;;  %v2528_v37 = vsub.f32 %v2227_v3, %v2421_v45  ;;  %v2536_v30 = vsub.f32 %v2217_v1, %v2431_v47  ;;  %v2540_v21 = vsub.f32 %v2262_v10, %v2297_v17 }
   0xd   :  { %5358 = vst [vmem:[#allocation9_spill] sm:$0xff] %v2478_v58  ;;  %v2483_v59 = vld [vmem:[%s5348_s1 + $0xc8] sm:$0xff]  ;;  %v2488_v60 = vld [vmem:[%s5348_s1 + $0xd0] sm:$0xff]  ;;  %v2493_v61 = vld [vmem:[%s5348_s1 + $0xd8] sm:$0xff] }
   0xe   :  { %5359 = vst [vmem:[#allocation10_spill] sm:$0xff] %v2497_v62  ;;  %5360 = vst [vmem:[#allocation11_spill] sm:$0xff] %v2501_v63  ;;  %v2514_v58 = vld [vmem:[%s5348_s1 + $0xe0] sm:$0xff]  ;;  %v2519_v51 = vld [vmem:[%s5348_s1 + $0xe8] sm:$0xff]  ;;  %v2565_v63 = vsub.f32 %v2217_v1, %v2483_v59  ;;  %v2569_v62 = vsub.f32 %v2222_v2, %v2488_v60 }
   0xf   :  { %5361 = vst [vmem:[#allocation12_spill] sm:$0xff] %v2505_v23  ;;  %5362 = vst [vmem:[#allocation13_spill] sm:$0xff] %v2509_v22  ;;  %v2524_v44 = vld [vmem:[%s5348_s1 + $0xf0] sm:$0xff]  ;;  %v2532_v22 = vsub.f32 %v2212_v0, %v2426_v46  ;;  %v2545_v23 = vld [vmem:[%s5348_s1 + $0xf8] sm:$0xff] }
  0x10   :  { %5363 = vst [vmem:[#allocation14_spill] sm:$0xff] %v2528_v37  ;;  %5365 = vst [vmem:[#allocation16_spill] sm:$0xff] %v2536_v30  ;;  %v2549_v37 = vsub.f32 %v2222_v2, %v2452_v52  ;;  %v2557_v30 = vsub.f32 %v2212_v0, %v2462_v54 }
  0x11   :  { %5364 = vst [vmem:[#allocation15_spill] sm:$0xff] %v2532_v22  ;;  %5366 = vst [vmem:[#allocation17_spill] sm:$0xff] %v2540_v21  ;;  %v2553_v22 = vsub.f32 %v2227_v3, %v2457_v53  ;;  %v2561_v21 = vsub.f32 %v2232_v4, %v2302_v18 }
  0x12   :  { %5367 = vst [vmem:[#allocation18_spill] sm:$0xff] %v2549_v37  ;;  %5369 = vst [vmem:[#allocation20_spill] sm:$0xff] %v2557_v30  ;;  %v2573_v37 = vsub.f32 %v2227_v3, %v2493_v61  ;;  %v2581_v30 = vsub.f32 %v2212_v0, %v2514_v58  ;;  %v2601_v0 = vsub.f32 %v2262_v10, %v2333_v25 }
  0x13   :  { %5368 = vst [vmem:[#allocation19_spill] sm:$0xff] %v2553_v22  ;;  %5370 = vst [vmem:[#allocation21_spill] sm:$0xff] %v2561_v21  ;;  %v2577_v22 = vsub.f32 %v2237_v5, %v2307_v19  ;;  %v2585_v21 = vsub.f32 %v2217_v1, %v2519_v51  ;;  %v2605_v1 = vsub.f32 %v2232_v4, %v2338_v26 }
  0x14   :  { %5371 = vst [vmem:[#allocation22_spill] sm:$0xff] %v2565_v63  ;;  %5372 = vst [vmem:[#allocation23_spill] sm:$0xff] %v2569_v62  ;;  %v2589_v63 = vsub.f32 %v2222_v2, %v2524_v44  ;;  %v2593_v62 = vsub.f32 %v2242_v6, %v2328_v24  ;;  %v2609_v2 = vsub.f32 %v2237_v5, %v2359_v31 }
  0x15   :  { %5373 = vst [vmem:[#allocation24_spill] sm:$0xff] %v2573_v37  ;;  %5374 = vst [vmem:[#allocation25_spill] sm:$0xff] %v2577_v22  ;;  %v2597_v37 = vsub.f32 %v2227_v3, %v2545_v23  ;;  %v2613_v22 = vsub.f32 %v2242_v6, %v2364_v32  ;;  %v2617_v3 = vsub.f32 %v2262_v10, %v2369_v33 }
  0x16   :  { %5375 = vst [vmem:[#allocation26_spill] sm:$0xff] %v2585_v21  ;;  %5376 = vst [vmem:[#allocation27_spill] sm:$0xff] %v2589_v63  ;;  %v2654_v63 = vsub.f32 %v2232_v4, %v2426_v46  ;;  %v2674_v21 = vsub.f32 %v2262_v10, %v2457_v53 }
  0x17   :  { %5377 = vst [vmem:[#allocation28_spill] sm:$0xff] %v2593_v62  ;;  %5378 = vst [vmem:[#allocation29_spill] sm:$0xff] %v2597_v37  ;;  %v2621_v62 = vsub.f32 %v2232_v4, %v2390_v38  ;;  %v22_v37 = vld [vmem:[%s5347_s0 + $0x58] sm:$0xff] }
  0x18   :  { %5379 = vst [vmem:[#allocation30_spill] sm:$0xff] %v2601_v0  ;;  %5380 = vst [vmem:[#allocation31_spill] sm:$0xff] %v2605_v1  ;;  %v2625_v0 = vsub.f32 %v2237_v5, %v2395_v39  ;;  %v2635_v1 = vsub.f32 %v2242_v6, %v2400_v40 }
  0x19   :  { %5381 = vst [vmem:[#allocation32_spill] sm:$0xff] %v2609_v2  ;;  %5382 = vst [vmem:[#allocation33_spill] sm:$0xff] %v2613_v22  ;;  %v20_v2 = vld [vmem:[%s5347_s0 + $0x48] sm:$0xff]  ;;  %v21_v22 = vld [vmem:[%s5347_s0 + $0x50] sm:$0xff] }
  0x1a   :  { %5383 = vst [vmem:[#allocation34_spill] sm:$0xff] %v2617_v3  ;;  %5384 = vst [vmem:[#allocation35_spill] sm:$0xff] %v2621_v62  ;;  %v2639_v3 = vsub.f32 %v2262_v10, %v2421_v45  ;;  %v2643_v62 = vsub.f32 %v2232_v4, %v2514_v58 }
  0x1b   :  { %5385 = vst [vmem:[#allocation36_spill] sm:$0xff] %v2625_v0  ;;  %5386 = vst [vmem:[#allocation37_spill] sm:$0xff] %v2635_v1  ;;  %v2647_v0 = vsub.f32 %v2237_v5, %v2519_v51  ;;  %v2658_v1 = vsub.f32 %v2237_v5, %v2431_v47 }
  0x1c   :  { %5387 = vst [vmem:[#allocation38_spill] sm:$0xff] %v2639_v3  ;;  %5388 = vst [vmem:[#allocation39_spill] sm:$0xff] %v2643_v62  ;;  %v2662_v3 = vsub.f32 %v2242_v6, %v2524_v44  ;;  %v2666_v62 = vsub.f32 %v2262_v10, %v2545_v23 }
  0x1d   :  { %5389 = vst [vmem:[#allocation40_spill] sm:$0xff] %v2647_v0  ;;  %5390 = vst [vmem:[#allocation41_spill] sm:$0xff] %v2654_v63  ;;  %v2670_v0 = vsub.f32 %v2242_v6, %v2452_v52  ;;  %v2678_v63 = vsub.f32 %v2232_v4, %v2462_v54  ;;  %v2699_v4 = vsub.f32 %v22_v37, %v2277_v13 }
  0x1e   :  { %5391 = vst [vmem:[#allocation42_spill] sm:$0xff] %v2658_v1  ;;  %5392 = vst [vmem:[#allocation43_spill] sm:$0xff] %v2662_v3  ;;  %v2682_v1 = vsub.f32 %v2237_v5, %v2483_v59  ;;  %v2686_v3 = vsub.f32 %v2242_v6, %v2488_v60  ;;  %v2703_v5 = vsub.f32 %v2247_v7, %v2282_v14 }
  0x1f   :  { %5393 = vst [vmem:[#allocation44_spill] sm:$0xff] %v2666_v62  ;;  %5394 = vst [vmem:[#allocation45_spill] sm:$0xff] %v2670_v0  ;;  %v2690_v62 = vsub.f32 %v2262_v10, %v2493_v61  ;;  %v2693_v0 = vsub.f32 %v20_v2, %v2267_v11  ;;  %v2706_v6 = vsub.f32 %v20_v2, %v2287_v15 }
  0x20   :  { %5395 = vst [vmem:[#allocation46_spill] sm:$0xff] %v2674_v21  ;;  %5396 = vst [vmem:[#allocation47_spill] sm:$0xff] %v2678_v63  ;;  %v2696_v21 = vsub.f32 %v21_v22, %v2272_v12  ;;  %v2712_v10 = vsub.f32 %v22_v37, %v2297_v17  ;;  %v2780_v63 = vsub.f32 %v21_v22, %v2400_v40 }
  0x21   :  { %5397 = vst [vmem:[#allocation48_spill] sm:$0xff] %v2682_v1  ;;  %5398 = vst [vmem:[#allocation49_spill] sm:$0xff] %v2686_v3  ;;  %v2709_v3 = vsub.f32 %v21_v22, %v2292_v16  ;;  %v2777_v1 = vsub.f32 %v20_v2, %v2395_v39 }
  0x22   :  { %5399 = vst [vmem:[#allocation50_spill] sm:$0xff] %v2690_v62  ;;  %5400 = vst [vmem:[#allocation51_spill] sm:$0xff] %v2693_v0  ;;  %v2716_v0 = vsub.f32 %v2247_v7, %v2302_v18  ;;  %v2774_v62 = vsub.f32 %v2247_v7, %v2390_v38 }
  0x23   :  { %5401 = vst [vmem:[#allocation52_spill] sm:$0xff] %v2696_v21  ;;  %5402 = vst [vmem:[#allocation53_spill] sm:$0xff] %v2699_v4  ;;  %v2719_v21 = vsub.f32 %v20_v2, %v2307_v19  ;;  %v2722_v4 = vsub.f32 %v21_v22, %v2328_v24 }
  0x24   :  { %5403 = vst [vmem:[#allocation54_spill] sm:$0xff] %v2703_v5  ;;  %5404 = vst [vmem:[#allocation55_spill] sm:$0xff] %v2706_v6  ;;  %v2725_v5 = vsub.f32 %v22_v37, %v2333_v25  ;;  %v2729_v6 = vsub.f32 %v2247_v7, %v2338_v26 }
  0x25   :  { %5405 = vst [vmem:[#allocation56_spill] sm:$0xff] %v2709_v3  ;;  %5406 = vst [vmem:[#allocation57_spill] sm:$0xff] %v2712_v10  ;;  %v2732_v3 = vsub.f32 %v20_v2, %v2359_v31  ;;  %v2735_v10 = vsub.f32 %v21_v22, %v2364_v32 }
  0x26   :  { %5407 = vst [vmem:[#allocation58_spill] sm:$0xff] %v2716_v0  ;;  %5408 = vst [vmem:[#allocation59_spill] sm:$0xff] %v2719_v21  ;;  %v2738_v0 = vsub.f32 %v22_v37, %v2369_v33  ;;  %v2742_v21 = vsub.f32 %v2247_v7, %v2462_v54 }
  0x27   :  { %5409 = vst [vmem:[#allocation60_spill] sm:$0xff] %v2722_v4  ;;  %5410 = vst [vmem:[#allocation61_spill] sm:$0xff] %v2725_v5  ;;  %v2745_v4 = vsub.f32 %v20_v2, %v2483_v59  ;;  %v2748_v5 = vsub.f32 %v21_v22, %v2488_v60 }
  0x28   :  { %5411 = vst [vmem:[#allocation62_spill] sm:$0xff] %v2729_v6  ;;  %5412 = vst [vmem:[#allocation63_spill] sm:$0xff] %v2732_v3  ;;  %v24_v3 = vld [vmem:[%s5347_s0 + $0x68] sm:$0xff]  ;;  %v2770_v6 = vsub.f32 %v21_v22, %v2524_v44 }
  0x29   :  { %5413 = vst [vmem:[#allocation64_spill] sm:$0xff] %v2735_v10  ;;  %5414 = vst [vmem:[#allocation65_spill] sm:$0xff] %v2738_v0  ;;  %v25_v10 = vld [vmem:[%s5347_s0 + $0x70] sm:$0xff]  ;;  %v26_v0 = vld [vmem:[%s5347_s0 + $0x78] sm:$0xff] }
  0x2a   :  { %5415 = vst [vmem:[#allocation66_spill] sm:$0xff] %v2742_v21  ;;  %5416 = vst [vmem:[#allocation67_spill] sm:$0xff] %v2745_v4  ;;  %v2760_v21 = vsub.f32 %v22_v37, %v2493_v61  ;;  %v2764_v4 = vsub.f32 %v2247_v7, %v2514_v58 }
  0x2b   :  { %5417 = vst [vmem:[#allocation68_spill] sm:$0xff] %v2748_v5  ;;  %v2767_v5 = vsub.f32 %v20_v2, %v2519_v51  ;;  %5421 = vst [vmem:[#allocation72_spill] sm:$0xff] %v2770_v6  ;;  %v2793_v6 = vsub.f32 %v20_v2, %v2431_v47  ;;  %v2815_v2 = vsub.f32 %v24_v3, %v2287_v15 }
  0x2c   :  { %5418 = vst [vmem:[#allocation69_spill] sm:$0xff] %v2760_v21  ;;  %5419 = vst [vmem:[#allocation70_spill] sm:$0xff] %v2764_v4  ;;  %v2783_v21 = vsub.f32 %v22_v37, %v2545_v23  ;;  %v2786_v4 = vsub.f32 %v22_v37, %v2421_v45 }
  0x2d   :  { %5420 = vst [vmem:[#allocation71_spill] sm:$0xff] %v2767_v5  ;;  %5422 = vst [vmem:[#allocation73_spill] sm:$0xff] %v2774_v62  ;;  %v2790_v5 = vsub.f32 %v2247_v7, %v2426_v46  ;;  %v2796_v62 = vsub.f32 %v21_v22, %v2452_v52  ;;  %v2812_v7 = vsub.f32 %v2252_v8, %v2282_v14 }
  0x2e   :  { %5423 = vst [vmem:[#allocation74_spill] sm:$0xff] %v2777_v1  ;;  %5424 = vst [vmem:[#allocation75_spill] sm:$0xff] %v2780_v63  ;;  %v2799_v1 = vsub.f32 %v22_v37, %v2457_v53  ;;  %v2802_v63 = vsub.f32 %v24_v3, %v2267_v11  ;;  %v2818_v22 = vsub.f32 %v25_v10, %v2292_v16 }
  0x2f   :  { %5425 = vst [vmem:[#allocation76_spill] sm:$0xff] %v2783_v21  ;;  %5426 = vst [vmem:[#allocation77_spill] sm:$0xff] %v2786_v4  ;;  %v2805_v21 = vsub.f32 %v25_v10, %v2272_v12  ;;  %v2808_v4 = vsub.f32 %v26_v0, %v2277_v13  ;;  %v2821_v37 = vsub.f32 %v26_v0, %v2297_v17 }
  0x30   :  { %5427 = vst [vmem:[#allocation78_spill] sm:$0xff] %v2790_v5  ;;  %5428 = vst [vmem:[#allocation79_spill] sm:$0xff] %v2793_v6  ;;  %v2892_v6 = vsub.f32 %v24_v3, %v2359_v31  ;;  %v2895_v5 = vsub.f32 %v25_v10, %v2364_v32 }
  0x31   :  { %5429 = vst [vmem:[#allocation80_spill] sm:$0xff] %v2796_v62  ;;  %5430 = vst [vmem:[#allocation81_spill] sm:$0xff] %v2799_v1  ;;  %v2885_v1 = vsub.f32 %v26_v0, %v2545_v23  ;;  %v2889_v62 = vsub.f32 %v2252_v8, %v2338_v26 }
  0x32   :  { %5431 = vst [vmem:[#allocation82_spill] sm:$0xff] %v2802_v63  ;;  %5432 = vst [vmem:[#allocation83_spill] sm:$0xff] %v2805_v21  ;;  %v2825_v63 = vsub.f32 %v2252_v8, %v2302_v18  ;;  %v2828_v21 = vsub.f32 %v24_v3, %v2307_v19 }
  0x33   :  { %5433 = vst [vmem:[#allocation84_spill] sm:$0xff] %v2808_v4  ;;  %5434 = vst [vmem:[#allocation85_spill] sm:$0xff] %v2812_v7  ;;  %v2831_v4 = vsub.f32 %v25_v10, %v2328_v24  ;;  %v2834_v7 = vsub.f32 %v26_v0, %v2333_v25 }
  0x34   :  { %5435 = vst [vmem:[#allocation86_spill] sm:$0xff] %v2815_v2  ;;  %5436 = vst [vmem:[#allocation87_spill] sm:$0xff] %v2818_v22  ;;  %v2838_v2 = vsub.f32 %v2252_v8, %v2426_v46  ;;  %v2841_v22 = vsub.f32 %v24_v3, %v2431_v47 }
  0x35   :  { %5437 = vst [vmem:[#allocation88_spill] sm:$0xff] %v2821_v37  ;;  %5438 = vst [vmem:[#allocation89_spill] sm:$0xff] %v2825_v63  ;;  %v2844_v37 = vsub.f32 %v25_v10, %v2452_v52  ;;  %v2847_v63 = vsub.f32 %v26_v0, %v2457_v53 }
  0x36   :  { %5439 = vst [vmem:[#allocation90_spill] sm:$0xff] %v2828_v21  ;;  %5440 = vst [vmem:[#allocation91_spill] sm:$0xff] %v2831_v4  ;;  %v27_v4 = vld [vmem:[%s5347_s0 + $0x80] sm:$0xff]  ;;  %v2857_v21 = vsub.f32 %v24_v3, %v2483_v59 }
  0x37   :  { %5441 = vst [vmem:[#allocation92_spill] sm:$0xff] %v2834_v7  ;;  %5442 = vst [vmem:[#allocation93_spill] sm:$0xff] %v2838_v2  ;;  %v2854_v7 = vsub.f32 %v2252_v8, %v2462_v54  ;;  %v2860_v2 = vsub.f32 %v25_v10, %v2488_v60 }
  0x38   :  { %5443 = vst [vmem:[#allocation94_spill] sm:$0xff] %v2841_v22  ;;  %5444 = vst [vmem:[#allocation95_spill] sm:$0xff] %v2844_v37  ;;  %v2863_v22 = vsub.f32 %v26_v0, %v2493_v61  ;;  %v29_v37 = vld [vmem:[%s5347_s0 + $0x90] sm:$0xff] }
  0x39   :  { %5445 = vst [vmem:[#allocation96_spill] sm:$0xff] %v2847_v63  ;;  %5446 = vst [vmem:[#allocation97_spill] sm:$0xff] %v2854_v7  ;;  %v28_v63 = vld [vmem:[%s5347_s0 + $0x88] sm:$0xff]  ;;  %v30_v7 = vld [vmem:[%s5347_s0 + $0x98] sm:$0xff] }
  0x3a   :  { %5447 = vst [vmem:[#allocation98_spill] sm:$0xff] %v2857_v21  ;;  %5448 = vst [vmem:[#allocation99_spill] sm:$0xff] %v2860_v2  ;;  %v2876_v21 = vsub.f32 %v2252_v8, %v2514_v58  ;;  %v2879_v2 = vsub.f32 %v24_v3, %v2519_v51 }
  0x3b   :  { %5449 = vst [vmem:[#allocation100_spill] sm:$0xff] %v2863_v22  ;;  %v2882_v22 = vsub.f32 %v25_v10, %v2524_v44  ;;  %5453 = vst [vmem:[#allocation104_spill] sm:$0xff] %v2885_v1  ;;  %v2908_v1 = vsub.f32 %v25_v10, %v2400_v40  ;;  %v2929_v10 = vsub.f32 %v28_v63, %v2287_v15 }
  0x3c   :  { %5450 = vst [vmem:[#allocation101_spill] sm:$0xff] %v2876_v21  ;;  %5451 = vst [vmem:[#allocation102_spill] sm:$0xff] %v2879_v2  ;;  %v2898_v21 = vsub.f32 %v26_v0, %v2369_v33  ;;  %v2902_v2 = vsub.f32 %v2252_v8, %v2390_v38  ;;  %v2923_v8 = vsub.f32 %v30_v7, %v2277_v13 }
  0x3d   :  { %5452 = vst [vmem:[#allocation103_spill] sm:$0xff] %v2882_v22  ;;  %5454 = vst [vmem:[#allocation105_spill] sm:$0xff] %v2889_v62  ;;  %v2905_v22 = vsub.f32 %v24_v3, %v2395_v39  ;;  %v2911_v62 = vsub.f32 %v26_v0, %v2421_v45  ;;  %v2926_v3 = vsub.f32 %v27_v4, %v2282_v14 }
  0x3e   :  { %5455 = vst [vmem:[#allocation106_spill] sm:$0xff] %v2892_v6  ;;  %5456 = vst [vmem:[#allocation107_spill] sm:$0xff] %v2895_v5  ;;  %v2914_v6 = vsub.f32 %v27_v4, %v2257_v9  ;;  %v2917_v5 = vsub.f32 %v28_v63, %v2267_v11  ;;  %v2932_v0 = vsub.f32 %v29_v37, %v2292_v16 }
  0x3f   :  { %5457 = vst [vmem:[#allocation108_spill] sm:$0xff] %v2898_v21  ;;  %5458 = vst [vmem:[#allocation109_spill] sm:$0xff] %v2902_v2  ;;  %v2920_v21 = vsub.f32 %v29_v37, %v2272_v12  ;;  %v3004_v2 = vsub.f32 %v29_v37, %v2328_v24 }
  0x40   :  { %5459 = vst [vmem:[#allocation110_spill] sm:$0xff] %v2905_v22  ;;  %5460 = vst [vmem:[#allocation111_spill] sm:$0xff] %v2908_v1  ;;  %v2998_v1 = vsub.f32 %v27_v4, %v2302_v18  ;;  %v3001_v22 = vsub.f32 %v28_v63, %v2307_v19 }
  0x41   :  { %5461 = vst [vmem:[#allocation112_spill] sm:$0xff] %v2911_v62  ;;  %5462 = vst [vmem:[#allocation113_spill] sm:$0xff] %v2914_v6  ;;  %v2935_v6 = vsub.f32 %v30_v7, %v2297_v17  ;;  %v2995_v62 = vsub.f32 %v30_v7, %v2545_v23 }
  0x42   :  { %5463 = vst [vmem:[#allocation114_spill] sm:$0xff] %v2917_v5  ;;  %5464 = vst [vmem:[#allocation115_spill] sm:$0xff] %v2920_v21  ;;  %v2938_v5 = vsub.f32 %v27_v4, %v2390_v38  ;;  %v2941_v21 = vsub.f32 %v28_v63, %v2395_v39 }
  0x43   :  { %5465 = vst [vmem:[#allocation116_spill] sm:$0xff] %v2923_v8  ;;  %5466 = vst [vmem:[#allocation117_spill] sm:$0xff] %v2926_v3  ;;  %v2944_v8 = vsub.f32 %v29_v37, %v2400_v40  ;;  %v2947_v3 = vsub.f32 %v30_v7, %v2421_v45 }
  0x44   :  { %5467 = vst [vmem:[#allocation118_spill] sm:$0xff] %v2929_v10  ;;  %5468 = vst [vmem:[#allocation119_spill] sm:$0xff] %v2932_v0  ;;  %v2950_v10 = vsub.f32 %v27_v4, %v2426_v46  ;;  %v2953_v0 = vsub.f32 %v28_v63, %v2431_v47 }
  0x45   :  { %5469 = vst [vmem:[#allocation120_spill] sm:$0xff] %v2935_v6  ;;  %5470 = vst [vmem:[#allocation121_spill] sm:$0xff] %v2938_v5  ;;  %v2956_v6 = vsub.f32 %v29_v37, %v2452_v52  ;;  %v2959_v5 = vsub.f32 %v30_v7, %v2457_v53 }
  0x46   :  { %5471 = vst [vmem:[#allocation122_spill] sm:$0xff] %v2941_v21  ;;  %5472 = vst [vmem:[#allocation123_spill] sm:$0xff] %v2944_v8  ;;  %v31_v21 = vld [vmem:[%s5347_s0 + $0xa0] sm:$0xff]  ;;  %v2965_v8 = vsub.f32 %v27_v4, %v2462_v54 }
  0x47   :  { %5473 = vst [vmem:[#allocation124_spill] sm:$0xff] %v2947_v3  ;;  %5474 = vst [vmem:[#allocation125_spill] sm:$0xff] %v2950_v10  ;;  %v2968_v3 = vsub.f32 %v28_v63, %v2483_v59  ;;  %v2971_v10 = vsub.f32 %v29_v37, %v2488_v60 }
  0x48   :  { %5475 = vst [vmem:[#allocation126_spill] sm:$0xff] %v2953_v0  ;;  %5476 = vst [vmem:[#allocation127_spill] sm:$0xff] %v2956_v6  ;;  %v2974_v0 = vsub.f32 %v30_v7, %v2493_v61  ;;  %v33_v6 = vld [vmem:[%s5347_s0 + $0xb0] sm:$0xff] }
  0x49   :  { %5477 = vst [vmem:[#allocation128_spill] sm:$0xff] %v2959_v5  ;;  %5478 = vst [vmem:[#allocation129_spill] sm:$0xff] %v2965_v8  ;;  %v32_v5 = vld [vmem:[%s5347_s0 + $0xa8] sm:$0xff]  ;;  %v34_v8 = vld [vmem:[%s5347_s0 + $0xb8] sm:$0xff] }
  0x4a   :  { %5479 = vst [vmem:[#allocation130_spill] sm:$0xff] %v2968_v3  ;;  %5480 = vst [vmem:[#allocation131_spill] sm:$0xff] %v2971_v10  ;;  %v2986_v3 = vsub.f32 %v27_v4, %v2514_v58  ;;  %v2989_v10 = vsub.f32 %v28_v63, %v2519_v51 }
  0x4b   :  { %5481 = vst [vmem:[#allocation132_spill] sm:$0xff] %v2974_v0  ;;  %v2992_v0 = vsub.f32 %v29_v37, %v2524_v44  ;;  %5485 = vst [vmem:[#allocation136_spill] sm:$0xff] %v2995_v62  ;;  %v3016_v62 = vsub.f32 %v29_v37, %v2364_v32  ;;  %v3037_v37 = vsub.f32 %v32_v5, %v2359_v31 }
  0x4c   :  { %5482 = vst [vmem:[#allocation133_spill] sm:$0xff] %v2986_v3  ;;  %5483 = vst [vmem:[#allocation134_spill] sm:$0xff] %v2989_v10  ;;  %v3007_v3 = vsub.f32 %v30_v7, %v2333_v25  ;;  %v3010_v10 = vsub.f32 %v27_v4, %v2338_v26  ;;  %v3031_v4 = vsub.f32 %v34_v8, %v2277_v13 }
  0x4d   :  { %5484 = vst [vmem:[#allocation135_spill] sm:$0xff] %v2992_v0  ;;  %5486 = vst [vmem:[#allocation137_spill] sm:$0xff] %v2998_v1  ;;  %v3013_v0 = vsub.f32 %v28_v63, %v2359_v31  ;;  %v3019_v1 = vsub.f32 %v30_v7, %v2369_v33  ;;  %v3034_v63 = vsub.f32 %v31_v21, %v2338_v26 }
  0x4e   :  { %5487 = vst [vmem:[#allocation138_spill] sm:$0xff] %v3001_v22  ;;  %5488 = vst [vmem:[#allocation139_spill] sm:$0xff] %v3004_v2  ;;  %v3022_v22 = vsub.f32 %v31_v21, %v2257_v9  ;;  %v3025_v2 = vsub.f32 %v32_v5, %v2267_v11  ;;  %v3040_v7 = vsub.f32 %v33_v6, %v2364_v32 }
  0x4f   :  { %5489 = vst [vmem:[#allocation140_spill] sm:$0xff] %v3007_v3  ;;  %5490 = vst [vmem:[#allocation141_spill] sm:$0xff] %v3010_v10  ;;  %v3028_v3 = vsub.f32 %v33_v6, %v2272_v12 }
  0x50   :  { %5491 = vst [vmem:[#allocation142_spill] sm:$0xff] %v3013_v0  ;;  %5492 = vst [vmem:[#allocation143_spill] sm:$0xff] %v3016_v62 }
  0x51   :  { %5493 = vst [vmem:[#allocation144_spill] sm:$0xff] %v3019_v1  ;;  %5494 = vst [vmem:[#allocation145_spill] sm:$0xff] %v3022_v22  ;;  %v3043_v22 = vsub.f32 %v34_v8, %v2369_v33  ;;  %v3135_v1 = vsub.f32 %v34_v8, %v2333_v25 }
  0x52   :  { %5495 = vst [vmem:[#allocation146_spill] sm:$0xff] %v3025_v2  ;;  %5496 = vst [vmem:[#allocation147_spill] sm:$0xff] %v3028_v3  ;;  %v3046_v2 = vsub.f32 %v31_v21, %v2390_v38  ;;  %v3049_v3 = vsub.f32 %v32_v5, %v2395_v39 }
  0x53   :  { %5497 = vst [vmem:[#allocation148_spill] sm:$0xff] %v3031_v4  ;;  %5498 = vst [vmem:[#allocation149_spill] sm:$0xff] %v3034_v63  ;;  %v3052_v4 = vsub.f32 %v33_v6, %v2400_v40  ;;  %v3055_v63 = vsub.f32 %v34_v8, %v2421_v45 }
  0x54   :  { %5499 = vst [vmem:[#allocation150_spill] sm:$0xff] %v3037_v37  ;;  %5500 = vst [vmem:[#allocation151_spill] sm:$0xff] %v3040_v7  ;;  %v3058_v37 = vsub.f32 %v31_v21, %v2426_v46  ;;  %v3061_v7 = vsub.f32 %v32_v5, %v2431_v47 }
  0x55   :  { %5501 = vst [vmem:[#allocation152_spill] sm:$0xff] %v3043_v22  ;;  %5502 = vst [vmem:[#allocation153_spill] sm:$0xff] %v3046_v2  ;;  %v3064_v22 = vsub.f32 %v33_v6, %v2452_v52  ;;  %v3067_v2 = vsub.f32 %v34_v8, %v2457_v53 }
  0x56   :  { %5503 = vst [vmem:[#allocation154_spill] sm:$0xff] %v3049_v3  ;;  %5504 = vst [vmem:[#allocation155_spill] sm:$0xff] %v3052_v4  ;;  %v3070_v3 = vsub.f32 %v31_v21, %v2462_v54  ;;  %v3073_v4 = vsub.f32 %v32_v5, %v2483_v59 }
  0x57   :  { %5505 = vst [vmem:[#allocation156_spill] sm:$0xff] %v3055_v63  ;;  %5506 = vst [vmem:[#allocation157_spill] sm:$0xff] %v3058_v37  ;;  %v3076_v63 = vsub.f32 %v33_v6, %v2488_v60  ;;  %v3079_v37 = vsub.f32 %v34_v8, %v2493_v61 }
  0x58   :  { %5507 = vst [vmem:[#allocation158_spill] sm:$0xff] %v3061_v7  ;;  %5508 = vst [vmem:[#allocation159_spill] sm:$0xff] %v3064_v22  ;;  %v3082_v7 = vsub.f32 %v31_v21, %v2514_v58  ;;  %v3085_v22 = vsub.f32 %v32_v5, %v2519_v51 }
  0x59   :  { %5509 = vst [vmem:[#allocation160_spill] sm:$0xff] %v3067_v2  ;;  %5510 = vst [vmem:[#allocation161_spill] sm:$0xff] %v3070_v3  ;;  %v3088_v2 = vsub.f32 %v33_v6, %v2524_v44  ;;  %v3091_v3 = vsub.f32 %v34_v8, %v2545_v23 }
  0x5a   :  { %5511 = vst [vmem:[#allocation162_spill] sm:$0xff] %v3073_v4  ;;  %5512 = vst [vmem:[#allocation163_spill] sm:$0xff] %v3076_v63  ;;  %v3096_v4 = vld [vmem:[%s5347_s0 + $0xc0] sm:$0xff]  ;;  %v3099_v63 = vsub.f32 %v31_v21, %v2282_v14 }
  0x5b   :  { %5513 = vst [vmem:[#allocation164_spill] sm:$0xff] %v3079_v37  ;;  %5514 = vst [vmem:[#allocation165_spill] sm:$0xff] %v3082_v7  ;;  %v3102_v37 = vsub.f32 %v32_v5, %v2287_v15  ;;  %v3105_v7 = vsub.f32 %v33_v6, %v2292_v16  ;;  %v3139_v62 = vsub.f32 %v3096_v4, %v2302_v18 }
  0x5c   :  { %5515 = vst [vmem:[#allocation166_spill] sm:$0xff] %v3085_v22  ;;  %5516 = vst [vmem:[#allocation167_spill] sm:$0xff] %v3088_v2  ;;  %v3108_v22 = vsub.f32 %v34_v8, %v2297_v17  ;;  %v3118_v2 = vld [vmem:[%s5347_s0 + $0xd0] sm:$0xff] }
  0x5d   :  { %5517 = vst [vmem:[#allocation168_spill] sm:$0xff] %v3091_v3  ;;  %5518 = vst [vmem:[#allocation169_spill] sm:$0xff] %v3099_v63  ;;  %v3113_v3 = vld [vmem:[%s5347_s0 + $0xc8] sm:$0xff]  ;;  %v3132_v63 = vsub.f32 %v33_v6, %v2328_v24  ;;  %v3155_v6 = vsub.f32 %v3096_v4, %v2338_v26 }
  0x5e   :  { %5519 = vst [vmem:[#allocation170_spill] sm:$0xff] %v3102_v37  ;;  %5520 = vst [vmem:[#allocation171_spill] sm:$0xff] %v3105_v7  ;;  %v3123_v37 = vld [vmem:[%s5347_s0 + $0xd8] sm:$0xff]  ;;  %v3126_v7 = vsub.f32 %v31_v21, %v2302_v18  ;;  %v3143_v0 = vsub.f32 %v3113_v3, %v2307_v19  ;;  %v3147_v21 = vsub.f32 %v3118_v2, %v2328_v24 }
  0x5f   :  { %5521 = vst [vmem:[#allocation172_spill] sm:$0xff] %v3108_v22  ;;  %v3129_v22 = vsub.f32 %v32_v5, %v2307_v19  ;;  %5524 = vst [vmem:[#allocation175_spill] sm:$0xff] %v3132_v63  ;;  %v3151_v5 = vsub.f32 %v3123_v37, %v2333_v25  ;;  %v3159_v8 = vsub.f32 %v3113_v3, %v2359_v31 }
  0x60   :  { %5522 = vst [vmem:[#allocation173_spill] sm:$0xff] %v3126_v7  ;;  %5525 = vst [vmem:[#allocation176_spill] sm:$0xff] %v3135_v1  ;;  %v3247_v1 = vsub.f32 %v3096_v4, %v2257_v9  ;;  %v3259_v63 = vsub.f32 %v3123_v37, %v2277_v13 }
  0x61   :  { %5523 = vst [vmem:[#allocation174_spill] sm:$0xff] %v3129_v22  ;;  %5526 = vst [vmem:[#allocation177_spill] sm:$0xff] %v3139_v62  ;;  %v3163_v62 = vsub.f32 %v3118_v2, %v2364_v32 }
  0x62   :  { %5527 = vst [vmem:[#allocation178_spill] sm:$0xff] %v3143_v0  ;;  %5528 = vst [vmem:[#allocation179_spill] sm:$0xff] %v3147_v21  ;;  %v3167_v0 = vsub.f32 %v3123_v37, %v2369_v33  ;;  %v3171_v21 = vsub.f32 %v3096_v4, %v2390_v38 }
  0x63   :  { %5529 = vst [vmem:[#allocation180_spill] sm:$0xff] %v3151_v5  ;;  %5530 = vst [vmem:[#allocation181_spill] sm:$0xff] %v3155_v6  ;;  %v3175_v5 = vsub.f32 %v3113_v3, %v2395_v39  ;;  %v3179_v6 = vsub.f32 %v3118_v2, %v2400_v40 }
  0x64   :  { %5531 = vst [vmem:[#allocation182_spill] sm:$0xff] %v3159_v8  ;;  %5532 = vst [vmem:[#allocation183_spill] sm:$0xff] %v3163_v62  ;;  %v3183_v8 = vsub.f32 %v3123_v37, %v2421_v45  ;;  %v3187_v62 = vsub.f32 %v3096_v4, %v2426_v46 }
  0x65   :  { %5533 = vst [vmem:[#allocation184_spill] sm:$0xff] %v3167_v0  ;;  %5534 = vst [vmem:[#allocation185_spill] sm:$0xff] %v3171_v21  ;;  %v3191_v0 = vsub.f32 %v3113_v3, %v2431_v47  ;;  %v3195_v21 = vsub.f32 %v3118_v2, %v2452_v52 }
  0x66   :  { %5535 = vst [vmem:[#allocation186_spill] sm:$0xff] %v3175_v5  ;;  %5536 = vst [vmem:[#allocation187_spill] sm:$0xff] %v3179_v6  ;;  %v3199_v5 = vsub.f32 %v3123_v37, %v2457_v53  ;;  %v3203_v6 = vsub.f32 %v3096_v4, %v2462_v54 }
  0x67   :  { %5537 = vst [vmem:[#allocation188_spill] sm:$0xff] %v3183_v8  ;;  %5538 = vst [vmem:[#allocation189_spill] sm:$0xff] %v3187_v62  ;;  %v3207_v8 = vsub.f32 %v3113_v3, %v2483_v59  ;;  %v3211_v62 = vsub.f32 %v3118_v2, %v2488_v60 }
  0x68   :  { %5539 = vst [vmem:[#allocation190_spill] sm:$0xff] %v3191_v0  ;;  %5540 = vst [vmem:[#allocation191_spill] sm:$0xff] %v3195_v21  ;;  %v3215_v0 = vsub.f32 %v3123_v37, %v2493_v61  ;;  %v3222_v21 = vsub.f32 %v3096_v4, %v2514_v58 }
  0x69   :  { %5541 = vst [vmem:[#allocation192_spill] sm:$0xff] %v3199_v5  ;;  %5542 = vst [vmem:[#allocation193_spill] sm:$0xff] %v3203_v6  ;;  %v39_v5 = vld [vmem:[%s5347_s0 + $0xe0] sm:$0xff]  ;;  %v3226_v6 = vsub.f32 %v3113_v3, %v2519_v51 }
  0x6a   :  { %5543 = vst [vmem:[#allocation194_spill] sm:$0xff] %v3207_v8  ;;  %5544 = vst [vmem:[#allocation195_spill] sm:$0xff] %v3211_v62  ;;  %v3230_v8 = vsub.f32 %v3118_v2, %v2524_v44  ;;  %v3234_v62 = vsub.f32 %v3123_v37, %v2545_v23  ;;  %v3262_v22 = vsub.f32 %v39_v5, %v2282_v14 }
  0x6b   :  { %5545 = vst [vmem:[#allocation196_spill] sm:$0xff] %v3215_v0  ;;  %5546 = vst [vmem:[#allocation197_spill] sm:$0xff] %v3222_v21  ;;  %v40_v0 = vld [vmem:[%s5347_s0 + $0xe8] sm:$0xff]  ;;  %v41_v21 = vld [vmem:[%s5347_s0 + $0xf0] sm:$0xff] }
  0x6c   :  { %5547 = vst [vmem:[#allocation198_spill] sm:$0xff] %v3226_v6  ;;  %5548 = vst [vmem:[#allocation199_spill] sm:$0xff] %v3230_v8  ;;  %v42_v6 = vld [vmem:[%s5347_s0 + $0xf8] sm:$0xff]  ;;  %v3251_v8 = vsub.f32 %v3113_v3, %v2267_v11  ;;  %v3265_v7 = vsub.f32 %v40_v0, %v2287_v15 }
  0x6d   :  { %5549 = vst [vmem:[#allocation200_spill] sm:$0xff] %v3234_v62  ;;  %5550 = vst [vmem:[#allocation201_spill] sm:$0xff] %v3247_v1  ;;  %v3255_v62 = vsub.f32 %v3118_v2, %v2272_v12  ;;  %v3268_v1 = vsub.f32 %v41_v21, %v2292_v16  ;;  %v3271_v10 = vsub.f32 %v42_v6, %v2297_v17 }
  0x6e   :  { %5551 = vst [vmem:[#allocation202_spill] sm:$0xff] %v3251_v8  ;;  %5553 = vst [vmem:[#allocation204_spill] sm:$0xff] %v3259_v63  ;;  %v3274_v8 = vsub.f32 %v39_v5, %v2302_v18  ;;  %v3280_v63 = vsub.f32 %v41_v21, %v2328_v24  ;;  %v3295_v18 = vsub.f32 %v42_v6, %v2369_v33 }
  0x6f   :  { %5552 = vst [vmem:[#allocation203_spill] sm:$0xff] %v3255_v62  ;;  %5554 = vst [vmem:[#allocation205_spill] sm:$0xff] %v3262_v22  ;;  %v3277_v62 = vsub.f32 %v40_v0, %v2307_v19  ;;  %v3283_v22 = vsub.f32 %v42_v6, %v2333_v25  ;;  %v3298_v19 = vsub.f32 %v39_v5, %v2390_v38 }
  0x70   :  { %5555 = vst [vmem:[#allocation206_spill] sm:$0xff] %v3265_v7  ;;  %5556 = vst [vmem:[#allocation207_spill] sm:$0xff] %v3268_v1  ;;  %v3286_v7 = vsub.f32 %v39_v5, %v2338_v26  ;;  %v3289_v1 = vsub.f32 %v40_v0, %v2359_v31  ;;  %v3301_v24 = vsub.f32 %v40_v0, %v2395_v39 }
  0x71   :  { %5557 = vst [vmem:[#allocation208_spill] sm:$0xff] %v3271_v10  ;;  %v3292_v10 = vsub.f32 %v41_v21, %v2364_v32  ;;  %v3304_v25 = vsub.f32 %v41_v21, %v2400_v40  ;;  %v3307_v26 = vsub.f32 %v42_v6, %v2421_v45  ;;  %v3310_v31 = vsub.f32 %v39_v5, %v2426_v46 }
  0x72   :  { %v3313_v32 = vsub.f32 %v40_v0, %v2431_v47  ;;  %v3316_v33 = vsub.f32 %v41_v21, %v2452_v52  ;;  %v3319_v38 = vsub.f32 %v42_v6, %v2457_v53  ;;  %v3322_v39 = vsub.f32 %v39_v5, %v2462_v54 }
  0x73   :  { %v3325_v40 = vsub.f32 %v40_v0, %v2483_v59  ;;  %v3328_v45 = vsub.f32 %v41_v21, %v2488_v60  ;;  %v3331_v46 = vsub.f32 %v42_v6, %v2493_v61  ;;  %v3334_v47 = vsub.f32 %v39_v5, %v2514_v58  ;;  %v5567_v61 = vld [vmem:[#allocation11_spill] sm:$0xff] }
  0x74   :  { %5558 = vst [vmem:[#allocation209_spill] sm:$0xff] %v3322_v39  ;;  %v3337_v52 = vsub.f32 %v40_v0, %v2519_v51  ;;  %v3340_v53 = vsub.f32 %v41_v21, %v2524_v44  ;;  %v3343_v54 = vsub.f32 %v42_v6, %v2545_v23  ;;  %v3347_v59 = vsub.f32 %v3096_v4, %v2282_v14  ;;  %v5571_v4 = vld [vmem:[#allocation16_spill] sm:$0xff]  ;;  %v5588_v39 = vld [vmem:[#allocation6_spill] sm:$0xff] }
  0x75   :  { %5559 = vst [vmem:[#allocation210_spill] sm:$0xff] %v3325_v40  ;;  %5560 = vst [vmem:[#allocation211_spill] sm:$0xff] %v3328_v45  ;;  %v3351_v60 = vsub.f32 %v3113_v3, %v2287_v15  ;;  %v3355_v58 = vsub.f32 %v3118_v2, %v2292_v16  ;;  %v3359_v51 = vsub.f32 %v3123_v37, %v2297_v17  ;;  %v5568_v2 = vld [vmem:[#allocation12_spill] sm:$0xff]  ;;  %v5569_v3 = vld [vmem:[#allocation14_spill] sm:$0xff] }
  0x76   :  { %5561 = vst [vmem:[#allocation212_spill] sm:$0xff] %v3331_v46  ;;  %5562 = vst [vmem:[#allocation213_spill] sm:$0xff] %v3334_v47  ;;  %v3362_v44 = vsub.f32 %v39_v5, %v2257_v9  ;;  %v3365_v23 = vsub.f32 %v40_v0, %v2267_v11  ;;  %v3368_v14 = vsub.f32 %v41_v21, %v2272_v12  ;;  %v5570_v0 = vld [vmem:[#allocation15_spill] sm:$0xff]  ;;  %v5572_v21 = vld [vmem:[#allocation18_spill] sm:$0xff] }
  0x77   :  { %5563 = vst [vmem:[#allocation214_spill] sm:$0xff] %v3337_v52  ;;  %5564 = vst [vmem:[#allocation215_spill] sm:$0xff] %v3340_v53  ;;  %v3371_v15 = vsub.f32 %v42_v6, %v2277_v13  ;;  %v3375_v16 = vmul.f32 %v2311_v20, %v2311_v20  ;;  %v3379_v17 = vmul.f32 %v2342_v27, %v2342_v27  ;;  %v5573_v6 = vld [vmem:[#allocation19_spill] sm:$0xff]  ;;  %v5578_v53 = vld [vmem:[#allocation24_spill] sm:$0xff] }
  0x78   :  { %5565 = vst [vmem:[#allocation216_spill] sm:$0xff] %v3343_v54  ;;  %v3383_v9 = vmul.f32 %v2346_v28, %v2346_v28  ;;  %v3387_v11 = vmul.f32 %v2350_v29, %v2350_v29  ;;  %v3391_v12 = vmul.f32 %v2373_v34, %v2373_v34  ;;  %v3395_v13 = vmul.f32 %v2377_v35, %v2377_v35  ;;  %v5577_v54 = vld [vmem:[#allocation23_spill] sm:$0xff]  ;;  %v5580_v52 = vld [vmem:[#allocation26_spill] sm:$0xff]  ;;  %v5582_v46 = vld [vmem:[#allocation29_spill] sm:$0xff] }
  0x79   :  { %v3399_v20 = vmul.f32 %v2381_v36, %v2381_v36  ;;  %v3403_v27 = vmul.f32 %v2404_v41, %v2404_v41  ;;  %v3407_v28 = vmul.f32 %v2408_v42, %v2408_v42  ;;  %v3411_v29 = vmul.f32 %v2412_v43, %v2412_v43  ;;  %v5581_v47 = vld [vmem:[#allocation27_spill] sm:$0xff]  ;;  %v5584_v45 = vld [vmem:[#allocation2_spill] sm:$0xff]  ;;  %v5586_v40 = vld [vmem:[#allocation5_spill] sm:$0xff] }
  0x7a   :  { %v3415_v34 = vmul.f32 %v2435_v48, %v2435_v48  ;;  %v3419_v35 = vmul.f32 %v2439_v49, %v2439_v49  ;;  %v3423_v36 = vmul.f32 %v2443_v50, %v2443_v50  ;;  %v3427_v41 = vmul.f32 %v2466_v55, %v2466_v55  ;;  %v5566_v48 = vld [vmem:[#allocation10_spill] sm:$0xff] }
  0x7b   :  { %v3431_v42 = vmul.f32 %v2470_v56, %v2470_v56  ;;  %v3435_v43 = vmul.f32 %v2474_v57, %v2474_v57  ;;  %v3439_v49 = vmul.f32 %v5566_v48, %v5566_v48  ;;  %v3443_v50 = vmul.f32 %v5567_v61, %v5567_v61  ;;  %v5575_v61 = vld [vmem:[#allocation20_spill] sm:$0xff] }
  0x7c   :  { %v3447_v55 = vmul.f32 %v5568_v2, %v5568_v2  ;;  %v3451_v56 = vmul.f32 %v5569_v3, %v5569_v3  ;;  %v3455_v57 = vmul.f32 %v5570_v0, %v5570_v0  ;;  %v3459_v37 = vmul.f32 %v5571_v4, %v5571_v4  ;;  %v5576_v3 = vld [vmem:[#allocation22_spill] sm:$0xff] }
  0x7d   :  { %v3463_v5 = vmul.f32 %v5572_v21, %v5572_v21  ;;  %v3467_v48 = vmul.f32 %v5573_v6, %v5573_v6  ;;  %v3471_v2 = vmul.f32 %v5575_v61, %v5575_v61  ;;  %v3475_v0 = vmul.f32 %v5576_v3, %v5576_v3 }
  0x7e   :  { %v3479_v4 = vmul.f32 %v5577_v54, %v5577_v54  ;;  %v3483_v21 = vmul.f32 %v5578_v53, %v5578_v53  ;;  %v3487_v6 = vmul.f32 %v2581_v30, %v2581_v30  ;;  %v3491_v61 = vmul.f32 %v5580_v52, %v5580_v52 }
  0x7f   :  { %5574 = vst [vmem:[#allocation10_spill] sm:$0xff] %v3467_v48  ;;  %v3495_v3 = vmul.f32 %v5581_v47, %v5581_v47  ;;  %v3499_v54 = vmul.f32 %v5582_v46, %v5582_v46  ;;  %v3503_v53 = vmul.f32 %v5584_v45, %v5584_v45  ;;  %v3507_v30 = vmul.f32 %v5586_v40, %v5586_v40  ;;  %v5592_v48 = vld [vmem:[#allocation8_spill] sm:$0xff] }
  0x80   :  { %5579 = vst [vmem:[#allocation11_spill] sm:$0xff] %v3483_v21  ;;  %v3511_v52 = vmul.f32 %v5588_v39, %v5588_v39  ;;  %v5590_v21 = vld [vmem:[#allocation7_spill] sm:$0xff]  ;;  %v3519_v46 = vmul.f32 %v5592_v48, %v5592_v48 }
  0x81   :  { %5583 = vst [vmem:[#allocation12_spill] sm:$0xff] %v3499_v54  ;;  %5585 = vst [vmem:[#allocation14_spill] sm:$0xff] %v3503_v53  ;;  %v3515_v47 = vmul.f32 %v5590_v21, %v5590_v21  ;;  %v5594_v54 = vld [vmem:[#allocation9_spill] sm:$0xff] }
  0x82   :  { %5587 = vst [vmem:[#allocation15_spill] sm:$0xff] %v3507_v30  ;;  %5589 = vst [vmem:[#allocation16_spill] sm:$0xff] %v3511_v52  ;;  %v3523_v45 = vmul.f32 %v5594_v54, %v5594_v54  ;;  %v5596_v53 = vld [vmem:[#allocation13_spill] sm:$0xff] }
  0x83   :  { %5591 = vst [vmem:[#allocation18_spill] sm:$0xff] %v3515_v47  ;;  %5593 = vst [vmem:[#allocation19_spill] sm:$0xff] %v3519_v46  ;;  %v3527_v40 = vmul.f32 %v5596_v53, %v5596_v53  ;;  %v5598_v30 = vld [vmem:[#allocation17_spill] sm:$0xff]  ;;  %v5604_v46 = vld [vmem:[#allocation28_spill] sm:$0xff] }
  0x84   :  { %5595 = vst [vmem:[#allocation20_spill] sm:$0xff] %v3523_v45  ;;  %v3531_v39 = vmul.f32 %v5598_v30, %v5598_v30  ;;  %v5600_v52 = vld [vmem:[#allocation21_spill] sm:$0xff]  ;;  %v3543_v54 = vmul.f32 %v5604_v46, %v5604_v46  ;;  %v5606_v45 = vld [vmem:[#allocation30_spill] sm:$0xff] }
  0x85   :  { %5597 = vst [vmem:[#allocation22_spill] sm:$0xff] %v3527_v40  ;;  %v3535_v21 = vmul.f32 %v5600_v52, %v5600_v52  ;;  %v5602_v47 = vld [vmem:[#allocation25_spill] sm:$0xff]  ;;  %v3547_v53 = vmul.f32 %v5606_v45, %v5606_v45  ;;  %v5608_v40 = vld [vmem:[#allocation31_spill] sm:$0xff] }
  0x86   :  { %5599 = vst [vmem:[#allocation23_spill] sm:$0xff] %v3531_v39  ;;  %v3539_v48 = vmul.f32 %v5602_v47, %v5602_v47  ;;  %5605 = vst [vmem:[#allocation27_spill] sm:$0xff] %v3543_v54  ;;  %v3551_v30 = vmul.f32 %v5608_v40, %v5608_v40  ;;  %v5610_v39 = vld [vmem:[#allocation32_spill] sm:$0xff]  ;;  %v5616_v54 = vld [vmem:[#allocation35_spill] sm:$0xff] }
  0x87   :  { %5601 = vst [vmem:[#allocation24_spill] sm:$0xff] %v3535_v21  ;;  %5607 = vst [vmem:[#allocation29_spill] sm:$0xff] %v3547_v53  ;;  %v3555_v52 = vmul.f32 %v5610_v39, %v5610_v39  ;;  %v5612_v21 = vld [vmem:[#allocation33_spill] sm:$0xff]  ;;  %v3567_v45 = vmul.f32 %v5616_v54, %v5616_v54  ;;  %v5618_v53 = vld [vmem:[#allocation36_spill] sm:$0xff] }
  0x88   :  { %5603 = vst [vmem:[#allocation26_spill] sm:$0xff] %v3539_v48  ;;  %5609 = vst [vmem:[#allocation2_spill] sm:$0xff] %v3551_v30  ;;  %v3559_v47 = vmul.f32 %v5612_v21, %v5612_v21  ;;  %v5614_v48 = vld [vmem:[#allocation34_spill] sm:$0xff]  ;;  %v3571_v40 = vmul.f32 %v5618_v53, %v5618_v53  ;;  %v5620_v30 = vld [vmem:[#allocation37_spill] sm:$0xff] }
  0x89   :  { %5611 = vst [vmem:[#allocation5_spill] sm:$0xff] %v3555_v52  ;;  %v3563_v46 = vmul.f32 %v5614_v48, %v5614_v48  ;;  %5617 = vst [vmem:[#allocation8_spill] sm:$0xff] %v3567_v45  ;;  %v3575_v39 = vmul.f32 %v5620_v30, %v5620_v30  ;;  %v5622_v52 = vld [vmem:[#allocation38_spill] sm:$0xff]  ;;  %v5628_v45 = vld [vmem:[#allocation45_spill] sm:$0xff] }
  0x8a   :  { %5613 = vst [vmem:[#allocation6_spill] sm:$0xff] %v3559_v47  ;;  %5619 = vst [vmem:[#allocation9_spill] sm:$0xff] %v3571_v40  ;;  %v3579_v21 = vmul.f32 %v5622_v52, %v5622_v52  ;;  %v5624_v47 = vld [vmem:[#allocation41_spill] sm:$0xff]  ;;  %v3591_v53 = vmul.f32 %v5628_v45, %v5628_v45  ;;  %v5630_v40 = vld [vmem:[#allocation46_spill] sm:$0xff] }
  0x8b   :  { %5615 = vst [vmem:[#allocation7_spill] sm:$0xff] %v3563_v46  ;;  %5621 = vst [vmem:[#allocation13_spill] sm:$0xff] %v3575_v39  ;;  %v3583_v48 = vmul.f32 %v5624_v47, %v5624_v47  ;;  %v5626_v46 = vld [vmem:[#allocation42_spill] sm:$0xff]  ;;  %v3595_v30 = vmul.f32 %v5630_v40, %v5630_v40  ;;  %v5632_v39 = vld [vmem:[#allocation47_spill] sm:$0xff] }
  0x8c   :  { %5623 = vst [vmem:[#allocation17_spill] sm:$0xff] %v3579_v21  ;;  %v3587_v54 = vmul.f32 %v5626_v46, %v5626_v46  ;;  %5629 = vst [vmem:[#allocation28_spill] sm:$0xff] %v3591_v53  ;;  %v3599_v52 = vmul.f32 %v5632_v39, %v5632_v39  ;;  %v5634_v21 = vld [vmem:[#allocation48_spill] sm:$0xff]  ;;  %v5640_v53 = vld [vmem:[#allocation39_spill] sm:$0xff] }
  0x8d   :  { %5625 = vst [vmem:[#allocation21_spill] sm:$0xff] %v3583_v48  ;;  %5631 = vst [vmem:[#allocation30_spill] sm:$0xff] %v3595_v30  ;;  %v3603_v47 = vmul.f32 %v5634_v21, %v5634_v21  ;;  %v5636_v48 = vld [vmem:[#allocation49_spill] sm:$0xff]  ;;  %v3615_v40 = vmul.f32 %v5640_v53, %v5640_v53  ;;  %v5642_v30 = vld [vmem:[#allocation40_spill] sm:$0xff] }
  0x8e   :  { %5627 = vst [vmem:[#allocation25_spill] sm:$0xff] %v3587_v54  ;;  %5633 = vst [vmem:[#allocation31_spill] sm:$0xff] %v3599_v52  ;;  %v3607_v46 = vmul.f32 %v5636_v48, %v5636_v48  ;;  %v5638_v54 = vld [vmem:[#allocation50_spill] sm:$0xff]  ;;  %v3619_v39 = vmul.f32 %v5642_v30, %v5642_v30  ;;  %v5644_v52 = vld [vmem:[#allocation43_spill] sm:$0xff] }
  0x8f   :  { %5635 = vst [vmem:[#allocation32_spill] sm:$0xff] %v3603_v47  ;;  %v3611_v45 = vmul.f32 %v5638_v54, %v5638_v54  ;;  %5641 = vst [vmem:[#allocation35_spill] sm:$0xff] %v3615_v40  ;;  %v3623_v21 = vmul.f32 %v5644_v52, %v5644_v52  ;;  %v5646_v47 = vld [vmem:[#allocation44_spill] sm:$0xff] }
  0x90   :  { %5637 = vst [vmem:[#allocation33_spill] sm:$0xff] %v3607_v46  ;;  %5643 = vst [vmem:[#allocation36_spill] sm:$0xff] %v3619_v39  ;;  %v3627_v48 = vmul.f32 %v5646_v47, %v5646_v47  ;;  %v5648_v46 = vld [vmem:[#allocation3_spill] sm:$0xff]  ;;  %v5652_v40 = vld [vmem:[#allocation52_spill] sm:$0xff] }
  0x91   :  { %5639 = vst [vmem:[#allocation34_spill] sm:$0xff] %v3611_v45  ;;  %5645 = vst [vmem:[#allocation37_spill] sm:$0xff] %v3623_v21  ;;  %v3631_v54 = vmul.f32 %v5648_v46, %v5648_v46  ;;  %v5650_v45 = vld [vmem:[#allocation51_spill] sm:$0xff]  ;;  %v3639_v30 = vmul.f32 %v5652_v40, %v5652_v40  ;;  %v5654_v39 = vld [vmem:[#allocation53_spill] sm:$0xff] }
  0x92   :  { %5647 = vst [vmem:[#allocation38_spill] sm:$0xff] %v3627_v48  ;;  %v3635_v53 = vmul.f32 %v5650_v45, %v5650_v45  ;;  %v3643_v52 = vmul.f32 %v5654_v39, %v5654_v39  ;;  %v5656_v21 = vld [vmem:[#allocation54_spill] sm:$0xff]  ;;  %v5658_v48 = vld [vmem:[#allocation55_spill] sm:$0xff] }
  0x93   :  { %5649 = vst [vmem:[#allocation41_spill] sm:$0xff] %v3631_v54  ;;  %5653 = vst [vmem:[#allocation45_spill] sm:$0xff] %v3639_v30  ;;  %v3647_v47 = vmul.f32 %v5656_v21, %v5656_v21  ;;  %v3651_v46 = vmul.f32 %v5658_v48, %v5658_v48  ;;  %v5660_v54 = vld [vmem:[#allocation56_spill] sm:$0xff]  ;;  %v5664_v30 = vld [vmem:[#allocation58_spill] sm:$0xff] }
  0x94   :  { %5651 = vst [vmem:[#allocation42_spill] sm:$0xff] %v3635_v53  ;;  %5655 = vst [vmem:[#allocation46_spill] sm:$0xff] %v3643_v52  ;;  %v3655_v45 = vmul.f32 %v5660_v54, %v5660_v54  ;;  %v5662_v53 = vld [vmem:[#allocation57_spill] sm:$0xff]  ;;  %v3663_v39 = vmul.f32 %v5664_v30, %v5664_v30  ;;  %v5666_v52 = vld [vmem:[#allocation59_spill] sm:$0xff] }
  0x95   :  { %5657 = vst [vmem:[#allocation47_spill] sm:$0xff] %v3647_v47  ;;  %5659 = vst [vmem:[#allocation48_spill] sm:$0xff] %v3651_v46  ;;  %v3659_v40 = vmul.f32 %v5662_v53, %v5662_v53  ;;  %v3667_v21 = vmul.f32 %v5666_v52, %v5666_v52  ;;  %v5668_v47 = vld [vmem:[#allocation60_spill] sm:$0xff]  ;;  %v5670_v46 = vld [vmem:[#allocation61_spill] sm:$0xff] }
  0x96   :  { %5661 = vst [vmem:[#allocation49_spill] sm:$0xff] %v3655_v45  ;;  %5665 = vst [vmem:[#allocation39_spill] sm:$0xff] %v3663_v39  ;;  %v3671_v48 = vmul.f32 %v5668_v47, %v5668_v47  ;;  %v3675_v54 = vmul.f32 %v5670_v46, %v5670_v46  ;;  %v5672_v45 = vld [vmem:[#allocation62_spill] sm:$0xff]  ;;  %v5676_v39 = vld [vmem:[#allocation64_spill] sm:$0xff] }
  0x97   :  { %5663 = vst [vmem:[#allocation50_spill] sm:$0xff] %v3659_v40  ;;  %5667 = vst [vmem:[#allocation40_spill] sm:$0xff] %v3667_v21  ;;  %v3679_v53 = vmul.f32 %v5672_v45, %v5672_v45  ;;  %v5674_v40 = vld [vmem:[#allocation63_spill] sm:$0xff]  ;;  %v3687_v52 = vmul.f32 %v5676_v39, %v5676_v39  ;;  %v5678_v21 = vld [vmem:[#allocation65_spill] sm:$0xff] }
  0x98   :  { %5669 = vst [vmem:[#allocation43_spill] sm:$0xff] %v3671_v48  ;;  %5671 = vst [vmem:[#allocation44_spill] sm:$0xff] %v3675_v54  ;;  %v3683_v30 = vmul.f32 %v5674_v40, %v5674_v40  ;;  %v3691_v47 = vmul.f32 %v5678_v21, %v5678_v21  ;;  %v5680_v48 = vld [vmem:[#allocation73_spill] sm:$0xff]  ;;  %v5682_v54 = vld [vmem:[#allocation74_spill] sm:$0xff] }
  0x99   :  { %5673 = vst [vmem:[#allocation3_spill] sm:$0xff] %v3679_v53  ;;  %5677 = vst [vmem:[#allocation52_spill] sm:$0xff] %v3687_v52  ;;  %v3695_v46 = vmul.f32 %v5680_v48, %v5680_v48  ;;  %v3699_v45 = vmul.f32 %v5682_v54, %v5682_v54  ;;  %v5684_v53 = vld [vmem:[#allocation75_spill] sm:$0xff]  ;;  %v5688_v52 = vld [vmem:[#allocation78_spill] sm:$0xff] }
  0x9a   :  { %5675 = vst [vmem:[#allocation51_spill] sm:$0xff] %v3683_v30  ;;  %5679 = vst [vmem:[#allocation53_spill] sm:$0xff] %v3691_v47  ;;  %v3703_v40 = vmul.f32 %v5684_v53, %v5684_v53  ;;  %v5686_v30 = vld [vmem:[#allocation77_spill] sm:$0xff]  ;;  %v3711_v21 = vmul.f32 %v5688_v52, %v5688_v52  ;;  %v5690_v47 = vld [vmem:[#allocation79_spill] sm:$0xff] }
  0x9b   :  { %5681 = vst [vmem:[#allocation54_spill] sm:$0xff] %v3695_v46  ;;  %5683 = vst [vmem:[#allocation55_spill] sm:$0xff] %v3699_v45  ;;  %v3707_v39 = vmul.f32 %v5686_v30, %v5686_v30  ;;  %v3715_v48 = vmul.f32 %v5690_v47, %v5690_v47  ;;  %v5692_v46 = vld [vmem:[#allocation80_spill] sm:$0xff]  ;;  %v5694_v45 = vld [vmem:[#allocation81_spill] sm:$0xff] }
  0x9c   :  { %5685 = vst [vmem:[#allocation56_spill] sm:$0xff] %v3703_v40  ;;  %5689 = vst [vmem:[#allocation58_spill] sm:$0xff] %v3711_v21  ;;  %v3719_v54 = vmul.f32 %v5692_v46, %v5692_v46  ;;  %v3723_v53 = vmul.f32 %v5694_v45, %v5694_v45  ;;  %v5696_v40 = vld [vmem:[#allocation66_spill] sm:$0xff]  ;;  %v5700_v21 = vld [vmem:[#allocation68_spill] sm:$0xff] }
  0x9d   :  { %5687 = vst [vmem:[#allocation57_spill] sm:$0xff] %v3707_v39  ;;  %5691 = vst [vmem:[#allocation59_spill] sm:$0xff] %v3715_v48  ;;  %v3727_v30 = vmul.f32 %v5696_v40, %v5696_v40  ;;  %v5698_v39 = vld [vmem:[#allocation67_spill] sm:$0xff]  ;;  %v3735_v47 = vmul.f32 %v5700_v21, %v5700_v21  ;;  %v5702_v48 = vld [vmem:[#allocation69_spill] sm:$0xff] }
  0x9e   :  { %5693 = vst [vmem:[#allocation60_spill] sm:$0xff] %v3719_v54  ;;  %5695 = vst [vmem:[#allocation61_spill] sm:$0xff] %v3723_v53  ;;  %v3731_v52 = vmul.f32 %v5698_v39, %v5698_v39  ;;  %v3739_v46 = vmul.f32 %v5702_v48, %v5702_v48  ;;  %v5704_v54 = vld [vmem:[#allocation70_spill] sm:$0xff]  ;;  %v5706_v53 = vld [vmem:[#allocation71_spill] sm:$0xff] }
  0x9f   :  { %5697 = vst [vmem:[#allocation62_spill] sm:$0xff] %v3727_v30  ;;  %5701 = vst [vmem:[#allocation64_spill] sm:$0xff] %v3735_v47  ;;  %v3743_v45 = vmul.f32 %v5704_v54, %v5704_v54  ;;  %v3747_v40 = vmul.f32 %v5706_v53, %v5706_v53  ;;  %v5708_v30 = vld [vmem:[#allocation72_spill] sm:$0xff] }
  0xa0   :  { %5699 = vst [vmem:[#allocation63_spill] sm:$0xff] %v3731_v52  ;;  %5703 = vst [vmem:[#allocation65_spill] sm:$0xff] %v3739_v46  ;;  %v3751_v39 = vmul.f32 %v5708_v30, %v5708_v30  ;;  %v5710_v52 = vld [vmem:[#allocation76_spill] sm:$0xff]  ;;  %v5714_v46 = vld [vmem:[#allocation82_spill] sm:$0xff] }
  0xa1   :  { %5705 = vst [vmem:[#allocation73_spill] sm:$0xff] %v3743_v45  ;;  %5707 = vst [vmem:[#allocation74_spill] sm:$0xff] %v3747_v40  ;;  %v3755_v21 = vmul.f32 %v5710_v52, %v5710_v52  ;;  %v5712_v47 = vld [vmem:[#allocation4_spill] sm:$0xff]  ;;  %v3763_v54 = vmul.f32 %v5714_v46, %v5714_v46  ;;  %v5716_v45 = vld [vmem:[#allocation83_spill] sm:$0xff] }
  0xa2   :  { %5709 = vst [vmem:[#allocation75_spill] sm:$0xff] %v3751_v39  ;;  %v3759_v48 = vmul.f32 %v5712_v47, %v5712_v47  ;;  %v3767_v53 = vmul.f32 %v5716_v45, %v5716_v45  ;;  %v5718_v40 = vld [vmem:[#allocation84_spill] sm:$0xff]  ;;  %v5720_v39 = vld [vmem:[#allocation85_spill] sm:$0xff] }
  0xa3   :  { %5711 = vst [vmem:[#allocation77_spill] sm:$0xff] %v3755_v21  ;;  %5715 = vst [vmem:[#allocation79_spill] sm:$0xff] %v3763_v54  ;;  %v3771_v30 = vmul.f32 %v5718_v40, %v5718_v40  ;;  %v3775_v52 = vmul.f32 %v5720_v39, %v5720_v39  ;;  %v5722_v21 = vld [vmem:[#allocation86_spill] sm:$0xff]  ;;  %v5726_v54 = vld [vmem:[#allocation88_spill] sm:$0xff] }
  0xa4   :  { %5713 = vst [vmem:[#allocation78_spill] sm:$0xff] %v3759_v48  ;;  %5717 = vst [vmem:[#allocation80_spill] sm:$0xff] %v3767_v53  ;;  %v3779_v47 = vmul.f32 %v5722_v21, %v5722_v21  ;;  %v5724_v48 = vld [vmem:[#allocation87_spill] sm:$0xff]  ;;  %v3787_v45 = vmul.f32 %v5726_v54, %v5726_v54  ;;  %v5728_v53 = vld [vmem:[#allocation89_spill] sm:$0xff] }
  0xa5   :  { %5719 = vst [vmem:[#allocation81_spill] sm:$0xff] %v3771_v30  ;;  %5721 = vst [vmem:[#allocation66_spill] sm:$0xff] %v3775_v52  ;;  %v3783_v46 = vmul.f32 %v5724_v48, %v5724_v48  ;;  %v3791_v40 = vmul.f32 %v5728_v53, %v5728_v53  ;;  %v5730_v30 = vld [vmem:[#allocation90_spill] sm:$0xff]  ;;  %v5732_v52 = vld [vmem:[#allocation91_spill] sm:$0xff] }
  0xa6   :  { %5723 = vst [vmem:[#allocation67_spill] sm:$0xff] %v3779_v47  ;;  %5727 = vst [vmem:[#allocation69_spill] sm:$0xff] %v3787_v45  ;;  %v3795_v39 = vmul.f32 %v5730_v30, %v5730_v30  ;;  %v3799_v21 = vmul.f32 %v5732_v52, %v5732_v52  ;;  %v5734_v47 = vld [vmem:[#allocation92_spill] sm:$0xff]  ;;  %v5738_v45 = vld [vmem:[#allocation106_spill] sm:$0xff] }
  0xa7   :  { %5725 = vst [vmem:[#allocation68_spill] sm:$0xff] %v3783_v46  ;;  %5729 = vst [vmem:[#allocation70_spill] sm:$0xff] %v3791_v40  ;;  %v3803_v48 = vmul.f32 %v5734_v47, %v5734_v47  ;;  %v5736_v46 = vld [vmem:[#allocation105_spill] sm:$0xff]  ;;  %v3811_v53 = vmul.f32 %v5738_v45, %v5738_v45  ;;  %v5740_v40 = vld [vmem:[#allocation107_spill] sm:$0xff] }
  0xa8   :  { %5731 = vst [vmem:[#allocation71_spill] sm:$0xff] %v3795_v39  ;;  %5733 = vst [vmem:[#allocation72_spill] sm:$0xff] %v3799_v21  ;;  %v3807_v54 = vmul.f32 %v5736_v46, %v5736_v46  ;;  %v3815_v30 = vmul.f32 %v5740_v40, %v5740_v40  ;;  %v5742_v39 = vld [vmem:[#allocation108_spill] sm:$0xff]  ;;  %v5744_v21 = vld [vmem:[#allocation109_spill] sm:$0xff] }
  0xa9   :  { %5735 = vst [vmem:[#allocation76_spill] sm:$0xff] %v3803_v48  ;;  %5739 = vst [vmem:[#allocation82_spill] sm:$0xff] %v3811_v53  ;;  %v3819_v52 = vmul.f32 %v5742_v39, %v5742_v39  ;;  %v3823_v47 = vmul.f32 %v5744_v21, %v5744_v21  ;;  %v5746_v48 = vld [vmem:[#allocation110_spill] sm:$0xff]  ;;  %v5750_v53 = vld [vmem:[#allocation112_spill] sm:$0xff] }
  0xaa   :  { %5737 = vst [vmem:[#allocation4_spill] sm:$0xff] %v3807_v54  ;;  %5741 = vst [vmem:[#allocation83_spill] sm:$0xff] %v3815_v30  ;;  %v3827_v46 = vmul.f32 %v5746_v48, %v5746_v48  ;;  %v5748_v54 = vld [vmem:[#allocation111_spill] sm:$0xff]  ;;  %v3835_v40 = vmul.f32 %v5750_v53, %v5750_v53  ;;  %v5752_v30 = vld [vmem:[#allocation93_spill] sm:$0xff] }
  0xab   :  { %5743 = vst [vmem:[#allocation84_spill] sm:$0xff] %v3819_v52  ;;  %5745 = vst [vmem:[#allocation85_spill] sm:$0xff] %v3823_v47  ;;  %v3831_v45 = vmul.f32 %v5748_v54, %v5748_v54  ;;  %v3839_v39 = vmul.f32 %v5752_v30, %v5752_v30  ;;  %v5754_v52 = vld [vmem:[#allocation94_spill] sm:$0xff]  ;;  %v5756_v47 = vld [vmem:[#allocation95_spill] sm:$0xff] }
  0xac   :  { %5747 = vst [vmem:[#allocation86_spill] sm:$0xff] %v3827_v46  ;;  %5751 = vst [vmem:[#allocation88_spill] sm:$0xff] %v3835_v40  ;;  %v3843_v21 = vmul.f32 %v5754_v52, %v5754_v52  ;;  %v3847_v48 = vmul.f32 %v5756_v47, %v5756_v47  ;;  %v5758_v46 = vld [vmem:[#allocation96_spill] sm:$0xff]  ;;  %v5762_v40 = vld [vmem:[#allocation98_spill] sm:$0xff] }
  0xad   :  { %5749 = vst [vmem:[#allocation87_spill] sm:$0xff] %v3831_v45  ;;  %5753 = vst [vmem:[#allocation89_spill] sm:$0xff] %v3839_v39  ;;  %v3851_v54 = vmul.f32 %v5758_v46, %v5758_v46  ;;  %v5760_v45 = vld [vmem:[#allocation97_spill] sm:$0xff]  ;;  %v3859_v30 = vmul.f32 %v5762_v40, %v5762_v40  ;;  %v5764_v39 = vld [vmem:[#allocation99_spill] sm:$0xff] }
  0xae   :  { %5755 = vst [vmem:[#allocation90_spill] sm:$0xff] %v3843_v21  ;;  %5757 = vst [vmem:[#allocation91_spill] sm:$0xff] %v3847_v48  ;;  %v3855_v53 = vmul.f32 %v5760_v45, %v5760_v45  ;;  %v3863_v52 = vmul.f32 %v5764_v39, %v5764_v39  ;;  %v5766_v21 = vld [vmem:[#allocation100_spill] sm:$0xff]  ;;  %v5768_v48 = vld [vmem:[#allocation101_spill] sm:$0xff] }
  0xaf   :  { %5759 = vst [vmem:[#allocation92_spill] sm:$0xff] %v3851_v54  ;;  %5763 = vst [vmem:[#allocation106_spill] sm:$0xff] %v3859_v30  ;;  %v3867_v47 = vmul.f32 %v5766_v21, %v5766_v21  ;;  %v3871_v46 = vmul.f32 %v5768_v48, %v5768_v48  ;;  %v5770_v54 = vld [vmem:[#allocation102_spill] sm:$0xff]  ;;  %v5774_v30 = vld [vmem:[#allocation104_spill] sm:$0xff] }
  0xb0   :  { %5761 = vst [vmem:[#allocation105_spill] sm:$0xff] %v3855_v53  ;;  %5765 = vst [vmem:[#allocation107_spill] sm:$0xff] %v3863_v52  ;;  %v3875_v45 = vmul.f32 %v5770_v54, %v5770_v54  ;;  %v5772_v53 = vld [vmem:[#allocation103_spill] sm:$0xff]  ;;  %v3883_v39 = vmul.f32 %v5774_v30, %v5774_v30  ;;  %v5776_v52 = vld [vmem:[#allocation113_spill] sm:$0xff] }
  0xb1   :  { %5767 = vst [vmem:[#allocation108_spill] sm:$0xff] %v3867_v47  ;;  %5769 = vst [vmem:[#allocation109_spill] sm:$0xff] %v3871_v46  ;;  %v3879_v40 = vmul.f32 %v5772_v53, %v5772_v53  ;;  %v3887_v21 = vmul.f32 %v5776_v52, %v5776_v52  ;;  %v5778_v47 = vld [vmem:[#allocation114_spill] sm:$0xff]  ;;  %v5780_v46 = vld [vmem:[#allocation115_spill] sm:$0xff] }
  0xb2   :  { %5771 = vst [vmem:[#allocation110_spill] sm:$0xff] %v3875_v45  ;;  %5775 = vst [vmem:[#allocation112_spill] sm:$0xff] %v3883_v39  ;;  %v3891_v48 = vmul.f32 %v5778_v47, %v5778_v47  ;;  %v3895_v54 = vmul.f32 %v5780_v46, %v5780_v46  ;;  %v5782_v45 = vld [vmem:[#allocation116_spill] sm:$0xff]  ;;  %v5786_v39 = vld [vmem:[#allocation118_spill] sm:$0xff] }
  0xb3   :  { %5773 = vst [vmem:[#allocation111_spill] sm:$0xff] %v3879_v40  ;;  %5777 = vst [vmem:[#allocation93_spill] sm:$0xff] %v3887_v21  ;;  %v3899_v53 = vmul.f32 %v5782_v45, %v5782_v45  ;;  %v5784_v40 = vld [vmem:[#allocation117_spill] sm:$0xff]  ;;  %v3907_v52 = vmul.f32 %v5786_v39, %v5786_v39  ;;  %v5788_v21 = vld [vmem:[#allocation119_spill] sm:$0xff] }
  0xb4   :  { %5779 = vst [vmem:[#allocation94_spill] sm:$0xff] %v3891_v48  ;;  %5781 = vst [vmem:[#allocation95_spill] sm:$0xff] %v3895_v54  ;;  %v3903_v30 = vmul.f32 %v5784_v40, %v5784_v40  ;;  %v3911_v47 = vmul.f32 %v5788_v21, %v5788_v21  ;;  %v5790_v48 = vld [vmem:[#allocation120_spill] sm:$0xff]  ;;  %v5792_v54 = vld [vmem:[#allocation137_spill] sm:$0xff] }
  0xb5   :  { %5783 = vst [vmem:[#allocation96_spill] sm:$0xff] %v3899_v53  ;;  %5787 = vst [vmem:[#allocation98_spill] sm:$0xff] %v3907_v52  ;;  %v3915_v46 = vmul.f32 %v5790_v48, %v5790_v48  ;;  %v3919_v45 = vmul.f32 %v5792_v54, %v5792_v54  ;;  %v5794_v53 = vld [vmem:[#allocation138_spill] sm:$0xff]  ;;  %v5798_v52 = vld [vmem:[#allocation140_spill] sm:$0xff] }
  0xb6   :  { %5785 = vst [vmem:[#allocation97_spill] sm:$0xff] %v3903_v30  ;;  %5789 = vst [vmem:[#allocation99_spill] sm:$0xff] %v3911_v47  ;;  %v3923_v40 = vmul.f32 %v5794_v53, %v5794_v53  ;;  %v5796_v30 = vld [vmem:[#allocation139_spill] sm:$0xff]  ;;  %v3931_v21 = vmul.f32 %v5798_v52, %v5798_v52  ;;  %v5800_v47 = vld [vmem:[#allocation141_spill] sm:$0xff] }
  0xb7   :  { %5791 = vst [vmem:[#allocation100_spill] sm:$0xff] %v3915_v46  ;;  %5793 = vst [vmem:[#allocation101_spill] sm:$0xff] %v3919_v45  ;;  %v3927_v39 = vmul.f32 %v5796_v30, %v5796_v30  ;;  %v3935_v48 = vmul.f32 %v5800_v47, %v5800_v47  ;;  %v5802_v46 = vld [vmem:[#allocation142_spill] sm:$0xff]  ;;  %v5804_v45 = vld [vmem:[#allocation143_spill] sm:$0xff] }
  0xb8   :  { %5795 = vst [vmem:[#allocation102_spill] sm:$0xff] %v3923_v40  ;;  %5799 = vst [vmem:[#allocation104_spill] sm:$0xff] %v3931_v21  ;;  %v3939_v54 = vmul.f32 %v5802_v46, %v5802_v46  ;;  %v3943_v53 = vmul.f32 %v5804_v45, %v5804_v45  ;;  %v5806_v40 = vld [vmem:[#allocation144_spill] sm:$0xff]  ;;  %v5810_v21 = vld [vmem:[#allocation122_spill] sm:$0xff] }
  0xb9   :  { %5797 = vst [vmem:[#allocation103_spill] sm:$0xff] %v3927_v39  ;;  %5801 = vst [vmem:[#allocation113_spill] sm:$0xff] %v3935_v48  ;;  %v3947_v30 = vmul.f32 %v5806_v40, %v5806_v40  ;;  %v5808_v39 = vld [vmem:[#allocation121_spill] sm:$0xff]  ;;  %v3955_v47 = vmul.f32 %v5810_v21, %v5810_v21  ;;  %v5812_v48 = vld [vmem:[#allocation123_spill] sm:$0xff] }
  0xba   :  { %5803 = vst [vmem:[#allocation114_spill] sm:$0xff] %v3939_v54  ;;  %5805 = vst [vmem:[#allocation115_spill] sm:$0xff] %v3943_v53  ;;  %v3951_v52 = vmul.f32 %v5808_v39, %v5808_v39  ;;  %v3959_v46 = vmul.f32 %v5812_v48, %v5812_v48  ;;  %v5814_v54 = vld [vmem:[#allocation124_spill] sm:$0xff]  ;;  %v5816_v53 = vld [vmem:[#allocation125_spill] sm:$0xff] }
  0xbb   :  { %5807 = vst [vmem:[#allocation116_spill] sm:$0xff] %v3947_v30  ;;  %5811 = vst [vmem:[#allocation118_spill] sm:$0xff] %v3955_v47  ;;  %v3963_v45 = vmul.f32 %v5814_v54, %v5814_v54  ;;  %v3967_v40 = vmul.f32 %v5816_v53, %v5816_v53  ;;  %v5818_v30 = vld [vmem:[#allocation126_spill] sm:$0xff]  ;;  %v5822_v47 = vld [vmem:[#allocation128_spill] sm:$0xff] }
  0xbc   :  { %5809 = vst [vmem:[#allocation117_spill] sm:$0xff] %v3951_v52  ;;  %5813 = vst [vmem:[#allocation119_spill] sm:$0xff] %v3959_v46  ;;  %v3971_v39 = vmul.f32 %v5818_v30, %v5818_v30  ;;  %v5820_v52 = vld [vmem:[#allocation127_spill] sm:$0xff]  ;;  %v3979_v48 = vmul.f32 %v5822_v47, %v5822_v47  ;;  %v5824_v46 = vld [vmem:[#allocation129_spill] sm:$0xff] }
  0xbd   :  { %5815 = vst [vmem:[#allocation120_spill] sm:$0xff] %v3963_v45  ;;  %5817 = vst [vmem:[#allocation137_spill] sm:$0xff] %v3967_v40  ;;  %v3975_v21 = vmul.f32 %v5820_v52, %v5820_v52  ;;  %v3983_v54 = vmul.f32 %v5824_v46, %v5824_v46  ;;  %v5826_v45 = vld [vmem:[#allocation130_spill] sm:$0xff]  ;;  %v5828_v40 = vld [vmem:[#allocation131_spill] sm:$0xff] }
  0xbe   :  { %5819 = vst [vmem:[#allocation138_spill] sm:$0xff] %v3971_v39  ;;  %5823 = vst [vmem:[#allocation140_spill] sm:$0xff] %v3979_v48  ;;  %v3987_v53 = vmul.f32 %v5826_v45, %v5826_v45  ;;  %v3991_v30 = vmul.f32 %v5828_v40, %v5828_v40  ;;  %v5830_v39 = vld [vmem:[#allocation132_spill] sm:$0xff]  ;;  %v5834_v48 = vld [vmem:[#allocation134_spill] sm:$0xff] }
  0xbf   :  { %5821 = vst [vmem:[#allocation139_spill] sm:$0xff] %v3975_v21  ;;  %5825 = vst [vmem:[#allocation141_spill] sm:$0xff] %v3983_v54  ;;  %v3995_v52 = vmul.f32 %v5830_v39, %v5830_v39  ;;  %v5832_v21 = vld [vmem:[#allocation133_spill] sm:$0xff]  ;;  %v4003_v46 = vmul.f32 %v5834_v48, %v5834_v48  ;;  %v5836_v54 = vld [vmem:[#allocation135_spill] sm:$0xff] }
  0xc0   :  { %5827 = vst [vmem:[#allocation142_spill] sm:$0xff] %v3987_v53  ;;  %5829 = vst [vmem:[#allocation143_spill] sm:$0xff] %v3991_v30  ;;  %v3999_v47 = vmul.f32 %v5832_v21, %v5832_v21  ;;  %v4007_v45 = vmul.f32 %v5836_v54, %v5836_v54  ;;  %v5838_v53 = vld [vmem:[#allocation136_spill] sm:$0xff]  ;;  %v5840_v30 = vld [vmem:[#allocation145_spill] sm:$0xff] }
  0xc1   :  { %5831 = vst [vmem:[#allocation144_spill] sm:$0xff] %v3995_v52  ;;  %5835 = vst [vmem:[#allocation122_spill] sm:$0xff] %v4003_v46  ;;  %v4011_v40 = vmul.f32 %v5838_v53, %v5838_v53  ;;  %v4015_v39 = vmul.f32 %v5840_v30, %v5840_v30  ;;  %v5842_v52 = vld [vmem:[#allocation146_spill] sm:$0xff]  ;;  %v5846_v46 = vld [vmem:[#allocation148_spill] sm:$0xff] }
  0xc2   :  { %5833 = vst [vmem:[#allocation121_spill] sm:$0xff] %v3999_v47  ;;  %5837 = vst [vmem:[#allocation123_spill] sm:$0xff] %v4007_v45  ;;  %v4019_v21 = vmul.f32 %v5842_v52, %v5842_v52  ;;  %v5844_v47 = vld [vmem:[#allocation147_spill] sm:$0xff]  ;;  %v4027_v54 = vmul.f32 %v5846_v46, %v5846_v46  ;;  %v5848_v45 = vld [vmem:[#allocation169_spill] sm:$0xff] }
  0xc3   :  { %5839 = vst [vmem:[#allocation124_spill] sm:$0xff] %v4011_v40  ;;  %5841 = vst [vmem:[#allocation125_spill] sm:$0xff] %v4015_v39  ;;  %v4023_v48 = vmul.f32 %v5844_v47, %v5844_v47  ;;  %v4031_v53 = vmul.f32 %v5848_v45, %v5848_v45  ;;  %v5850_v40 = vld [vmem:[#allocation170_spill] sm:$0xff]  ;;  %v5852_v39 = vld [vmem:[#allocation171_spill] sm:$0xff] }
  0xc4   :  { %5843 = vst [vmem:[#allocation126_spill] sm:$0xff] %v4019_v21  ;;  %5847 = vst [vmem:[#allocation128_spill] sm:$0xff] %v4027_v54  ;;  %v4035_v30 = vmul.f32 %v5850_v40, %v5850_v40  ;;  %v4039_v52 = vmul.f32 %v5852_v39, %v5852_v39  ;;  %v5854_v21 = vld [vmem:[#allocation172_spill] sm:$0xff]  ;;  %v5858_v54 = vld [vmem:[#allocation174_spill] sm:$0xff] }
  0xc5   :  { %5845 = vst [vmem:[#allocation127_spill] sm:$0xff] %v4023_v48  ;;  %5849 = vst [vmem:[#allocation129_spill] sm:$0xff] %v4031_v53  ;;  %v4043_v47 = vmul.f32 %v5854_v21, %v5854_v21  ;;  %v5856_v48 = vld [vmem:[#allocation173_spill] sm:$0xff]  ;;  %v4051_v45 = vmul.f32 %v5858_v54, %v5858_v54  ;;  %v5860_v53 = vld [vmem:[#allocation175_spill] sm:$0xff] }
  0xc6   :  { %5851 = vst [vmem:[#allocation130_spill] sm:$0xff] %v4035_v30  ;;  %5853 = vst [vmem:[#allocation131_spill] sm:$0xff] %v4039_v52  ;;  %v4047_v46 = vmul.f32 %v5856_v48, %v5856_v48  ;;  %v4055_v40 = vmul.f32 %v5860_v53, %v5860_v53  ;;  %v5862_v30 = vld [vmem:[#allocation176_spill] sm:$0xff]  ;;  %v5864_v52 = vld [vmem:[#allocation149_spill] sm:$0xff] }
  0xc7   :  { %5855 = vst [vmem:[#allocation132_spill] sm:$0xff] %v4043_v47  ;;  %5859 = vst [vmem:[#allocation134_spill] sm:$0xff] %v4051_v45  ;;  %v4059_v39 = vmul.f32 %v5862_v30, %v5862_v30  ;;  %v4063_v21 = vmul.f32 %v5864_v52, %v5864_v52  ;;  %v5866_v47 = vld [vmem:[#allocation150_spill] sm:$0xff]  ;;  %v5870_v45 = vld [vmem:[#allocation152_spill] sm:$0xff] }
  0xc8   :  { %5857 = vst [vmem:[#allocation133_spill] sm:$0xff] %v4047_v46  ;;  %5861 = vst [vmem:[#allocation135_spill] sm:$0xff] %v4055_v40  ;;  %v4067_v48 = vmul.f32 %v5866_v47, %v5866_v47  ;;  %v5868_v46 = vld [vmem:[#allocation151_spill] sm:$0xff]  ;;  %v4075_v53 = vmul.f32 %v5870_v45, %v5870_v45  ;;  %v5872_v40 = vld [vmem:[#allocation153_spill] sm:$0xff] }
  0xc9   :  { %5863 = vst [vmem:[#allocation136_spill] sm:$0xff] %v4059_v39  ;;  %5865 = vst [vmem:[#allocation145_spill] sm:$0xff] %v4063_v21  ;;  %v4071_v54 = vmul.f32 %v5868_v46, %v5868_v46  ;;  %v4079_v30 = vmul.f32 %v5872_v40, %v5872_v40  ;;  %v5874_v39 = vld [vmem:[#allocation154_spill] sm:$0xff]  ;;  %v5876_v21 = vld [vmem:[#allocation155_spill] sm:$0xff] }
  0xca   :  { %5867 = vst [vmem:[#allocation146_spill] sm:$0xff] %v4067_v48  ;;  %5871 = vst [vmem:[#allocation148_spill] sm:$0xff] %v4075_v53  ;;  %v4083_v52 = vmul.f32 %v5874_v39, %v5874_v39  ;;  %v4087_v47 = vmul.f32 %v5876_v21, %v5876_v21  ;;  %v5878_v48 = vld [vmem:[#allocation156_spill] sm:$0xff]  ;;  %v5882_v53 = vld [vmem:[#allocation158_spill] sm:$0xff] }
  0xcb   :  { %5869 = vst [vmem:[#allocation147_spill] sm:$0xff] %v4071_v54  ;;  %5873 = vst [vmem:[#allocation169_spill] sm:$0xff] %v4079_v30  ;;  %v4091_v46 = vmul.f32 %v5878_v48, %v5878_v48  ;;  %v5880_v54 = vld [vmem:[#allocation157_spill] sm:$0xff]  ;;  %v4099_v40 = vmul.f32 %v5882_v53, %v5882_v53  ;;  %v5884_v30 = vld [vmem:[#allocation159_spill] sm:$0xff] }
  0xcc   :  { %5875 = vst [vmem:[#allocation170_spill] sm:$0xff] %v4083_v52  ;;  %5877 = vst [vmem:[#allocation171_spill] sm:$0xff] %v4087_v47  ;;  %v4095_v45 = vmul.f32 %v5880_v54, %v5880_v54  ;;  %v4103_v39 = vmul.f32 %v5884_v30, %v5884_v30  ;;  %v5886_v52 = vld [vmem:[#allocation160_spill] sm:$0xff]  ;;  %v5888_v47 = vld [vmem:[#allocation161_spill] sm:$0xff] }
  0xcd   :  { %5879 = vst [vmem:[#allocation172_spill] sm:$0xff] %v4091_v46  ;;  %5883 = vst [vmem:[#allocation174_spill] sm:$0xff] %v4099_v40  ;;  %v4107_v21 = vmul.f32 %v5886_v52, %v5886_v52  ;;  %v4111_v48 = vmul.f32 %v5888_v47, %v5888_v47  ;;  %v5890_v46 = vld [vmem:[#allocation162_spill] sm:$0xff]  ;;  %v5894_v40 = vld [vmem:[#allocation164_spill] sm:$0xff] }
  0xce   :  { %5881 = vst [vmem:[#allocation173_spill] sm:$0xff] %v4095_v45  ;;  %5885 = vst [vmem:[#allocation175_spill] sm:$0xff] %v4103_v39  ;;  %v4115_v54 = vmul.f32 %v5890_v46, %v5890_v46  ;;  %v5892_v45 = vld [vmem:[#allocation163_spill] sm:$0xff]  ;;  %v4123_v30 = vmul.f32 %v5894_v40, %v5894_v40  ;;  %v5896_v39 = vld [vmem:[#allocation165_spill] sm:$0xff] }
  0xcf   :  { %5887 = vst [vmem:[#allocation176_spill] sm:$0xff] %v4107_v21  ;;  %5889 = vst [vmem:[#allocation149_spill] sm:$0xff] %v4111_v48  ;;  %v4119_v53 = vmul.f32 %v5892_v45, %v5892_v45  ;;  %v4127_v52 = vmul.f32 %v5896_v39, %v5896_v39  ;;  %v5898_v21 = vld [vmem:[#allocation166_spill] sm:$0xff]  ;;  %v5900_v48 = vld [vmem:[#allocation167_spill] sm:$0xff] }
  0xd0   :  { %5891 = vst [vmem:[#allocation150_spill] sm:$0xff] %v4115_v54  ;;  %5895 = vst [vmem:[#allocation152_spill] sm:$0xff] %v4123_v30  ;;  %v4131_v47 = vmul.f32 %v5898_v21, %v5898_v21  ;;  %v4135_v46 = vmul.f32 %v5900_v48, %v5900_v48  ;;  %v5901_v54 = vld [vmem:[#allocation168_spill] sm:$0xff]  ;;  %v5903_v30 = vld [vmem:[#allocation202_spill] sm:$0xff] }
  0xd1   :  { %5893 = vst [vmem:[#allocation151_spill] sm:$0xff] %v4119_v53  ;;  %5897 = vst [vmem:[#allocation153_spill] sm:$0xff] %v4127_v52  ;;  %v4139_v45 = vmul.f32 %v5901_v54, %v5901_v54  ;;  %v5902_v53 = vld [vmem:[#allocation201_spill] sm:$0xff]  ;;  %v4147_v39 = vmul.f32 %v5903_v30, %v5903_v30  ;;  %v5904_v52 = vld [vmem:[#allocation203_spill] sm:$0xff]  ;;  %v4159_v54 = vmul.f32 %v3347_v59, %v3347_v59 }
  0xd2   :  { %5899 = vst [vmem:[#allocation154_spill] sm:$0xff] %v4131_v47  ;;  %v4143_v40 = vmul.f32 %v5902_v53, %v5902_v53  ;;  %v4151_v21 = vmul.f32 %v5904_v52, %v5904_v52  ;;  %v5906_v47 = vld [vmem:[#allocation204_spill] sm:$0xff]  ;;  %v4163_v53 = vmul.f32 %v3351_v60, %v3351_v60  ;;  %v4167_v30 = vmul.f32 %v3355_v58, %v3355_v58 }
  0xd3   :  { %v4155_v48 = vmul.f32 %v5906_v47, %v5906_v47  ;;  %5908 = vst [vmem:[#allocation157_spill] sm:$0xff] %v4159_v54  ;;  %v4171_v52 = vmul.f32 %v3359_v51, %v3359_v51  ;;  %v5916_v54 = vld [vmem:[#allocation179_spill] sm:$0xff] }
  0xd4   :  { %5905 = vst [vmem:[#allocation155_spill] sm:$0xff] %v4151_v21  ;;  %5909 = vst [vmem:[#allocation158_spill] sm:$0xff] %v4163_v53  ;;  %v5912_v21 = vld [vmem:[#allocation177_spill] sm:$0xff]  ;;  %v4183_v60 = vmul.f32 %v5916_v54, %v5916_v54  ;;  %v5918_v53 = vld [vmem:[#allocation180_spill] sm:$0xff] }
  0xd5   :  { %5907 = vst [vmem:[#allocation156_spill] sm:$0xff] %v4155_v48  ;;  %5910 = vst [vmem:[#allocation159_spill] sm:$0xff] %v4167_v30  ;;  %v4175_v47 = vmul.f32 %v5912_v21, %v5912_v21  ;;  %v5914_v48 = vld [vmem:[#allocation178_spill] sm:$0xff]  ;;  %v4187_v58 = vmul.f32 %v5918_v53, %v5918_v53  ;;  %v5920_v30 = vld [vmem:[#allocation181_spill] sm:$0xff] }
  0xd6   :  { %5911 = vst [vmem:[#allocation160_spill] sm:$0xff] %v4171_v52  ;;  %v4179_v59 = vmul.f32 %v5914_v48, %v5914_v48  ;;  %5917 = vst [vmem:[#allocation163_spill] sm:$0xff] %v4183_v60  ;;  %v4191_v51 = vmul.f32 %v5920_v30, %v5920_v30  ;;  %v5922_v52 = vld [vmem:[#allocation182_spill] sm:$0xff]  ;;  %v5928_v60 = vld [vmem:[#allocation185_spill] sm:$0xff] }
  0xd7   :  { %5913 = vst [vmem:[#allocation161_spill] sm:$0xff] %v4175_v47  ;;  %5919 = vst [vmem:[#allocation164_spill] sm:$0xff] %v4187_v58  ;;  %v4195_v21 = vmul.f32 %v5922_v52, %v5922_v52  ;;  %v5924_v47 = vld [vmem:[#allocation183_spill] sm:$0xff]  ;;  %v4207_v53 = vmul.f32 %v5928_v60, %v5928_v60  ;;  %v5930_v58 = vld [vmem:[#allocation186_spill] sm:$0xff] }
  0xd8   :  { %5915 = vst [vmem:[#allocation162_spill] sm:$0xff] %v4179_v59  ;;  %5921 = vst [vmem:[#allocation165_spill] sm:$0xff] %v4191_v51  ;;  %v4199_v48 = vmul.f32 %v5924_v47, %v5924_v47  ;;  %v5926_v59 = vld [vmem:[#allocation184_spill] sm:$0xff]  ;;  %v4211_v30 = vmul.f32 %v5930_v58, %v5930_v58  ;;  %v5932_v51 = vld [vmem:[#allocation187_spill] sm:$0xff] }
  0xd9   :  { %5923 = vst [vmem:[#allocation166_spill] sm:$0xff] %v4195_v21  ;;  %v4203_v54 = vmul.f32 %v5926_v59, %v5926_v59  ;;  %5929 = vst [vmem:[#allocation201_spill] sm:$0xff] %v4207_v53  ;;  %v4215_v52 = vmul.f32 %v5932_v51, %v5932_v51  ;;  %v5934_v21 = vld [vmem:[#allocation188_spill] sm:$0xff]  ;;  %v5940_v53 = vld [vmem:[#allocation191_spill] sm:$0xff] }
  0xda   :  { %5925 = vst [vmem:[#allocation167_spill] sm:$0xff] %v4199_v48  ;;  %5931 = vst [vmem:[#allocation202_spill] sm:$0xff] %v4211_v30  ;;  %v4219_v47 = vmul.f32 %v5934_v21, %v5934_v21  ;;  %v5936_v48 = vld [vmem:[#allocation189_spill] sm:$0xff]  ;;  %v4231_v58 = vmul.f32 %v5940_v53, %v5940_v53  ;;  %v5942_v30 = vld [vmem:[#allocation192_spill] sm:$0xff] }
  0xdb   :  { %5927 = vst [vmem:[#allocation168_spill] sm:$0xff] %v4203_v54  ;;  %5933 = vst [vmem:[#allocation203_spill] sm:$0xff] %v4215_v52  ;;  %v4223_v59 = vmul.f32 %v5936_v48, %v5936_v48  ;;  %v5938_v54 = vld [vmem:[#allocation190_spill] sm:$0xff]  ;;  %v4235_v51 = vmul.f32 %v5942_v30, %v5942_v30  ;;  %v5944_v52 = vld [vmem:[#allocation193_spill] sm:$0xff] }
  0xdc   :  { %5935 = vst [vmem:[#allocation204_spill] sm:$0xff] %v4219_v47  ;;  %v4227_v60 = vmul.f32 %v5938_v54, %v5938_v54  ;;  %5941 = vst [vmem:[#allocation179_spill] sm:$0xff] %v4231_v58  ;;  %v4239_v21 = vmul.f32 %v5944_v52, %v5944_v52  ;;  %v5946_v47 = vld [vmem:[#allocation194_spill] sm:$0xff]  ;;  %v5951_v58 = vld [vmem:[#allocation197_spill] sm:$0xff] }
  0xdd   :  { %5937 = vst [vmem:[#allocation177_spill] sm:$0xff] %v4223_v59  ;;  %5943 = vst [vmem:[#allocation180_spill] sm:$0xff] %v4235_v51  ;;  %v4243_v48 = vmul.f32 %v5946_v47, %v5946_v47  ;;  %v5948_v59 = vld [vmem:[#allocation195_spill] sm:$0xff]  ;;  %v4255_v30 = vmul.f32 %v5951_v58, %v5951_v58  ;;  %v5952_v51 = vld [vmem:[#allocation198_spill] sm:$0xff]  ;;  %v4275_v58 = vmul.f32 %v3365_v23, %v3365_v23 }
  0xde   :  { %5939 = vst [vmem:[#allocation178_spill] sm:$0xff] %v4227_v60  ;;  %5945 = vst [vmem:[#allocation181_spill] sm:$0xff] %v4239_v21  ;;  %v4247_v54 = vmul.f32 %v5948_v59, %v5948_v59  ;;  %v5949_v60 = vld [vmem:[#allocation196_spill] sm:$0xff]  ;;  %v4259_v52 = vmul.f32 %v5952_v51, %v5952_v51  ;;  %v5953_v21 = vld [vmem:[#allocation199_spill] sm:$0xff]  ;;  %v4279_v51 = vmul.f32 %v3368_v14, %v3368_v14 }
  0xdf   :  { %5947 = vst [vmem:[#allocation182_spill] sm:$0xff] %v4243_v48  ;;  %v4251_v53 = vmul.f32 %v5949_v60, %v5949_v60  ;;  %v4263_v47 = vmul.f32 %v5953_v21, %v5953_v21  ;;  %v5954_v48 = vld [vmem:[#allocation200_spill] sm:$0xff]  ;;  %v4271_v60 = vmul.f32 %v3362_v44, %v3362_v44  ;;  %5957 = vst [vmem:[#allocation186_spill] sm:$0xff] %v4275_v58 }
  0xe0   :  { %v4267_v59 = vmul.f32 %v5954_v48, %v5954_v48  ;;  %v4283_v21 = vmul.f32 %v3371_v15, %v3371_v15  ;;  %v5963_v58 = vld [vmem:[#allocation208_spill] sm:$0xff]  ;;  %v4303_v15 = vmul.f32 %v3274_v8, %v3274_v8  ;;  %v4323_v8 = vmul.f32 %v3289_v1, %v3289_v1 }
  0xe1   :  { %5950 = vst [vmem:[#allocation183_spill] sm:$0xff] %v4251_v53  ;;  %5956 = vst [vmem:[#allocation185_spill] sm:$0xff] %v4271_v60  ;;  %v5959_v53 = vld [vmem:[#allocation205_spill] sm:$0xff]  ;;  %v5961_v60 = vld [vmem:[#allocation207_spill] sm:$0xff]  ;;  %v4299_v14 = vmul.f32 %v5963_v58, %v5963_v58  ;;  %v4319_v58 = vmul.f32 %v3286_v7, %v3286_v7  ;;  %v4339_v7 = vmul.f32 %v3301_v24, %v3301_v24 }
  0xe2   :  { %5955 = vst [vmem:[#allocation184_spill] sm:$0xff] %v4267_v59  ;;  %5958 = vst [vmem:[#allocation187_spill] sm:$0xff] %v4283_v21  ;;  %v4287_v48 = vmul.f32 %v5959_v53, %v5959_v53  ;;  %v5960_v59 = vld [vmem:[#allocation206_spill] sm:$0xff]  ;;  %v4295_v23 = vmul.f32 %v5961_v60, %v5961_v60  ;;  %v4307_v53 = vmul.f32 %v3277_v62, %v3277_v62  ;;  %v6002_v21 = vld [vmem:[#allocation35_spill] sm:$0xff] }
  0xe3   :  { %v4291_v44 = vmul.f32 %v5960_v59, %v5960_v59  ;;  %5964 = vst [vmem:[#allocation189_spill] sm:$0xff] %v4299_v14  ;;  %v4311_v59 = vmul.f32 %v3280_v63, %v3280_v63  ;;  %v4315_v60 = vmul.f32 %v3283_v22, %v3283_v22  ;;  %v4327_v62 = vmul.f32 %v3292_v10, %v3292_v10 }
  0xe4   :  { %5962 = vst [vmem:[#allocation188_spill] sm:$0xff] %v4295_v23  ;;  %v4331_v63 = vmul.f32 %v3295_v18, %v3295_v18  ;;  %v4335_v22 = vmul.f32 %v3298_v19, %v3298_v19  ;;  %v4343_v1 = vmul.f32 %v3304_v25, %v3304_v25  ;;  %v4347_v10 = vmul.f32 %v3307_v26, %v3307_v26  ;;  %v6013_v23 = vld [vmem:[#allocation23_spill] sm:$0xff] }
  0xe5   :  { %5965 = vst [vmem:[#allocation190_spill] sm:$0xff] %v4311_v59  ;;  %5966 = vst [vmem:[#allocation191_spill] sm:$0xff] %v4315_v60  ;;  %v4351_v18 = vmul.f32 %v3310_v31, %v3310_v31  ;;  %v4355_v19 = vmul.f32 %v3313_v32, %v3313_v32  ;;  %v4359_v24 = vmul.f32 %v3316_v33, %v3316_v33  ;;  %v6000_v60 = vld [vmem:[#allocation31_spill] sm:$0xff] }
  0xe6   :  { %5967 = vst [vmem:[#allocation192_spill] sm:$0xff] %v4327_v62  ;;  %5968 = vst [vmem:[#allocation193_spill] sm:$0xff] %v4331_v63  ;;  %v4363_v25 = vmul.f32 %v3319_v38, %v3319_v38  ;;  %v587_v26 = vadd.f32 %v3379_v17, %v3375_v16  ;;  %v605_v31 = vadd.f32 %v3411_v29, %v3407_v28  ;;  %v6010_v62 = vld [vmem:[#allocation33_spill] sm:$0xff] }
  0xe7   :  { %5969 = vst [vmem:[#allocation194_spill] sm:$0xff] %v4343_v1  ;;  %5970 = vst [vmem:[#allocation195_spill] sm:$0xff] %v4347_v10  ;;  %v596_v10 = vadd.f32 %v3395_v13, %v3391_v12  ;;  %v614_v32 = vadd.f32 %v3427_v41, %v3423_v36  ;;  %v623_v33 = vadd.f32 %v3443_v50, %v3439_v49 }
  0xe8   :  { %5971 = vst [vmem:[#allocation196_spill] sm:$0xff] %v4359_v24  ;;  %5972 = vst [vmem:[#allocation197_spill] sm:$0xff] %v4363_v25  ;;  %v632_v63 = vadd.f32 %v3459_v37, %v3455_v57  ;;  %v641_v38 = vadd.f32 %v3475_v0, %v3471_v2  ;;  %v650_v16 = vadd.f32 %v3491_v61, %v3487_v6  ;;  %v5973_v37 = vld [vmem:[#allocation10_spill] sm:$0xff]  ;;  %v5974_v2 = vld [vmem:[#allocation11_spill] sm:$0xff] }
  0xe9   :  { %v588_v17 = vadd.f32 %v587_v26, %v3383_v9  ;;  %v597_v12 = vadd.f32 %v596_v10, %v3399_v20  ;;  %v606_v13 = vadd.f32 %v605_v31, %v3415_v34  ;;  %v615_v28 = vadd.f32 %v614_v32, %v3431_v42  ;;  %v5975_v0 = vld [vmem:[#allocation12_spill] sm:$0xff]  ;;  %v5999_v25 = vld [vmem:[#allocation25_spill] sm:$0xff]  ;;  %v6007_v24 = vld [vmem:[#allocation6_spill] sm:$0xff] }
  0xea   :  { %v624_v29 = vadd.f32 %v623_v33, %v3447_v55  ;;  %v633_v36 = vadd.f32 %v632_v63, %v3463_v5  ;;  %v642_v41 = vadd.f32 %v641_v38, %v3479_v4  ;;  %v651_v49 = vadd.f32 %v650_v16, %v3495_v3 }
  0xeb   :  { %v589_v50 = vadd.f32 %v588_v17, %v3387_v11  ;;  %v598_v57 = vadd.f32 %v597_v12, %v3403_v27  ;;  %v607_v9 = vadd.f32 %v606_v13, %v3419_v35  ;;  %v616_v20 = vadd.f32 %v615_v28, %v3435_v43 }
  0xec   :  { %v625_v34 = vadd.f32 %v624_v29, %v3451_v56  ;;  %v634_v42 = vadd.f32 %v633_v36, %v5973_v37  ;;  %v643_v55 = vadd.f32 %v642_v41, %v5974_v2  ;;  %v652_v5 = vadd.f32 %v651_v49, %v5975_v0  ;;  %v5977_v0 = vld [vmem:[#allocation210_spill] sm:$0xff] }
  0xed   :  { %v590_v6 = vrot.slane %v589_v50, 4  ;;  %v599_v4 = vrot.slane %v598_v57, 4  ;;  %v608_v61 = vrot.slane %v607_v9, 4  ;;  %v617_v3 = vrot.slane %v616_v20, 4 }
  0xee   :  { %v626_v63 = vrot.slane %v625_v34, 4  ;;  %v635_v11 = vrot.slane %v634_v42, 4  ;;  %v644_v10 = vrot.slane %v643_v55, 4  ;;  %v653_v27 = vrot.slane %v652_v5, 4 }
  0xef   :  { %v591_v26 = vadd.f32 %v590_v6, %v589_v50  ;;  %v600_v35 = vadd.f32 %v599_v4, %v598_v57  ;;  %v609_v31 = vadd.f32 %v608_v61, %v607_v9  ;;  %v618_v43 = vadd.f32 %v617_v3, %v616_v20  ;;  %v5978_v6 = vld [vmem:[#allocation211_spill] sm:$0xff]  ;;  %v5980_v61 = vld [vmem:[#allocation212_spill] sm:$0xff] }
  0xf0   :  { %v627_v32 = vadd.f32 %v626_v63, %v625_v34  ;;  %v636_v56 = vadd.f32 %v635_v11, %v634_v42  ;;  %v645_v33 = vadd.f32 %v644_v10, %v643_v55  ;;  %v654_v38 = vadd.f32 %v653_v27, %v652_v5  ;;  %v5976_v42 = vld [vmem:[#allocation209_spill] sm:$0xff]  ;;  %v5983_v10 = vld [vmem:[#allocation214_spill] sm:$0xff] }
  0xf1   :  { %v592_v16 = vrot.slane %v591_v26, 2  ;;  %v601_v17 = vrot.slane %v600_v35, 2  ;;  %v610_v12 = vrot.slane %v609_v31, 2  ;;  %v619_v13 = vrot.slane %v618_v43, 2  ;;  %v5982_v63 = vld [vmem:[#allocation213_spill] sm:$0xff] }
  0xf2   :  { %v628_v28 = vrot.slane %v627_v32, 2  ;;  %v637_v29 = vrot.slane %v636_v56, 2  ;;  %v646_v36 = vrot.slane %v645_v33, 2  ;;  %v655_v41 = vrot.slane %v654_v38, 2 }
  0xf3   :  { %v593_v49 = vadd.f32 %v592_v16, %v591_v26  ;;  %v602_v37 = vadd.f32 %v601_v17, %v600_v35  ;;  %v4397_v2 = vadd.f32 %v610_v12, %v609_v31  ;;  %v4399_v50 = vadd.f32 %v619_v13, %v618_v43  ;;  %v5984_v26 = vld [vmem:[#allocation215_spill] sm:$0xff]  ;;  %v5986_v31 = vld [vmem:[#allocation216_spill] sm:$0xff]  ;;  %v5997_v16 = vld [vmem:[#allocation9_spill] sm:$0xff] }
  0xf4   :  { %v4401_v57 = vadd.f32 %v628_v28, %v627_v32  ;;  %v4403_v9 = vadd.f32 %v637_v29, %v636_v56  ;;  %v4405_v20 = vadd.f32 %v646_v36, %v645_v33  ;;  %v4407_v34 = vadd.f32 %v655_v41, %v654_v38  ;;  %v5988_v28 = vld [vmem:[#allocation14_spill] sm:$0xff]  ;;  %v5989_v29 = vld [vmem:[#allocation15_spill] sm:$0xff]  ;;  %v5998_v17 = vld [vmem:[#allocation21_spill] sm:$0xff] }
  0xf5   :  { %v4411_v55 = vmul.f32 %v5976_v42, %v5976_v42  ;;  %v4415_v5 = vmul.f32 %v5977_v0, %v5977_v0  ;;  %v4419_v4 = vmul.f32 %v5978_v6, %v5978_v6  ;;  %v4423_v3 = vmul.f32 %v5980_v61, %v5980_v61  ;;  %v5990_v41 = vld [vmem:[#allocation19_spill] sm:$0xff]  ;;  %v5991_v42 = vld [vmem:[#allocation20_spill] sm:$0xff]  ;;  %v5993_v61 = vld [vmem:[#allocation26_spill] sm:$0xff] }
  0xf6   :  { %v4427_v11 = vmul.f32 %v5982_v63, %v5982_v63  ;;  %v4431_v27 = vmul.f32 %v5983_v10, %v5983_v10  ;;  %v4435_v35 = vmul.f32 %v5984_v26, %v5984_v26  ;;  %v4439_v43 = vmul.f32 %v5986_v31, %v5986_v31  ;;  %v5992_v6 = vld [vmem:[#allocation24_spill] sm:$0xff]  ;;  %v5994_v10 = vld [vmem:[#allocation2_spill] sm:$0xff]  ;;  %v5995_v26 = vld [vmem:[#allocation5_spill] sm:$0xff] }
  0xf7   :  { %5979 = vst [vmem:[#allocation198_spill] sm:$0xff] %v4419_v4  ;;  %5981 = vst [vmem:[#allocation199_spill] sm:$0xff] %v4423_v3  ;;  %v594_v32 = vrot.slane %v593_v49, 1  ;;  %v603_v56 = vrot.slane %v602_v37, 1  ;;  %v612_v33 = vrot.slane %v4397_v2, 1  ;;  %v621_v38 = vrot.slane %v4399_v50, 1 }
  0xf8   :  { %5985 = vst [vmem:[#allocation200_spill] sm:$0xff] %v4435_v35  ;;  %5987 = vst [vmem:[#allocation205_spill] sm:$0xff] %v4439_v43  ;;  %v659_v36 = vadd.f32 %v5989_v29, %v5988_v28  ;;  %v668_v0 = vadd.f32 %v5991_v42, %v5990_v41  ;;  %v677_v63 = vadd.f32 %v5993_v61, %v5992_v6  ;;  %v5996_v43 = vld [vmem:[#allocation8_spill] sm:$0xff]  ;;  %v6005_v42 = vld [vmem:[#allocation22_spill] sm:$0xff] }
  0xf9   :  { %v686_v31 = vadd.f32 %v5995_v26, %v5994_v10  ;;  %v695_v3 = vadd.f32 %v5997_v16, %v5996_v43  ;;  %v704_v12 = vadd.f32 %v5999_v25, %v5998_v17  ;;  %v6001_v13 = vld [vmem:[#allocation32_spill] sm:$0xff]  ;;  %v6006_v6 = vld [vmem:[#allocation27_spill] sm:$0xff]  ;;  %v6008_v26 = vld [vmem:[#allocation13_spill] sm:$0xff] }
  0xfa   :  { %v713_v14 = vadd.f32 %v6001_v13, %v6000_v60  ;;  %v6003_v28 = vld [vmem:[#allocation36_spill] sm:$0xff]  ;;  %v669_v4 = vadd.f32 %v668_v0, %v6005_v42  ;;  %v678_v61 = vadd.f32 %v677_v63, %v6006_v6  ;;  %v6011_v17 = vld [vmem:[#allocation37_spill] sm:$0xff]  ;;  %v6012_v60 = vld [vmem:[#allocation18_spill] sm:$0xff] }
  0xfb   :  { %v722_v29 = vadd.f32 %v6003_v28, %v6002_v21  ;;  %v6004_v35 = vld [vmem:[#allocation16_spill] sm:$0xff]  ;;  %v687_v10 = vadd.f32 %v686_v31, %v6007_v24  ;;  %v696_v1 = vadd.f32 %v695_v3, %v6008_v26  ;;  %v6014_v28 = vld [vmem:[#allocation29_spill] sm:$0xff]  ;;  %v6017_v6 = vld [vmem:[#allocation30_spill] sm:$0xff] }
  0xfc   :  { %v660_v41 = vadd.f32 %v659_v36, %v6004_v35  ;;  %v6009_v43 = vld [vmem:[#allocation28_spill] sm:$0xff]  ;;  %v714_v25 = vadd.f32 %v713_v14, %v6010_v62  ;;  %v670_v21 = vadd.f32 %v669_v4, %v6013_v23  ;;  %v679_v35 = vadd.f32 %v678_v61, %v6014_v28  ;;  %v6015_v36 = vld [vmem:[#allocation7_spill] sm:$0xff]  ;;  %v6016_v42 = vld [vmem:[#allocation17_spill] sm:$0xff] }
  0xfd   :  { %v705_v16 = vadd.f32 %v704_v12, %v6009_v43  ;;  %v723_v59 = vadd.f32 %v722_v29, %v6011_v17  ;;  %v688_v0 = vadd.f32 %v687_v10, %v6015_v36  ;;  %v697_v63 = vadd.f32 %v696_v1, %v6016_v42  ;;  %v6018_v31 = vld [vmem:[#allocation34_spill] sm:$0xff] }
  0xfe   :  { %v661_v13 = vadd.f32 %v660_v41, %v6012_v60  ;;  %v715_v3 = vadd.f32 %v714_v25, %v6018_v31  ;;  %v6019_v26 = vld [vmem:[#allocation38_spill] sm:$0xff]  ;;  %v671_v62 = vrot.slane %v670_v21, 4  ;;  %v680_v29 = vrot.slane %v679_v35, 4 }
  0xff   :  { %v706_v24 = vadd.f32 %v705_v16, %v6017_v6  ;;  %v4479_v12 = vadd.f32 %v723_v59, %v6019_v26  ;;  %v689_v43 = vrot.slane %v688_v0, 4  ;;  %v4481_v41 = vadd.f32 %v594_v32, %v593_v49 }
 0x100   :  { %v662_v14 = vrot.slane %v661_v13, 4  ;;  %v698_v23 = vrot.slane %v697_v63, 4  ;;  %v716_v61 = vrot.slane %v715_v3, 4  ;;  %v672_v10 = vadd.f32 %v671_v62, %v670_v21 }
 0x101   :  { %6020 = vst [vmem:[#allocation206_spill] sm:$0xff] %v4479_v12  ;;  %6021 = vst [vmem:[#allocation207_spill] sm:$0xff] %v4481_v41  ;;  %v707_v4 = vrot.slane %v706_v24, 4  ;;  %v681_v60 = vadd.f32 %v680_v29, %v679_v35  ;;  %v690_v1 = vadd.f32 %v689_v43, %v688_v0  ;;  %v4483_v28 = vadd.f32 %v603_v56, %v602_v37 }
 0x102   :  { %v663_v17 = vadd.f32 %v662_v14, %v661_v13  ;;  %v699_v16 = vadd.f32 %v698_v23, %v697_v63  ;;  %v717_v36 = vadd.f32 %v716_v61, %v715_v3  ;;  %v673_v42 = vrot.slane %v672_v10, 2 }
 0x103   :  { %v708_v25 = vadd.f32 %v707_v4, %v706_v24  ;;  %v682_v6 = vrot.slane %v681_v60, 2  ;;  %v691_v31 = vrot.slane %v690_v1, 2  ;;  %v4486_v26 = vadd.f32 %v612_v33, %v4397_v2 }
 0x104   :  { %v664_v59 = vrot.slane %v663_v17, 2  ;;  %v700_v49 = vrot.slane %v699_v16, 2  ;;  %v718_v12 = vrot.slane %v717_v36, 2  ;;  %v674_v13 = vadd.f32 %v673_v42, %v672_v10  ;;  %v6040_v42 = vld [vmem:[#allocation40_spill] sm:$0xff] }
 0x105   :  { %v709_v32 = vrot.slane %v708_v25, 2  ;;  %v683_v21 = vadd.f32 %v682_v6, %v681_v60  ;;  %v692_v35 = vadd.f32 %v691_v31, %v690_v1  ;;  %v4489_v37 = vadd.f32 %v621_v38, %v4399_v50  ;;  %v6035_v1 = vld [vmem:[#allocation41_spill] sm:$0xff]  ;;  %v6041_v31 = vld [vmem:[#allocation3_spill] sm:$0xff] }
 0x106   :  { %v665_v41 = vadd.f32 %v664_v59, %v663_v17  ;;  %v701_v56 = vadd.f32 %v700_v49, %v699_v16  ;;  %v4493_v63 = vadd.f32 %v718_v12, %v717_v36  ;;  %v675_v3 = vrot.slane %v674_v13, 1  ;;  %v6036_v16 = vld [vmem:[#allocation42_spill] sm:$0xff]  ;;  %v6037_v36 = vld [vmem:[#allocation47_spill] sm:$0xff] }
 0x107   :  { %6022 = vst [vmem:[#allocation208_spill] sm:$0xff] %v4489_v37  ;;  %v4491_v0 = vadd.f32 %v709_v32, %v708_v25  ;;  %v684_v14 = vrot.slane %v683_v21, 1  ;;  %v693_v2 = vrot.slane %v692_v35, 1  ;;  %v6023_v33 = vrot.slane %v4401_v57, 1  ;;  %v6042_v49 = vld [vmem:[#allocation51_spill] sm:$0xff] }
 0x108   :  { %v666_v24 = vrot.slane %v665_v41, 1  ;;  %v6025_v29 = vrot.slane %v4403_v9, 1  ;;  %v6027_v50 = vrot.slane %v4405_v20, 1  ;;  %v702_v12 = vrot.slane %v701_v56, 1 }
 0x109   :  { %v4498_v62 = vadd.f32 %v6023_v33, %v4401_v57  ;;  %v6029_v23 = vrot.slane %v4407_v34, 1  ;;  %v4519_v10 = vadd.f32 %v675_v3, %v674_v13  ;;  %v4523_v60 = vadd.f32 %v693_v2, %v692_v35  ;;  %v6043_v13 = vld [vmem:[#allocation54_spill] sm:$0xff]  ;;  %v6046_v35 = vld [vmem:[#allocation59_spill] sm:$0xff]  ;;  %v6057_v57 = vld [vmem:[#allocation64_spill] sm:$0xff] }
 0x10a   :  { %v4503_v43 = vadd.f32 %v6025_v29, %v4403_v9  ;;  %v4508_v38 = vadd.f32 %v6027_v50, %v4405_v20  ;;  %v4515_v61 = vadd.f32 %v666_v24, %v665_v41  ;;  %v4521_v9 = vadd.f32 %v684_v14, %v683_v21  ;;  %v6039_v41 = vld [vmem:[#allocation39_spill] sm:$0xff]  ;;  %v6045_v3 = vld [vmem:[#allocation58_spill] sm:$0xff]  ;;  %v6049_v29 = vld [vmem:[#allocation73_spill] sm:$0xff] }
 0x10b   :  { %6024 = vst [vmem:[#allocation10_spill] sm:$0xff] %v4498_v62  ;;  %v4513_v4 = vadd.f32 %v6029_v23, %v4407_v34  ;;  %6031 = vst [vmem:[#allocation210_spill] sm:$0xff] %v4519_v10  ;;  %v4525_v20 = vadd.f32 %v702_v12, %v701_v56  ;;  %v731_v25 = vadd.f32 %v6036_v16, %v6035_v1  ;;  %v6038_v34 = vld [vmem:[#allocation48_spill] sm:$0xff]  ;;  %v6044_v24 = vld [vmem:[#allocation55_spill] sm:$0xff] }
 0x10c   :  { %6026 = vst [vmem:[#allocation11_spill] sm:$0xff] %v4503_v43  ;;  %6028 = vst [vmem:[#allocation12_spill] sm:$0xff] %v4508_v38  ;;  %v740_v59 = vadd.f32 %v6038_v34, %v6037_v36  ;;  %v749_v6 = vadd.f32 %v6040_v42, %v6039_v41  ;;  %v758_v32 = vadd.f32 %v6042_v49, %v6041_v31  ;;  %v6047_v56 = vld [vmem:[#allocation62_spill] sm:$0xff]  ;;  %v6048_v2 = vld [vmem:[#allocation63_spill] sm:$0xff] }
 0x10d   :  { %6030 = vst [vmem:[#allocation209_spill] sm:$0xff] %v4513_v4  ;;  %6032 = vst [vmem:[#allocation211_spill] sm:$0xff] %v4521_v9  ;;  %v767_v21 = vadd.f32 %v6044_v24, %v6043_v13  ;;  %v776_v14 = vadd.f32 %v6046_v35, %v6045_v3  ;;  %v785_v33 = vadd.f32 %v6048_v2, %v6047_v56  ;;  %v6050_v50 = vld [vmem:[#allocation74_spill] sm:$0xff]  ;;  %v6051_v23 = vld [vmem:[#allocation45_spill] sm:$0xff] }
 0x10e   :  { %6033 = vst [vmem:[#allocation212_spill] sm:$0xff] %v4523_v60  ;;  %6034 = vst [vmem:[#allocation213_spill] sm:$0xff] %v4525_v20  ;;  %v794_v12 = vadd.f32 %v6050_v50, %v6049_v29  ;;  %v732_v1 = vadd.f32 %v731_v25, %v6051_v23  ;;  %v6052_v16 = vld [vmem:[#allocation49_spill] sm:$0xff]  ;;  %v6053_v34 = vld [vmem:[#allocation43_spill] sm:$0xff] }
 0x10f   :  { %v741_v36 = vadd.f32 %v740_v59, %v6052_v16  ;;  %v750_v41 = vadd.f32 %v749_v6, %v6053_v34  ;;  %v6054_v42 = vld [vmem:[#allocation52_spill] sm:$0xff]  ;;  %v786_v3 = vadd.f32 %v785_v33, %v6057_v57  ;;  %v6058_v35 = vld [vmem:[#allocation75_spill] sm:$0xff]  ;;  %v6059_v56 = vld [vmem:[#allocation46_spill] sm:$0xff] }
 0x110   :  { %v759_v31 = vadd.f32 %v758_v32, %v6054_v42  ;;  %v6055_v49 = vld [vmem:[#allocation56_spill] sm:$0xff]  ;;  %v795_v4 = vadd.f32 %v794_v12, %v6058_v35  ;;  %v733_v2 = vadd.f32 %v732_v1, %v6059_v56  ;;  %v6060_v38 = vld [vmem:[#allocation50_spill] sm:$0xff]  ;;  %v6062_v23 = vld [vmem:[#allocation53_spill] sm:$0xff] }
 0x111   :  { %v768_v17 = vadd.f32 %v767_v21, %v6055_v49  ;;  %v6056_v13 = vld [vmem:[#allocation60_spill] sm:$0xff]  ;;  %v742_v29 = vadd.f32 %v741_v36, %v6060_v38  ;;  %v6063_v16 = vld [vmem:[#allocation57_spill] sm:$0xff] }
 0x112   :  { %v777_v24 = vadd.f32 %v776_v14, %v6056_v13  ;;  %v6061_v50 = vld [vmem:[#allocation44_spill] sm:$0xff]  ;;  %v760_v59 = vadd.f32 %v759_v31, %v6062_v23  ;;  %v6064_v34 = vld [vmem:[#allocation61_spill] sm:$0xff]  ;;  %v734_v13 = vrot.slane %v733_v2, 4 }
 0x113   :  { %v751_v25 = vadd.f32 %v750_v41, %v6061_v50  ;;  %v769_v6 = vadd.f32 %v768_v17, %v6063_v16  ;;  %v6065_v42 = vld [vmem:[#allocation65_spill] sm:$0xff]  ;;  %v743_v57 = vrot.slane %v742_v29, 4 }
 0x114   :  { %v778_v32 = vadd.f32 %v777_v24, %v6064_v34  ;;  %v787_v21 = vadd.f32 %v786_v3, %v6065_v42  ;;  %v6066_v49 = vld [vmem:[#allocation77_spill] sm:$0xff]  ;;  %v761_v12 = vrot.slane %v760_v59, 4  ;;  %v735_v36 = vadd.f32 %v734_v13, %v733_v2 }
 0x115   :  { %v796_v14 = vadd.f32 %v795_v4, %v6066_v49  ;;  %v752_v33 = vrot.slane %v751_v25, 4  ;;  %v770_v35 = vrot.slane %v769_v6, 4  ;;  %v744_v41 = vadd.f32 %v743_v57, %v742_v29 }
 0x116   :  { %v779_v1 = vrot.slane %v778_v32, 4  ;;  %v788_v56 = vrot.slane %v787_v21, 4  ;;  %v762_v31 = vadd.f32 %v761_v12, %v760_v59  ;;  %v736_v34 = vrot.slane %v735_v36, 2 }
 0x117   :  { %v797_v38 = vrot.slane %v796_v14, 4  ;;  %v753_v50 = vadd.f32 %v752_v33, %v751_v25  ;;  %v771_v23 = vadd.f32 %v770_v35, %v769_v6  ;;  %v745_v3 = vrot.slane %v744_v41, 2 }
 0x118   :  { %v780_v17 = vadd.f32 %v779_v1, %v778_v32  ;;  %v789_v16 = vadd.f32 %v788_v56, %v787_v21  ;;  %v763_v4 = vrot.slane %v762_v31, 2  ;;  %v737_v62 = vadd.f32 %v736_v34, %v735_v36  ;;  %v6083_v34 = vld [vmem:[#allocation4_spill] sm:$0xff]  ;;  %v6099_v56 = vld [vmem:[#allocation107_spill] sm:$0xff] }
 0x119   :  { %v798_v24 = vadd.f32 %v797_v38, %v796_v14  ;;  %v754_v42 = vrot.slane %v753_v50, 2  ;;  %v772_v49 = vrot.slane %v771_v23, 2  ;;  %v746_v9 = vadd.f32 %v745_v3, %v744_v41  ;;  %v6084_v3 = vld [vmem:[#allocation82_spill] sm:$0xff] }
 0x11a   :  { %v781_v20 = vrot.slane %v780_v17, 2  ;;  %v790_v43 = vrot.slane %v789_v16, 2  ;;  %v764_v10 = vadd.f32 %v763_v4, %v762_v31  ;;  %v738_v6 = vrot.slane %v737_v62, 1  ;;  %v6086_v4 = vld [vmem:[#allocation86_spill] sm:$0xff] }
 0x11b   :  { %v799_v60 = vrot.slane %v798_v24, 2  ;;  %v755_v37 = vadd.f32 %v754_v42, %v753_v50  ;;  %v773_v2 = vadd.f32 %v772_v49, %v771_v23  ;;  %v747_v32 = vrot.slane %v746_v9, 1  ;;  %v6078_v50 = vld [vmem:[#allocation79_spill] sm:$0xff]  ;;  %v6079_v23 = vld [vmem:[#allocation66_spill] sm:$0xff]  ;;  %v6087_v49 = vld [vmem:[#allocation89_spill] sm:$0xff] }
 0x11c   :  { %v782_v29 = vadd.f32 %v781_v20, %v780_v17  ;;  %v4559_v25 = vadd.f32 %v790_v43, %v789_v16  ;;  %v765_v14 = vrot.slane %v764_v10, 1  ;;  %v6067_v13 = vrot.slane %v4491_v0, 1  ;;  %v6082_v16 = vld [vmem:[#allocation71_spill] sm:$0xff] }
 0x11d   :  { %v4561_v59 = vadd.f32 %v799_v60, %v798_v24  ;;  %v756_v21 = vrot.slane %v755_v37, 1  ;;  %v6069_v33 = vrot.slane %v4493_v63, 1  ;;  %v774_v35 = vrot.slane %v773_v2, 1 }
 0x11e   :  { %v4566_v57 = vadd.f32 %v6067_v13, %v4491_v0  ;;  %v783_v20 = vrot.slane %v782_v29, 1  ;;  %v4573_v43 = vadd.f32 %v738_v6, %v737_v62  ;;  %v4575_v60 = vadd.f32 %v747_v32, %v746_v9  ;;  %v6080_v62 = vld [vmem:[#allocation67_spill] sm:$0xff]  ;;  %v6081_v9 = vld [vmem:[#allocation70_spill] sm:$0xff] }
 0x11f   :  { %v4571_v12 = vadd.f32 %v6069_v33, %v4493_v63  ;;  %v4579_v38 = vadd.f32 %v756_v21, %v755_v37  ;;  %v4581_v36 = vadd.f32 %v765_v14, %v764_v10  ;;  %v4583_v0 = vadd.f32 %v774_v35, %v773_v2  ;;  %v6077_v63 = vld [vmem:[#allocation78_spill] sm:$0xff]  ;;  %v6085_v37 = vld [vmem:[#allocation85_spill] sm:$0xff]  ;;  %v6093_v35 = vld [vmem:[#allocation80_spill] sm:$0xff] }
 0x120   :  { %6068 = vst [vmem:[#allocation214_spill] sm:$0xff] %v4566_v57  ;;  %6071 = vst [vmem:[#allocation216_spill] sm:$0xff] %v4573_v43  ;;  %v4585_v41 = vadd.f32 %v783_v20, %v782_v29  ;;  %v803_v31 = vadd.f32 %v6078_v50, %v6077_v63  ;;  %v812_v17 = vadd.f32 %v6080_v62, %v6079_v23  ;;  %v6088_v2 = vld [vmem:[#allocation90_spill] sm:$0xff]  ;;  %v6089_v29 = vld [vmem:[#allocation105_spill] sm:$0xff] }
 0x121   :  { %6070 = vst [vmem:[#allocation215_spill] sm:$0xff] %v4571_v12  ;;  %6072 = vst [vmem:[#allocation14_spill] sm:$0xff] %v4575_v60  ;;  %v821_v24 = vadd.f32 %v6082_v16, %v6081_v9  ;;  %v830_v42 = vadd.f32 %v6084_v3, %v6083_v34  ;;  %v839_v10 = vadd.f32 %v6086_v4, %v6085_v37  ;;  %v6090_v32 = vld [vmem:[#allocation106_spill] sm:$0xff]  ;;  %v6091_v14 = vld [vmem:[#allocation109_spill] sm:$0xff] }
 0x122   :  { %6073 = vst [vmem:[#allocation15_spill] sm:$0xff] %v4579_v38  ;;  %6074 = vst [vmem:[#allocation19_spill] sm:$0xff] %v4581_v36  ;;  %v848_v6 = vadd.f32 %v6088_v2, %v6087_v49  ;;  %v857_v21 = vadd.f32 %v6090_v32, %v6089_v29  ;;  %v6092_v13 = vld [vmem:[#allocation110_spill] sm:$0xff]  ;;  %v804_v20 = vadd.f32 %v803_v31, %v6093_v35  ;;  %v6094_v63 = vld [vmem:[#allocation68_spill] sm:$0xff] }
 0x123   :  { %6075 = vst [vmem:[#allocation20_spill] sm:$0xff] %v4583_v0  ;;  %6076 = vst [vmem:[#allocation24_spill] sm:$0xff] %v4585_v41  ;;  %v866_v33 = vadd.f32 %v6092_v13, %v6091_v14  ;;  %v813_v50 = vadd.f32 %v812_v17, %v6094_v63  ;;  %v6095_v23 = vld [vmem:[#allocation72_spill] sm:$0xff]  ;;  %v6096_v9 = vld [vmem:[#allocation83_spill] sm:$0xff] }
 0x124   :  { %v822_v62 = vadd.f32 %v821_v24, %v6095_v23  ;;  %v831_v16 = vadd.f32 %v830_v42, %v6096_v9  ;;  %v6097_v34 = vld [vmem:[#allocation87_spill] sm:$0xff]  ;;  %v858_v49 = vadd.f32 %v857_v21, %v6099_v56  ;;  %v6101_v29 = vld [vmem:[#allocation81_spill] sm:$0xff]  ;;  %v6103_v13 = vld [vmem:[#allocation76_spill] sm:$0xff] }
 0x125   :  { %v840_v3 = vadd.f32 %v839_v10, %v6097_v34  ;;  %v6098_v37 = vld [vmem:[#allocation91_spill] sm:$0xff]  ;;  %v805_v32 = vadd.f32 %v804_v20, %v6101_v29  ;;  %v6102_v12 = vld [vmem:[#allocation69_spill] sm:$0xff]  ;;  %v6104_v35 = vld [vmem:[#allocation84_spill] sm:$0xff] }
 0x126   :  { %v849_v4 = vadd.f32 %v848_v6, %v6098_v37  ;;  %v6100_v2 = vld [vmem:[#allocation111_spill] sm:$0xff]  ;;  %v814_v14 = vadd.f32 %v813_v50, %v6102_v12  ;;  %v823_v31 = vadd.f32 %v822_v62, %v6103_v13  ;;  %v832_v17 = vadd.f32 %v831_v16, %v6104_v35  ;;  %v6105_v63 = vld [vmem:[#allocation88_spill] sm:$0xff] }
 0x127   :  { %v867_v1 = vadd.f32 %v866_v33, %v6100_v2  ;;  %v841_v24 = vadd.f32 %v840_v3, %v6105_v63  ;;  %v6106_v23 = vld [vmem:[#allocation92_spill] sm:$0xff]  ;;  %v806_v37 = vrot.slane %v805_v32, 4 }
 0x128   :  { %v850_v42 = vadd.f32 %v849_v4, %v6106_v23  ;;  %v6107_v9 = vld [vmem:[#allocation108_spill] sm:$0xff]  ;;  %v815_v56 = vrot.slane %v814_v14, 4  ;;  %v824_v21 = vrot.slane %v823_v31, 4  ;;  %v833_v33 = vrot.slane %v832_v17, 4 }
 0x129   :  { %v859_v10 = vadd.f32 %v858_v49, %v6107_v9  ;;  %v6108_v34 = vld [vmem:[#allocation112_spill] sm:$0xff]  ;;  %v842_v2 = vrot.slane %v841_v24, 4  ;;  %v807_v50 = vadd.f32 %v806_v37, %v805_v32  ;;  %v6109_v37 = vrot.slane %v4559_v25, 1 }
 0x12a   :  { %v868_v6 = vadd.f32 %v867_v1, %v6108_v34  ;;  %v851_v20 = vrot.slane %v850_v42, 4  ;;  %v816_v62 = vadd.f32 %v815_v56, %v814_v14  ;;  %v825_v13 = vadd.f32 %v824_v21, %v823_v31 }
 0x12b   :  { %v860_v29 = vrot.slane %v859_v10, 4  ;;  %v834_v16 = vadd.f32 %v833_v33, %v832_v17  ;;  %v843_v35 = vadd.f32 %v842_v2, %v841_v24  ;;  %v808_v23 = vrot.slane %v807_v50, 2 }
 0x12c   :  { %v869_v12 = vrot.slane %v868_v6, 4  ;;  %v852_v3 = vadd.f32 %v851_v20, %v850_v42  ;;  %v817_v49 = vrot.slane %v816_v62, 2  ;;  %v826_v9 = vrot.slane %v825_v13, 2 }
 0x12d   :  { %v861_v63 = vadd.f32 %v860_v29, %v859_v10  ;;  %v835_v1 = vrot.slane %v834_v16, 2  ;;  %v844_v34 = vrot.slane %v843_v35, 2  ;;  %v809_v36 = vadd.f32 %v808_v23, %v807_v50  ;;  %v6125_v23 = vld [vmem:[#allocation113_spill] sm:$0xff]  ;;  %v6141_v29 = vld [vmem:[#allocation143_spill] sm:$0xff] }
 0x12e   :  { %v870_v4 = vadd.f32 %v869_v12, %v868_v6  ;;  %v853_v41 = vrot.slane %v852_v3, 2  ;;  %v818_v38 = vadd.f32 %v817_v49, %v816_v62  ;;  %v827_v60 = vadd.f32 %v826_v9, %v825_v13  ;;  %v6120_v13 = vld [vmem:[#allocation94_spill] sm:$0xff] }
 0x12f   :  { %v862_v57 = vrot.slane %v861_v63, 2  ;;  %v836_v43 = vadd.f32 %v835_v1, %v834_v16  ;;  %v845_v32 = vadd.f32 %v844_v34, %v843_v35  ;;  %v810_v24 = vrot.slane %v809_v36, 1  ;;  %v6121_v35 = vld [vmem:[#allocation97_spill] sm:$0xff]  ;;  %v6126_v49 = vld [vmem:[#allocation114_spill] sm:$0xff] }
 0x130   :  { %v871_v0 = vrot.slane %v870_v4, 2  ;;  %v854_v14 = vadd.f32 %v853_v41, %v852_v3  ;;  %v819_v42 = vrot.slane %v818_v38, 1  ;;  %v828_v10 = vrot.slane %v827_v60, 1  ;;  %v6128_v1 = vld [vmem:[#allocation118_spill] sm:$0xff]  ;;  %v6129_v34 = vld [vmem:[#allocation137_spill] sm:$0xff] }
 0x131   :  { %v4619_v31 = vadd.f32 %v862_v57, %v861_v63  ;;  %v837_v6 = vrot.slane %v836_v43, 1  ;;  %v4626_v56 = vadd.f32 %v6109_v37, %v4559_v25  ;;  %v6111_v21 = vrot.slane %v4561_v59, 1  ;;  %v6124_v63 = vld [vmem:[#allocation102_spill] sm:$0xff] }
 0x132   :  { %v4621_v17 = vadd.f32 %v871_v0, %v870_v4  ;;  %v846_v2 = vrot.slane %v845_v32, 1  ;;  %v855_v41 = vrot.slane %v854_v14, 1  ;;  %v4633_v57 = vadd.f32 %v810_v24, %v809_v36  ;;  %v6122_v36 = vld [vmem:[#allocation98_spill] sm:$0xff] }
 0x133   :  { %6110 = vst [vmem:[#allocation26_spill] sm:$0xff] %v4626_v56  ;;  %v4631_v33 = vadd.f32 %v6111_v21, %v4561_v59  ;;  %v4635_v0 = vadd.f32 %v819_v42, %v818_v38  ;;  %v4639_v12 = vadd.f32 %v828_v10, %v827_v60  ;;  %v4641_v50 = vadd.f32 %v837_v6, %v836_v43  ;;  %v6119_v59 = vld [vmem:[#allocation93_spill] sm:$0xff]  ;;  %v6132_v42 = vld [vmem:[#allocation142_spill] sm:$0xff] }
 0x134   :  { %6113 = vst [vmem:[#allocation5_spill] sm:$0xff] %v4633_v57  ;;  %v4643_v25 = vadd.f32 %v846_v2, %v845_v32  ;;  %v4645_v62 = vadd.f32 %v855_v41, %v854_v14  ;;  %v875_v16 = vadd.f32 %v6120_v13, %v6119_v59  ;;  %v884_v3 = vadd.f32 %v6122_v36, %v6121_v35  ;;  %v6123_v38 = vld [vmem:[#allocation101_spill] sm:$0xff]  ;;  %v6130_v32 = vld [vmem:[#allocation138_spill] sm:$0xff]  ;;  %v6135_v2 = vld [vmem:[#allocation95_spill] sm:$0xff] }
 0x135   :  { %6112 = vst [vmem:[#allocation2_spill] sm:$0xff] %v4631_v33  ;;  %6114 = vst [vmem:[#allocation8_spill] sm:$0xff] %v4635_v0  ;;  %v893_v4 = vadd.f32 %v6124_v63, %v6123_v38  ;;  %v902_v9 = vadd.f32 %v6126_v49, %v6125_v23  ;;  %v6127_v60 = vld [vmem:[#allocation117_spill] sm:$0xff]  ;;  %v920_v24 = vadd.f32 %v6130_v32, %v6129_v34  ;;  %v6134_v37 = vld [vmem:[#allocation122_spill] sm:$0xff] }
 0x136   :  { %6115 = vst [vmem:[#allocation9_spill] sm:$0xff] %v4639_v12  ;;  %6116 = vst [vmem:[#allocation21_spill] sm:$0xff] %v4641_v50  ;;  %v911_v43 = vadd.f32 %v6128_v1, %v6127_v60  ;;  %v6131_v14 = vld [vmem:[#allocation141_spill] sm:$0xff]  ;;  %v876_v41 = vadd.f32 %v875_v16, %v6135_v2  ;;  %v6136_v59 = vld [vmem:[#allocation99_spill] sm:$0xff] }
 0x137   :  { %6117 = vst [vmem:[#allocation25_spill] sm:$0xff] %v4643_v25  ;;  %6118 = vst [vmem:[#allocation31_spill] sm:$0xff] %v4645_v62  ;;  %v929_v10 = vadd.f32 %v6132_v42, %v6131_v14  ;;  %v6133_v6 = vld [vmem:[#allocation121_spill] sm:$0xff]  ;;  %v885_v13 = vadd.f32 %v884_v3, %v6136_v59  ;;  %v6137_v35 = vld [vmem:[#allocation103_spill] sm:$0xff] }
 0x138   :  { %v938_v21 = vadd.f32 %v6134_v37, %v6133_v6  ;;  %v894_v36 = vadd.f32 %v893_v4, %v6137_v35  ;;  %v6138_v38 = vld [vmem:[#allocation115_spill] sm:$0xff]  ;;  %v6143_v14 = vld [vmem:[#allocation96_spill] sm:$0xff] }
 0x139   :  { %v903_v63 = vadd.f32 %v902_v9, %v6138_v38  ;;  %v6139_v23 = vld [vmem:[#allocation119_spill] sm:$0xff]  ;;  %v930_v34 = vadd.f32 %v929_v10, %v6141_v29  ;;  %v877_v42 = vadd.f32 %v876_v41, %v6143_v14  ;;  %v6144_v25 = vld [vmem:[#allocation100_spill] sm:$0xff] }
 0x13a   :  { %v912_v49 = vadd.f32 %v911_v43, %v6139_v23  ;;  %v6140_v60 = vld [vmem:[#allocation139_spill] sm:$0xff]  ;;  %v886_v6 = vadd.f32 %v885_v13, %v6144_v25  ;;  %v6145_v37 = vld [vmem:[#allocation104_spill] sm:$0xff] }
 0x13b   :  { %v921_v1 = vadd.f32 %v920_v24, %v6140_v60  ;;  %v6142_v32 = vld [vmem:[#allocation123_spill] sm:$0xff]  ;;  %v895_v16 = vadd.f32 %v894_v36, %v6145_v37  ;;  %v6146_v2 = vld [vmem:[#allocation116_spill] sm:$0xff]  ;;  %v878_v60 = vrot.slane %v877_v42, 4 }
 0x13c   :  { %v939_v20 = vadd.f32 %v938_v21, %v6142_v32  ;;  %v904_v3 = vadd.f32 %v903_v63, %v6146_v2  ;;  %v6147_v59 = vld [vmem:[#allocation120_spill] sm:$0xff]  ;;  %v887_v29 = vrot.slane %v886_v6, 4 }
 0x13d   :  { %v913_v4 = vadd.f32 %v912_v49, %v6147_v59  ;;  %v6148_v35 = vld [vmem:[#allocation140_spill] sm:$0xff]  ;;  %v896_v10 = vrot.slane %v895_v16, 4  ;;  %v879_v13 = vadd.f32 %v878_v60, %v877_v42  ;;  %v6151_v60 = vrot.slane %v4619_v31, 1 }
 0x13e   :  { %v922_v9 = vadd.f32 %v921_v1, %v6148_v35  ;;  %v6149_v38 = vld [vmem:[#allocation144_spill] sm:$0xff]  ;;  %v905_v21 = vrot.slane %v904_v3, 4  ;;  %v888_v36 = vadd.f32 %v887_v29, %v886_v6 }
 0x13f   :  { %v931_v43 = vadd.f32 %v930_v34, %v6149_v38  ;;  %v6150_v23 = vld [vmem:[#allocation124_spill] sm:$0xff]  ;;  %v914_v32 = vrot.slane %v913_v4, 4  ;;  %v897_v37 = vadd.f32 %v896_v10, %v895_v16  ;;  %v880_v35 = vrot.slane %v879_v13, 2 }
 0x140   :  { %v940_v24 = vadd.f32 %v939_v20, %v6150_v23  ;;  %v923_v41 = vrot.slane %v922_v9, 4  ;;  %v906_v63 = vadd.f32 %v905_v21, %v904_v3  ;;  %v889_v34 = vrot.slane %v888_v36, 2 }
 0x141   :  { %v932_v14 = vrot.slane %v931_v43, 4  ;;  %v915_v2 = vadd.f32 %v914_v32, %v913_v4  ;;  %v898_v38 = vrot.slane %v897_v37, 2  ;;  %v881_v0 = vadd.f32 %v880_v35, %v879_v13  ;;  %v6165_v35 = vld [vmem:[#allocation145_spill] sm:$0xff] }
 0x142   :  { %v941_v25 = vrot.slane %v940_v24, 4  ;;  %v924_v49 = vadd.f32 %v923_v41, %v922_v9  ;;  %v907_v20 = vrot.slane %v906_v63, 2  ;;  %v890_v57 = vadd.f32 %v889_v34, %v888_v36  ;;  %v6166_v34 = vld [vmem:[#allocation146_spill] sm:$0xff]  ;;  %v6183_v41 = vld [vmem:[#allocation132_spill] sm:$0xff] }
 0x143   :  { %v933_v59 = vadd.f32 %v932_v14, %v931_v43  ;;  %v916_v23 = vrot.slane %v915_v2, 2  ;;  %v899_v33 = vadd.f32 %v898_v38, %v897_v37  ;;  %v882_v4 = vrot.slane %v881_v0, 1  ;;  %v6160_v37 = vld [vmem:[#allocation126_spill] sm:$0xff]  ;;  %v6181_v14 = vld [vmem:[#allocation151_spill] sm:$0xff] }
 0x144   :  { %v942_v1 = vadd.f32 %v941_v25, %v940_v24  ;;  %v925_v50 = vrot.slane %v924_v49, 2  ;;  %v908_v56 = vadd.f32 %v907_v20, %v906_v63  ;;  %v891_v9 = vrot.slane %v890_v57, 1  ;;  %v6168_v20 = vld [vmem:[#allocation170_spill] sm:$0xff] }
 0x145   :  { %v934_v62 = vrot.slane %v933_v59, 2  ;;  %v917_v42 = vadd.f32 %v916_v23, %v915_v2  ;;  %v900_v43 = vrot.slane %v899_v33, 1  ;;  %v4686_v29 = vadd.f32 %v6151_v60, %v4619_v31  ;;  %v6161_v2 = vld [vmem:[#allocation129_spill] sm:$0xff]  ;;  %v6174_v60 = vld [vmem:[#allocation154_spill] sm:$0xff] }
 0x146   :  { %v943_v12 = vrot.slane %v942_v1, 2  ;;  %v926_v6 = vadd.f32 %v925_v50, %v924_v49  ;;  %v909_v24 = vrot.slane %v908_v56, 1  ;;  %v6152_v10 = vrot.slane %v4621_v17, 1  ;;  %v6169_v23 = vld [vmem:[#allocation173_spill] sm:$0xff] }
 0x147   :  { %v4679_v16 = vadd.f32 %v934_v62, %v933_v59  ;;  %v918_v32 = vrot.slane %v917_v42, 1  ;;  %v4693_v62 = vadd.f32 %v882_v4, %v881_v0  ;;  %v4699_v25 = vadd.f32 %v900_v43, %v899_v33  ;;  %v6162_v0 = vld [vmem:[#allocation130_spill] sm:$0xff]  ;;  %v6167_v33 = vld [vmem:[#allocation169_spill] sm:$0xff] }
 0x148   :  { %v4681_v3 = vadd.f32 %v943_v12, %v942_v1  ;;  %v4691_v21 = vadd.f32 %v6152_v10, %v4621_v17  ;;  %v927_v50 = vrot.slane %v926_v6, 1  ;;  %v4695_v12 = vadd.f32 %v891_v9, %v890_v57  ;;  %v6159_v17 = vld [vmem:[#allocation125_spill] sm:$0xff]  ;;  %v6164_v59 = vld [vmem:[#allocation134_spill] sm:$0xff] }
 0x149   :  { %6153 = vst [vmem:[#allocation32_spill] sm:$0xff] %v4693_v62  ;;  %6155 = vst [vmem:[#allocation36_spill] sm:$0xff] %v4699_v25  ;;  %v4701_v13 = vadd.f32 %v909_v24, %v908_v56  ;;  %v4703_v31 = vadd.f32 %v918_v32, %v917_v42  ;;  %v947_v63 = vadd.f32 %v6160_v37, %v6159_v17  ;;  %v6163_v57 = vld [vmem:[#allocation133_spill] sm:$0xff]  ;;  %v6170_v42 = vld [vmem:[#allocation174_spill] sm:$0xff] }
 0x14a   :  { %6154 = vst [vmem:[#allocation35_spill] sm:$0xff] %v4695_v12  ;;  %v4705_v36 = vadd.f32 %v927_v50, %v926_v6  ;;  %v956_v49 = vadd.f32 %v6162_v0, %v6161_v2  ;;  %v965_v1 = vadd.f32 %v6164_v59, %v6163_v57  ;;  %v974_v38 = vadd.f32 %v6166_v34, %v6165_v35  ;;  %v6171_v6 = vld [vmem:[#allocation149_spill] sm:$0xff]  ;;  %v6172_v9 = vld [vmem:[#allocation150_spill] sm:$0xff]  ;;  %v6175_v32 = vld [vmem:[#allocation127_spill] sm:$0xff] }
 0x14b   :  { %6156 = vst [vmem:[#allocation16_spill] sm:$0xff] %v4701_v13  ;;  %6157 = vst [vmem:[#allocation22_spill] sm:$0xff] %v4703_v31  ;;  %v983_v56 = vadd.f32 %v6168_v20, %v6167_v33  ;;  %v992_v4 = vadd.f32 %v6170_v42, %v6169_v23  ;;  %v1001_v43 = vadd.f32 %v6172_v9, %v6171_v6  ;;  %v6173_v24 = vld [vmem:[#allocation153_spill] sm:$0xff]  ;;  %v6176_v17 = vld [vmem:[#allocation131_spill] sm:$0xff] }
 0x14c   :  { %6158 = vst [vmem:[#allocation27_spill] sm:$0xff] %v4705_v36  ;;  %v1010_v10 = vadd.f32 %v6174_v60, %v6173_v24  ;;  %v948_v50 = vadd.f32 %v947_v63, %v6175_v32  ;;  %v957_v37 = vadd.f32 %v956_v49, %v6176_v17  ;;  %v6177_v2 = vld [vmem:[#allocation135_spill] sm:$0xff]  ;;  %v6182_v6 = vld [vmem:[#allocation128_spill] sm:$0xff] }
 0x14d   :  { %v966_v0 = vadd.f32 %v965_v1, %v6177_v2  ;;  %v6178_v57 = vld [vmem:[#allocation147_spill] sm:$0xff]  ;;  %v1002_v23 = vadd.f32 %v1001_v43, %v6181_v14  ;;  %v6184_v60 = vld [vmem:[#allocation136_spill] sm:$0xff] }
 0x14e   :  { %v975_v59 = vadd.f32 %v974_v38, %v6178_v57  ;;  %v6179_v35 = vld [vmem:[#allocation171_spill] sm:$0xff]  ;;  %v1011_v42 = vadd.f32 %v1010_v10, %v4135_v46  ;;  %v949_v9 = vadd.f32 %v948_v50, %v6182_v6  ;;  %v958_v24 = vadd.f32 %v957_v37, %v6183_v41  ;;  %v6185_v32 = vld [vmem:[#allocation148_spill] sm:$0xff] }
 0x14f   :  { %v984_v34 = vadd.f32 %v983_v56, %v6179_v35  ;;  %v6180_v33 = vld [vmem:[#allocation175_spill] sm:$0xff]  ;;  %v967_v63 = vadd.f32 %v966_v0, %v6184_v60  ;;  %v6186_v17 = vld [vmem:[#allocation172_spill] sm:$0xff] }
 0x150   :  { %v993_v20 = vadd.f32 %v992_v4, %v6180_v33  ;;  %v976_v49 = vadd.f32 %v975_v59, %v6185_v32  ;;  %v6187_v2 = vld [vmem:[#allocation176_spill] sm:$0xff]  ;;  %v1012_v4 = vadd.f32 %v1011_v42, %v4139_v45  ;;  %v950_v35 = vrot.slane %v949_v9, 4 }
 0x151   :  { %v985_v1 = vadd.f32 %v984_v34, %v6186_v17  ;;  %v6188_v57 = vld [vmem:[#allocation152_spill] sm:$0xff]  ;;  %v959_v14 = vrot.slane %v958_v24, 4  ;;  %v968_v43 = vrot.slane %v967_v63, 4 }
 0x152   :  { %v994_v38 = vadd.f32 %v993_v20, %v6187_v2  ;;  %v1003_v56 = vadd.f32 %v1002_v23, %v6188_v57  ;;  %v977_v46 = vrot.slane %v976_v49, 4  ;;  %v1013_v41 = vrot.slane %v1012_v4, 4 }
 0x153   :  { %v986_v10 = vrot.slane %v985_v1, 4  ;;  %v951_v37 = vadd.f32 %v950_v35, %v949_v9  ;;  %v960_v0 = vadd.f32 %v959_v14, %v958_v24  ;;  %v969_v6 = vadd.f32 %v968_v43, %v967_v63 }
 0x154   :  { %v995_v50 = vrot.slane %v994_v38, 4  ;;  %v1004_v33 = vrot.slane %v1003_v56, 4  ;;  %v978_v59 = vadd.f32 %v977_v46, %v976_v49  ;;  %v1014_v20 = vadd.f32 %v1013_v41, %v1012_v4 }
 0x155   :  { %v987_v60 = vadd.f32 %v986_v10, %v985_v1  ;;  %v952_v17 = vrot.slane %v951_v37, 2  ;;  %v961_v23 = vrot.slane %v960_v0, 2  ;;  %v970_v2 = vrot.slane %v969_v6, 2 }
 0x156   :  { %v996_v34 = vadd.f32 %v995_v50, %v994_v38  ;;  %v1005_v32 = vadd.f32 %v1004_v33, %v1003_v56  ;;  %v979_v45 = vrot.slane %v978_v59, 2  ;;  %v1015_v25 = vrot.slane %v1014_v20, 2 }
 0x157   :  { %v988_v42 = vrot.slane %v987_v60, 2  ;;  %v953_v36 = vadd.f32 %v952_v17, %v951_v37  ;;  %v962_v31 = vadd.f32 %v961_v23, %v960_v0  ;;  %v971_v12 = vadd.f32 %v970_v2, %v969_v6  ;;  %v6198_v17 = vld [vmem:[#allocation166_spill] sm:$0xff] }
 0x158   :  { %v997_v57 = vrot.slane %v996_v34, 2  ;;  %v1006_v13 = vrot.slane %v1005_v32, 2  ;;  %v980_v62 = vadd.f32 %v979_v45, %v978_v59  ;;  %v4741_v49 = vadd.f32 %v1015_v25, %v1014_v20  ;;  %v6193_v59 = vld [vmem:[#allocation157_spill] sm:$0xff]  ;;  %v6200_v2 = vld [vmem:[#allocation202_spill] sm:$0xff] }
 0x159   :  { %v989_v9 = vadd.f32 %v988_v42, %v987_v60  ;;  %v954_v1 = vrot.slane %v953_v36, 1  ;;  %v963_v38 = vrot.slane %v962_v31, 1  ;;  %v972_v56 = vrot.slane %v971_v12, 1  ;;  %v6197_v20 = vld [vmem:[#allocation165_spill] sm:$0xff]  ;;  %v6202_v42 = vld [vmem:[#allocation178_spill] sm:$0xff] }
 0x15a   :  { %v998_v24 = vadd.f32 %v997_v57, %v996_v34  ;;  %v4739_v63 = vadd.f32 %v1006_v13, %v1005_v32  ;;  %v981_v4 = vrot.slane %v980_v62, 1  ;;  %v6189_v35 = vrot.slane %v4679_v16, 1  ;;  %v6196_v34 = vld [vmem:[#allocation162_spill] sm:$0xff]  ;;  %v6201_v45 = vld [vmem:[#allocation177_spill] sm:$0xff] }
 0x15b   :  { %v6190_v43 = vrot.slane %v4681_v3, 1  ;;  %v990_v10 = vrot.slane %v989_v9, 1  ;;  %v4753_v13 = vadd.f32 %v954_v1, %v953_v36  ;;  %v4755_v25 = vadd.f32 %v963_v38, %v962_v31  ;;  %v6194_v36 = vld [vmem:[#allocation158_spill] sm:$0xff]  ;;  %v6195_v31 = vld [vmem:[#allocation161_spill] sm:$0xff] }
 0x15c   :  { %v4746_v14 = vadd.f32 %v6189_v35, %v4679_v16  ;;  %v999_v50 = vrot.slane %v998_v24, 1  ;;  %v4759_v37 = vadd.f32 %v972_v56, %v971_v12  ;;  %v4761_v0 = vadd.f32 %v981_v4, %v980_v62  ;;  %v6199_v12 = vld [vmem:[#allocation201_spill] sm:$0xff]  ;;  %v6206_v56 = vld [vmem:[#allocation159_spill] sm:$0xff] }
 0x15d   :  { %v4751_v46 = vadd.f32 %v6190_v43, %v4681_v3  ;;  %v4763_v16 = vadd.f32 %v990_v10, %v989_v9  ;;  %v1019_v3 = vadd.f32 %v4147_v39, %v4143_v40  ;;  %v1028_v60 = vadd.f32 %v6194_v36, %v6193_v59  ;;  %v6203_v9 = vld [vmem:[#allocation181_spill] sm:$0xff]  ;;  %v6205_v39 = vld [vmem:[#allocation155_spill] sm:$0xff] }
 0x15e   :  { %6191 = vst [vmem:[#allocation6_spill] sm:$0xff] %v4759_v37  ;;  %v4765_v6 = vadd.f32 %v999_v50, %v998_v24  ;;  %v1037_v32 = vadd.f32 %v6196_v34, %v6195_v31  ;;  %v1046_v23 = vadd.f32 %v6198_v17, %v6197_v20  ;;  %v1055_v62 = vadd.f32 %v6200_v2, %v6199_v12  ;;  %v6204_v24 = vld [vmem:[#allocation182_spill] sm:$0xff]  ;;  %v6207_v35 = vld [vmem:[#allocation163_spill] sm:$0xff]  ;;  %v6211_v12 = vld [vmem:[#allocation156_spill] sm:$0xff] }
 0x15f   :  { %v1064_v57 = vadd.f32 %v6202_v42, %v6201_v45  ;;  %v1073_v1 = vadd.f32 %v6204_v24, %v6203_v9  ;;  %v1082_v40 = vadd.f32 %v4259_v52, %v4255_v30  ;;  %v1020_v38 = vadd.f32 %v1019_v3, %v6205_v39  ;;  %v6208_v10 = vld [vmem:[#allocation167_spill] sm:$0xff]  ;;  %v6212_v45 = vld [vmem:[#allocation160_spill] sm:$0xff] }
 0x160   :  { %6192 = vst [vmem:[#allocation13_spill] sm:$0xff] %v4765_v6  ;;  %v1029_v4 = vadd.f32 %v1028_v60, %v6206_v56  ;;  %v1038_v43 = vadd.f32 %v1037_v32, %v6207_v35  ;;  %v1047_v50 = vadd.f32 %v1046_v23, %v6208_v10  ;;  %v6209_v59 = vld [vmem:[#allocation203_spill] sm:$0xff]  ;;  %v6213_v52 = vld [vmem:[#allocation164_spill] sm:$0xff] }
 0x161   :  { %v1056_v36 = vadd.f32 %v1055_v62, %v6209_v59  ;;  %v6210_v31 = vld [vmem:[#allocation179_spill] sm:$0xff]  ;;  %v1074_v20 = vadd.f32 %v1073_v1, %v4247_v54  ;;  %v1083_v17 = vadd.f32 %v1082_v40, %v4263_v47  ;;  %v1021_v2 = vadd.f32 %v1020_v38, %v6211_v12  ;;  %v6214_v42 = vld [vmem:[#allocation168_spill] sm:$0xff] }
 0x162   :  { %v1065_v34 = vadd.f32 %v1064_v57, %v6210_v31  ;;  %v1030_v30 = vadd.f32 %v1029_v4, %v6212_v45  ;;  %v1039_v3 = vadd.f32 %v1038_v43, %v6213_v52  ;;  %v1048_v60 = vadd.f32 %v1047_v50, %v6214_v42  ;;  %v6215_v9 = vld [vmem:[#allocation204_spill] sm:$0xff]  ;;  %v6217_v39 = vld [vmem:[#allocation183_spill] sm:$0xff] }
 0x163   :  { %v1057_v32 = vadd.f32 %v1056_v36, %v6215_v9  ;;  %v6216_v24 = vld [vmem:[#allocation180_spill] sm:$0xff]  ;;  %v1075_v62 = vadd.f32 %v1074_v20, %v6217_v39  ;;  %v1022_v35 = vrot.slane %v1021_v2, 4 }
 0x164   :  { %v1066_v23 = vadd.f32 %v1065_v34, %v6216_v24  ;;  %v6218_v56 = vld [vmem:[#allocation184_spill] sm:$0xff]  ;;  %v1031_v54 = vrot.slane %v1030_v30, 4  ;;  %v1040_v1 = vrot.slane %v1039_v3, 4  ;;  %v1049_v47 = vrot.slane %v1048_v60, 4 }
 0x165   :  { %v1084_v57 = vadd.f32 %v1083_v17, %v6218_v56  ;;  %v1058_v40 = vrot.slane %v1057_v32, 4  ;;  %v1076_v10 = vrot.slane %v1075_v62, 4  ;;  %v1023_v59 = vadd.f32 %v1022_v35, %v1021_v2 }
 0x166   :  { %v1067_v38 = vrot.slane %v1066_v23, 4  ;;  %v1032_v43 = vadd.f32 %v1031_v54, %v1030_v30  ;;  %v1041_v31 = vadd.f32 %v1040_v1, %v1039_v3  ;;  %v1050_v50 = vadd.f32 %v1049_v47, %v1048_v60 }
 0x167   :  { %v1085_v4 = vrot.slane %v1084_v57, 4  ;;  %v1059_v12 = vadd.f32 %v1058_v40, %v1057_v32  ;;  %v1077_v45 = vadd.f32 %v1076_v10, %v1075_v62  ;;  %v1024_v52 = vrot.slane %v1023_v59, 2 }
 0x168   :  { %v1068_v36 = vadd.f32 %v1067_v38, %v1066_v23  ;;  %v1033_v20 = vrot.slane %v1032_v43, 2  ;;  %v1042_v42 = vrot.slane %v1041_v31, 2  ;;  %v1051_v17 = vrot.slane %v1050_v50, 2 }
 0x169   :  { %v1086_v34 = vadd.f32 %v1085_v4, %v1084_v57  ;;  %v1060_v9 = vrot.slane %v1059_v12, 2  ;;  %v1078_v39 = vrot.slane %v1077_v45, 2  ;;  %v1025_v41 = vadd.f32 %v1024_v52, %v1023_v59 }
 0x16a   :  { %v1069_v24 = vrot.slane %v1068_v36, 2  ;;  %v1034_v33 = vadd.f32 %v1033_v20, %v1032_v43  ;;  %v1043_v6 = vadd.f32 %v1042_v42, %v1041_v31  ;;  %v1052_v37 = vadd.f32 %v1051_v17, %v1050_v50  ;;  %v6225_v17 = vld [vmem:[#allocation192_spill] sm:$0xff] }
 0x16b   :  { %v1087_v56 = vrot.slane %v1086_v34, 2  ;;  %v1061_v2 = vadd.f32 %v1060_v9, %v1059_v12  ;;  %v4799_v3 = vadd.f32 %v1078_v39, %v1077_v45  ;;  %v1026_v32 = vrot.slane %v1025_v41, 1 }
 0x16c   :  { %v1070_v30 = vadd.f32 %v1069_v24, %v1068_v36  ;;  %v1035_v23 = vrot.slane %v1034_v33, 1  ;;  %v1044_v62 = vrot.slane %v1043_v6, 1  ;;  %v1053_v57 = vrot.slane %v1052_v37, 1  ;;  %v6222_v36 = vld [vmem:[#allocation186_spill] sm:$0xff] }
 0x16d   :  { %v4801_v60 = vadd.f32 %v1087_v56, %v1086_v34  ;;  %v6219_v35 = vrot.slane %v4739_v63, 1  ;;  %v6220_v1 = vrot.slane %v4741_v49, 1  ;;  %v1062_v40 = vrot.slane %v1061_v2, 1  ;;  %v6228_v24 = vld [vmem:[#allocation198_spill] sm:$0xff]  ;;  %v6231_v56 = vld [vmem:[#allocation189_spill] sm:$0xff] }
 0x16e   :  { %v1071_v38 = vrot.slane %v1070_v30, 1  ;;  %v4813_v10 = vadd.f32 %v1026_v32, %v1025_v41  ;;  %v4815_v4 = vadd.f32 %v1035_v23, %v1034_v33  ;;  %v1080_v59 = vrot.slane %v4799_v3, 1  ;;  %v6234_v32 = vld [vmem:[#allocation195_spill] sm:$0xff] }
 0x16f   :  { %v4806_v54 = vadd.f32 %v6219_v35, %v4739_v63  ;;  %v4811_v47 = vadd.f32 %v6220_v1, %v4741_v49  ;;  %v1089_v43 = vrot.slane %v4801_v60, 1  ;;  %v4819_v31 = vadd.f32 %v1044_v62, %v1043_v6  ;;  %v6221_v49 = vld [vmem:[#allocation185_spill] sm:$0xff]  ;;  %v6236_v35 = vld [vmem:[#allocation199_spill] sm:$0xff] }
 0x170   :  { %v4821_v50 = vadd.f32 %v1053_v57, %v1052_v37  ;;  %v4823_v63 = vadd.f32 %v1062_v40, %v1061_v2  ;;  %v4825_v12 = vadd.f32 %v1071_v38, %v1070_v30  ;;  %v1091_v45 = vadd.f32 %v6222_v36, %v6221_v49  ;;  %v6233_v2 = vld [vmem:[#allocation193_spill] sm:$0xff] }
 0x171   :  { %v1100_v41 = vadd.f32 %v4291_v44, %v4287_v48  ;;  %v1109_v33 = vadd.f32 %v4307_v53, %v4303_v15  ;;  %v1118_v34 = vadd.f32 %v4323_v8, %v4319_v58  ;;  %v1127_v37 = vadd.f32 %v4339_v7, %v4335_v22  ;;  %v6223_v44 = vld [vmem:[#allocation188_spill] sm:$0xff]  ;;  %v6224_v15 = vld [vmem:[#allocation190_spill] sm:$0xff]  ;;  %v6235_v62 = vld [vmem:[#allocation197_spill] sm:$0xff] }
 0x172   :  { %v1136_v6 = vadd.f32 %v4355_v19, %v4351_v18  ;;  %v1145_v52 = vadd.f32 %v4415_v5, %v4411_v55  ;;  %v1154_v20 = vadd.f32 %v4431_v27, %v4427_v11  ;;  %v1092_v48 = vadd.f32 %v1091_v45, %v4279_v51  ;;  %v6226_v8 = vld [vmem:[#allocation194_spill] sm:$0xff]  ;;  %v6227_v22 = vld [vmem:[#allocation196_spill] sm:$0xff]  ;;  %v6230_v55 = vld [vmem:[#allocation187_spill] sm:$0xff] }
 0x173   :  { %v1101_v42 = vadd.f32 %v1100_v41, %v6223_v44  ;;  %v1110_v53 = vadd.f32 %v1109_v33, %v6224_v15  ;;  %v1119_v58 = vadd.f32 %v1118_v34, %v6225_v17  ;;  %v1128_v9 = vadd.f32 %v1127_v37, %v6226_v8  ;;  %v6229_v19 = vld [vmem:[#allocation200_spill] sm:$0xff]  ;;  %v6232_v27 = vld [vmem:[#allocation191_spill] sm:$0xff]  ;;  %v6237_v40 = vld [vmem:[#allocation205_spill] sm:$0xff] }
 0x174   :  { %v1137_v7 = vadd.f32 %v1136_v6, %v6227_v22  ;;  %v1146_v18 = vadd.f32 %v1145_v52, %v6228_v24  ;;  %v1155_v39 = vadd.f32 %v1154_v20, %v6229_v19  ;;  %v1093_v5 = vadd.f32 %v1092_v48, %v6230_v55 }
 0x175   :  { %v1102_v11 = vadd.f32 %v1101_v42, %v6231_v56  ;;  %v1111_v51 = vadd.f32 %v1110_v53, %v6232_v27  ;;  %v1120_v30 = vadd.f32 %v1119_v58, %v6233_v2  ;;  %v1129_v23 = vadd.f32 %v1128_v9, %v6234_v32 }
 0x176   :  { %v1138_v57 = vadd.f32 %v1137_v7, %v6235_v62  ;;  %v1147_v1 = vadd.f32 %v1146_v18, %v6236_v35  ;;  %v1156_v38 = vadd.f32 %v1155_v39, %v6237_v40  ;;  %v1094_v49 = vrot.slane %v1093_v5, 4 }
 0x177   :  { %v1103_v36 = vrot.slane %v1102_v11, 4  ;;  %v1112_v45 = vrot.slane %v1111_v51, 4  ;;  %v1121_v41 = vrot.slane %v1120_v30, 4  ;;  %v1130_v33 = vrot.slane %v1129_v23, 4 }
 0x178   :  { %v1139_v34 = vrot.slane %v1138_v57, 4  ;;  %v1148_v37 = vrot.slane %v1147_v1, 4  ;;  %v1157_v6 = vrot.slane %v1156_v38, 4  ;;  %v1095_v52 = vadd.f32 %v1094_v49, %v1093_v5 }
 0x179   :  { %v1104_v20 = vadd.f32 %v1103_v36, %v1102_v11  ;;  %v1113_v48 = vadd.f32 %v1112_v45, %v1111_v51  ;;  %v1122_v44 = vadd.f32 %v1121_v41, %v1120_v30  ;;  %v1131_v42 = vadd.f32 %v1130_v33, %v1129_v23 }
 0x17a   :  { %v1140_v15 = vadd.f32 %v1139_v34, %v1138_v57  ;;  %v1149_v53 = vadd.f32 %v1148_v37, %v1147_v1  ;;  %v1158_v17 = vadd.f32 %v1157_v6, %v1156_v38  ;;  %v1096_v58 = vrot.slane %v1095_v52, 2 }
 0x17b   :  { %v1105_v8 = vrot.slane %v1104_v20, 2  ;;  %v1114_v9 = vrot.slane %v1113_v48, 2  ;;  %v1123_v22 = vrot.slane %v1122_v44, 2  ;;  %v1132_v7 = vrot.slane %v1131_v42, 2 }
 0x17c   :  { %v1141_v24 = vrot.slane %v1140_v15, 2  ;;  %v1150_v18 = vrot.slane %v1149_v53, 2  ;;  %v1159_v19 = vrot.slane %v1158_v17, 2  ;;  %v1097_v39 = vadd.f32 %v1096_v58, %v1095_v52  ;;  %v6239_v52 = vld [vmem:[#allocation210_spill] sm:$0xff]  ;;  %v6244_v58 = vld [vmem:[#allocation15_spill] sm:$0xff] }
 0x17d   :  { %v1106_v55 = vadd.f32 %v1105_v8, %v1104_v20  ;;  %v1115_v56 = vadd.f32 %v1114_v9, %v1113_v48  ;;  %v1124_v27 = vadd.f32 %v1123_v22, %v1122_v44  ;;  %v1133_v5 = vadd.f32 %v1132_v7, %v1131_v42  ;;  %v6240_v48 = vld [vmem:[#allocation216_spill] sm:$0xff]  ;;  %v6241_v44 = vld [vmem:[#allocation14_spill] sm:$0xff]  ;;  %v6247_v7 = vld [vmem:[#allocation19_spill] sm:$0xff] }
 0x17e   :  { %v1142_v11 = vadd.f32 %v1141_v24, %v1140_v15  ;;  %v1151_v51 = vadd.f32 %v1150_v18, %v1149_v53  ;;  %v1160_v2 = vadd.f32 %v1159_v19, %v1158_v17  ;;  %v1098_v30 = vrot.slane %v1097_v39, 1  ;;  %v6242_v15 = vld [vmem:[#allocation208_spill] sm:$0xff]  ;;  %v6243_v17 = vld [vmem:[#allocation211_spill] sm:$0xff]  ;;  %v6248_v18 = vld [vmem:[#allocation26_spill] sm:$0xff] }
 0x17f   :  { %v1107_v32 = vrot.slane %v1106_v55, 1  ;;  %v1116_v23 = vrot.slane %v1115_v56, 1  ;;  %v1125_v62 = vrot.slane %v1124_v27, 1  ;;  %v1134_v57 = vrot.slane %v1133_v5, 1  ;;  %v6246_v22 = vld [vmem:[#allocation212_spill] sm:$0xff]  ;;  %v6249_v19 = vld [vmem:[#allocation2_spill] sm:$0xff] }
 0x180   :  { %v1143_v35 = vrot.slane %v1142_v11, 1  ;;  %v1152_v1 = vrot.slane %v1151_v51, 1  ;;  %v1161_v40 = vrot.slane %v1160_v2, 1  ;;  %v4862_v38 = vadd.f32 %v1080_v59, %v4799_v3  ;;  %v6238_v59 = vld [vmem:[#allocation207_spill] sm:$0xff] }
 0x181   :  { %v4867_v49 = vadd.f32 %v1089_v43, %v4801_v60  ;;  %v4869_v36 = vadd.f32 %v1098_v30, %v1097_v39  ;;  %v4871_v45 = vadd.f32 %v1107_v32, %v1106_v55  ;;  %v4873_v41 = vadd.f32 %v1116_v23, %v1115_v56  ;;  %v6250_v55 = vld [vmem:[#allocation11_spill] sm:$0xff]  ;;  %v6254_v32 = vld [vmem:[#allocation214_spill] sm:$0xff] }
 0x182   :  { %v4875_v33 = vadd.f32 %v1125_v62, %v1124_v27  ;;  %v4877_v34 = vadd.f32 %v1134_v57, %v1133_v5  ;;  %v4879_v37 = vadd.f32 %v1143_v35, %v1142_v11  ;;  %v4881_v3 = vadd.f32 %v1152_v1, %v1151_v51  ;;  %v6251_v27 = vld [vmem:[#allocation213_spill] sm:$0xff]  ;;  %v6252_v11 = vld [vmem:[#allocation20_spill] sm:$0xff] }
 0x183   :  { %v4883_v60 = vadd.f32 %v1161_v40, %v1160_v2  ;;  %v1172_v43 = vsel %vm1171_vm0, %v4483_v28, %v6238_v59  ;;  %v1194_v20 = vsel %vm1173_vm1, %v6239_v52, %v4515_v61  ;;  %v1213_v42 = vsel %vm1175_vm2, %v6241_v44, %v6240_v48  ;;  %v6253_v2 = vld [vmem:[#allocation12_spill] sm:$0xff]  ;;  %v6256_v1 = vld [vmem:[#allocation209_spill] sm:$0xff]  ;;  %v6257_v59 = vld [vmem:[#allocation215_spill] sm:$0xff] }
 0x184   :  { %v1174_v6 = vsel %vm1173_vm1, %v4486_v26, %v1172_v43  ;;  %v1195_v28 = vsel %vm1175_vm2, %v6243_v17, %v1194_v20  ;;  %v1214_v8 = vsel %vm1177_vm3, %v6244_v58, %v1213_v42  ;;  %v6245_v26 = vld [vmem:[#allocation10_spill] sm:$0xff]  ;;  %v1218_v39 = vsel %vm1171_vm0, %v6249_v19, %v6248_v18  ;;  %v6255_v62 = vld [vmem:[#allocation24_spill] sm:$0xff]  ;;  %v6260_v44 = vld [vmem:[#allocation9_spill] sm:$0xff] }
 0x185   :  { %v1176_v53 = vsel %vm1175_vm2, %v6242_v15, %v1174_v6  ;;  %v1196_v61 = vsel %vm1177_vm3, %v6246_v22, %v1195_v28  ;;  %v1215_v24 = vsel %vm1179_vm4, %v6247_v7, %v1214_v8  ;;  %v4923_v35 = vsel %vm1221_vm7, %v1218_v39, inf  ;;  %v6258_v6 = vld [vmem:[#allocation5_spill] sm:$0xff]  ;;  %v6259_v52 = vld [vmem:[#allocation8_spill] sm:$0xff]  ;;  %v6261_v15 = vld [vmem:[#allocation31_spill] sm:$0xff] }
 0x186   :  { %v1178_v9 = vsel %vm1177_vm3, %v6245_v26, %v1176_v53  ;;  %v1197_v5 = vsel %vm1179_vm4, %v6251_v27, %v1196_v61  ;;  %v1216_v51 = vsel %vm1181_vm5, %v6252_v11, %v1215_v24  ;;  %v1232_v20 = vsel %vm1177_vm3, %v6259_v52, %v6258_v6  ;;  %v6262_v17 = vld [vmem:[#allocation21_spill] sm:$0xff]  ;;  %v6263_v8 = vld [vmem:[#allocation32_spill] sm:$0xff]  ;;  %v6264_v26 = vld [vmem:[#allocation35_spill] sm:$0xff] }
 0x187   :  { %v1180_v56 = vsel %vm1179_vm4, %v6250_v55, %v1178_v9  ;;  %v1198_v23 = vsel %vm1181_vm5, %v6254_v32, %v1197_v5  ;;  %v1217_v57 = vsel %vm1183_vm6, %v6255_v62, %v1216_v51  ;;  %v1233_v42 = vsel %vm1179_vm4, %v6260_v44, %v1232_v20  ;;  %v6265_v22 = vld [vmem:[#allocation22_spill] sm:$0xff]  ;;  %v6266_v61 = vld [vmem:[#allocation27_spill] sm:$0xff]  ;;  %v6267_v24 = vld [vmem:[#allocation25_spill] sm:$0xff] }
 0x188   :  { %v1182_v30 = vsel %vm1181_vm5, %v6253_v2, %v1180_v56  ;;  %v1199_v43 = vsel %vm1183_vm6, %v6257_v59, %v1198_v23  ;;  %v4934_v48 = vsel %vm1221_vm7, inf, %v1217_v57  ;;  %v1236_v53 = vsel %vm1171_vm0, %v4686_v29, %v6261_v15  ;;  %v6268_v29 = vld [vmem:[#allocation36_spill] sm:$0xff]  ;;  %v6271_v23 = vld [vmem:[#allocation13_spill] sm:$0xff] }
 0x189   :  { %v4927_v40 = vsel %vm1183_vm6, %v6256_v1, %v1182_v30  ;;  %v1234_v28 = vsel %vm1181_vm5, %v6262_v17, %v1233_v42  ;;  %v1237_v58 = vsel %vm1173_vm1, %v4691_v21, %v1236_v53  ;;  %v1251_v9 = vsel %vm1179_vm4, %v6264_v26, %v6263_v8  ;;  %v6269_v56 = vld [vmem:[#allocation16_spill] sm:$0xff]  ;;  %v6270_v30 = vld [vmem:[#allocation6_spill] sm:$0xff] }
 0x18a   :  { %v1254_v7 = vsel %vm1171_vm0, %v6266_v61, %v6265_v22  ;;  %v1235_v18 = vsel %vm1183_vm6, %v6267_v24, %v1234_v28  ;;  %v4953_v19 = vsel %vm1240_vm9, %v1237_v58, inf  ;;  %v1252_v39 = vsel %vm1181_vm5, %v6268_v29, %v1251_v9 }
 0x18b   :  { %v1255_v55 = vsel %vm1173_vm1, %v4746_v14, %v1254_v7  ;;  %v4960_v21 = vsel %vm1202_vm8, inf, %v1199_v43  ;;  %v1253_v27 = vsel %vm1183_vm6, %v6269_v56, %v1252_v39  ;;  %v4966_v11 = vsel %vm1240_vm9, inf, %v1235_v18 }
 0x18c   :  { %v1256_v5 = vsel %vm1175_vm2, %v4751_v46, %v1255_v55  ;;  %v1270_v2 = vsel %vm1181_vm5, %v4755_v25, %v4753_v13  ;;  %v1272_v14 = vsel %vm1171_vm0, %v4763_v16, %v4761_v0  ;;  %v1289_v46 = vsel %vm1183_vm6, %v4815_v4, %v4813_v10 }
 0x18d   :  { %v4968_v51 = vsel %vm1259_vm10, %v1256_v5, inf  ;;  %v1271_v32 = vsel %vm1183_vm6, %v6270_v30, %v1270_v2  ;;  %v1273_v62 = vsel %vm1173_vm1, %v6271_v23, %v1272_v14  ;;  %v4983_v57 = vsel %vm1259_vm10, inf, %v1253_v27 }
 0x18e   :  { %v1274_v13 = vsel %vm1175_vm2, %v4806_v54, %v1273_v62  ;;  %v1290_v25 = vsel %vm1171_vm0, %v4821_v50, %v4819_v31  ;;  %v4992_v16 = vsel %vm1278_vm11, inf, %v1271_v32  ;;  %v1308_v10 = vsel %vm1171_vm0, %v4873_v41, %v4871_v45 }
 0x18f   :  { %v1275_v0 = vsel %vm1177_vm3, %v4811_v47, %v1274_v13  ;;  %v1291_v1 = vsel %vm1173_vm1, %v4823_v63, %v1290_v25  ;;  %v5004_v31 = vsel %vm1297_vm12, inf, %v1289_v46  ;;  %v1309_v47 = vsel %vm1173_vm1, %v4875_v33, %v1308_v10 }
 0x190   :  { %v4999_v4 = vsel %vm1278_vm11, %v1275_v0, inf  ;;  %v1292_v54 = vsel %vm1175_vm2, %v4825_v12, %v1291_v1  ;;  %v1310_v63 = vsel %vm1175_vm2, %v4877_v34, %v1309_v47  ;;  %v1324_v45 = vrot.slane %v4927_v40, 7 }
 0x191   :  { %v1293_v50 = vsel %vm1177_vm3, %v4862_v38, %v1292_v54  ;;  %v1311_v12 = vsel %vm1177_vm3, %v4879_v37, %v1310_v63  ;;  %v1325_v59 = vrot.slane %v4960_v21, 6  ;;  %v1327_v43 = vrot.slane %v4934_v48, 5 }
 0x192   :  { %v1294_v41 = vsel %vm1179_vm4, %v4867_v49, %v1293_v50  ;;  %v1312_v38 = vsel %vm1179_vm4, %v4881_v3, %v1311_v12  ;;  %v1329_v34 = vrot.slane %v4966_v11, 4  ;;  %v1331_v6 = vrot.slane %v4983_v57, 3 }
 0x193   :  { %v5020_v33 = vsel %vm1297_vm12, %v1294_v41, inf  ;;  %v5028_v49 = vsel %vm1181_vm5, %v4883_v60, %v1312_v38  ;;  %v1326_v37 = vsel %vm1173_vm1, %v1325_v59, %v1324_v45  ;;  %v1333_v52 = vrot.slane %v4992_v16, 2 }
 0x194   :  { %v1335_v20 = vrot.slane %v5004_v31, 1  ;;  %v1328_v44 = vsel %vm1175_vm2, %v1327_v43, %v1326_v37  ;;  %v1340_v42 = vrot.slane %v4960_v21, 7  ;;  %v1342_v3 = vrot.slane %v4934_v48, 6 }
 0x195   :  { %v1344_v15 = vrot.slane %v4966_v11, 5  ;;  %v5039_v53 = vsel %vm1316_vm13, inf, %v4869_v36  ;;  %v1330_v60 = vsel %vm1177_vm3, %v1329_v34, %v1328_v44  ;;  %v1346_v17 = vrot.slane %v4983_v57, 4 }
 0x196   :  { %v1332_v28 = vsel %vm1179_vm4, %v1331_v6, %v1330_v60  ;;  %v1341_v58 = vsel %vm1171_vm0, %v1340_v42, %v4927_v40  ;;  %v1348_v8 = vrot.slane %v4992_v16, 3  ;;  %v1350_v22 = vrot.slane %v5004_v31, 2 }
 0x197   :  { %v1334_v26 = vsel %vm1181_vm5, %v1333_v52, %v1332_v28  ;;  %v1343_v9 = vsel %vm1173_vm1, %v1342_v3, %v1341_v58  ;;  %v1352_v7 = vrot.slane %v5039_v53, 1 }
 0x198   :  { %v1336_v36 = vsel %vm1183_vm6, %v1335_v20, %v1334_v26  ;;  %v1345_v61 = vsel %vm1175_vm2, %v1344_v15, %v1343_v9 }
 0x199   :  { %v1347_v24 = vsel %vm1177_vm3, %v1346_v17, %v1345_v61  ;;  %v1338_v18 = vsel %vm1202_vm8, inf, %v1336_v36 }
 0x19a   :  { %v1349_v29 = vsel %vm1179_vm4, %v1348_v8, %v1347_v24 }
 0x19b   :  { %v1351_v39 = vsel %vm1181_vm5, %v1350_v22, %v1349_v29 }
 0x19c   :  { %v1353_v55 = vsel %vm1183_vm6, %v1352_v7, %v1351_v39 }
 0x19d   :  { %v1355_v56 = vmin.f32 %v1338_v18, %v1353_v55 }
 0x19f   :  { %v1357_v27 = vrot.slane %v1355_v56, 7  ;;  %v1358_v5 = vrot.slane %v1355_v56, 1  ;;  %v1359_v2 = vrot.slane %v1355_v56, 2  ;;  %v1360_v14 = vrot.slane %v1355_v56, 3 }
 0x1a0   :  { %v1361_v30 = vrot.slane %v1355_v56, 4  ;;  %v1362_v32 = vrot.slane %v1355_v56, 5  ;;  %v1363_v23 = vrot.slane %v1355_v56, 6  ;;  %v1373_v62 = vadd.f32 %v1355_v56, %v4960_v21 }
 0x1a1   :  { %v1372_v46 = vadd.f32 %v1357_v27, %v4927_v40  ;;  %v1374_v13 = vadd.f32 %v1358_v5, %v4934_v48  ;;  %v1375_v25 = vadd.f32 %v1359_v2, %v4966_v11  ;;  %v1376_v0 = vadd.f32 %v1360_v14, %v4983_v57 }
 0x1a2   :  { %v1377_v1 = vadd.f32 %v1361_v30, %v4992_v16  ;;  %v1378_v10 = vadd.f32 %v1362_v32, %v5004_v31  ;;  %v1379_v54 = vadd.f32 %v1363_v23, %v5039_v53  ;;  %v1387_v47 = vrot.slane %v1373_v62, 7 }
 0x1a3   :  { %v1389_v50 = vrot.slane %v1374_v13, 6  ;;  %v1391_v63 = vrot.slane %v1375_v25, 5  ;;  %v1393_v45 = vrot.slane %v1376_v0, 4  ;;  %v1402_v41 = vrot.slane %v1372_v46, 1 }
 0x1a4   :  { %v1388_v12 = vsel %vm1173_vm1, %v1387_v47, %v1372_v46  ;;  %v1395_v59 = vrot.slane %v1377_v1, 3  ;;  %v1397_v43 = vrot.slane %v1378_v10, 2  ;;  %v1404_v38 = vrot.slane %v1374_v13, 7 }
 0x1a5   :  { %v1390_v34 = vsel %vm1175_vm2, %v1389_v50, %v1388_v12  ;;  %v1403_v6 = vsel %vm1171_vm0, %v1373_v62, %v1402_v41  ;;  %v1406_v37 = vrot.slane %v1375_v25, 6  ;;  %v1408_v52 = vrot.slane %v1376_v0, 5 }
 0x1a6   :  { %v1392_v20 = vsel %vm1177_vm3, %v1391_v63, %v1390_v34  ;;  %v1405_v44 = vsel %vm1173_vm1, %v1404_v38, %v1403_v6  ;;  %v1410_v42 = vrot.slane %v1377_v1, 4  ;;  %v1412_v3 = vrot.slane %v1378_v10, 3 }
 0x1a7   :  { %v1394_v15 = vsel %vm1179_vm4, %v1393_v45, %v1392_v20  ;;  %v1407_v60 = vsel %vm1175_vm2, %v1406_v37, %v1405_v44  ;;  %v1414_v17 = vrot.slane %v1379_v54, 2 }
 0x1a8   :  { %v1396_v28 = vsel %vm1181_vm5, %v1395_v59, %v1394_v15  ;;  %v1409_v58 = vsel %vm1177_vm3, %v1408_v52, %v1407_v60 }
 0x1a9   :  { %v1398_v8 = vsel %vm1183_vm6, %v1397_v43, %v1396_v28  ;;  %v1411_v26 = vsel %vm1179_vm4, %v1410_v42, %v1409_v58 }
 0x1aa   :  { %v1400_v9 = vsel %vm1202_vm8, inf, %v1398_v8  ;;  %v1413_v22 = vsel %vm1181_vm5, %v1412_v3, %v1411_v26 }
 0x1ab   :  { %v1415_v36 = vsel %vm1183_vm6, %v1414_v17, %v1413_v22 }
 0x1ac   :  { %v1417_v61 = vmin.f32 %v1400_v9, %v1415_v36 }
 0x1ae   :  { %v1418_v7 = vmin.f32 %v1417_v61, %v1338_v18 }
 0x1b0   :  { %v1420_v24 = vrot.slane %v1418_v7, 6  ;;  %v1421_v29 = vrot.slane %v1418_v7, 7  ;;  %v1422_v39 = vrot.slane %v1418_v7, 1  ;;  %v1423_v55 = vrot.slane %v1418_v7, 2 }
 0x1b1   :  { %v1424_v56 = vrot.slane %v1418_v7, 3  ;;  %v1425_v27 = vrot.slane %v1418_v7, 4  ;;  %v1426_v5 = vrot.slane %v1418_v7, 5  ;;  %v1437_v2 = vadd.f32 %v1418_v7, %v4934_v48 }
 0x1b2   :  { %v1435_v14 = vadd.f32 %v1420_v24, %v4927_v40  ;;  %v1436_v30 = vadd.f32 %v1421_v29, %v4960_v21  ;;  %v1438_v32 = vadd.f32 %v1422_v39, %v4966_v11  ;;  %v1439_v23 = vadd.f32 %v1423_v55, %v4983_v57 }
 0x1b3   :  { %v1440_v62 = vadd.f32 %v1424_v56, %v4992_v16  ;;  %v1441_v18 = vadd.f32 %v1425_v27, %v5004_v31  ;;  %v1452_v46 = vrot.slane %v1437_v2, 7  ;;  %v1442_v1 = vadd.f32 %v1426_v5, %v5039_v53 }
 0x1b4   :  { %v1450_v13 = vrot.slane %v1435_v14, 1  ;;  %v1454_v25 = vrot.slane %v1438_v32, 6  ;;  %v1465_v0 = vrot.slane %v1435_v14, 2  ;;  %v1456_v10 = vrot.slane %v1439_v23, 5 }
 0x1b5   :  { %v1466_v54 = vrot.slane %v1436_v30, 1  ;;  %v1469_v47 = vrot.slane %v1438_v32, 7  ;;  %v1458_v63 = vrot.slane %v1440_v62, 4  ;;  %v1471_v45 = vrot.slane %v1439_v23, 6 }
 0x1b6   :  { %v1451_v50 = vsel %vm1173_vm1, %v1436_v30, %v1450_v13  ;;  %v1460_v12 = vrot.slane %v1441_v18, 3  ;;  %v1473_v43 = vrot.slane %v1440_v62, 5  ;;  %v1475_v6 = vrot.slane %v1441_v18, 4 }
 0x1b7   :  { %v1453_v41 = vsel %vm1175_vm2, %v1452_v46, %v1451_v50  ;;  %v1467_v59 = vsel %vm1171_vm0, %v1466_v54, %v1465_v0  ;;  %v1477_v20 = vrot.slane %v1442_v1, 3 }
 0x1b8   :  { %v1455_v38 = vsel %vm1177_vm3, %v1454_v25, %v1453_v41  ;;  %v1468_v34 = vsel %vm1173_vm1, %v1437_v2, %v1467_v59 }
 0x1b9   :  { %v1457_v37 = vsel %vm1179_vm4, %v1456_v10, %v1455_v38  ;;  %v1470_v52 = vsel %vm1175_vm2, %v1469_v47, %v1468_v34 }
 0x1ba   :  { %v1459_v44 = vsel %vm1181_vm5, %v1458_v63, %v1457_v37  ;;  %v1472_v42 = vsel %vm1177_vm3, %v1471_v45, %v1470_v52 }
 0x1bb   :  { %v1461_v3 = vsel %vm1183_vm6, %v1460_v12, %v1459_v44  ;;  %v1474_v15 = vsel %vm1179_vm4, %v1473_v43, %v1472_v42 }
 0x1bc   :  { %v1463_v60 = vsel %vm1202_vm8, inf, %v1461_v3  ;;  %v1476_v17 = vsel %vm1181_vm5, %v1475_v6, %v1474_v15 }
 0x1bd   :  { %v1478_v28 = vsel %vm1183_vm6, %v1477_v20, %v1476_v17 }
 0x1be   :  { %v1480_v58 = vmin.f32 %v1463_v60, %v1478_v28 }
 0x1c0   :  { %v1481_v8 = vmin.f32 %v1480_v58, %v1400_v9 }
 0x1c2   :  { %v1483_v26 = vrot.slane %v1481_v8, 5  ;;  %v1484_v22 = vrot.slane %v1481_v8, 6  ;;  %v1485_v36 = vrot.slane %v1481_v8, 7  ;;  %v1486_v61 = vrot.slane %v1481_v8, 1 }
 0x1c3   :  { %v1487_v7 = vrot.slane %v1481_v8, 2  ;;  %v1488_v24 = vrot.slane %v1481_v8, 3  ;;  %v1489_v29 = vrot.slane %v1481_v8, 4  ;;  %v1501_v39 = vadd.f32 %v1481_v8, %v4966_v11 }
 0x1c4   :  { %v1498_v55 = vadd.f32 %v1483_v26, %v4927_v40  ;;  %v1499_v56 = vadd.f32 %v1484_v22, %v4960_v21  ;;  %v1500_v27 = vadd.f32 %v1485_v36, %v4934_v48  ;;  %v1502_v5 = vadd.f32 %v1486_v61, %v4983_v57 }
 0x1c5   :  { %v1503_v2 = vadd.f32 %v1487_v7, %v4992_v16  ;;  %v1504_v9 = vadd.f32 %v1488_v24, %v5004_v31  ;;  %v1517_v32 = vrot.slane %v1501_v39, 7  ;;  %v1505_v62 = vadd.f32 %v1489_v29, %v5039_v53 }
 0x1c6   :  { %v1513_v14 = vrot.slane %v1498_v55, 2  ;;  %v1514_v30 = vrot.slane %v1499_v56, 1  ;;  %v1528_v23 = vrot.slane %v1498_v55, 3  ;;  %v1519_v18 = vrot.slane %v1502_v5, 6 }
 0x1c7   :  { %v1529_v46 = vrot.slane %v1499_v56, 2  ;;  %v1531_v13 = vrot.slane %v1500_v27, 1  ;;  %v1521_v0 = vrot.slane %v1503_v2, 5  ;;  %v1534_v1 = vrot.slane %v1502_v5, 7 }
 0x1c8   :  { %v1515_v25 = vsel %vm1173_vm1, %v1514_v30, %v1513_v14  ;;  %v1523_v54 = vrot.slane %v1504_v9, 4  ;;  %v1536_v50 = vrot.slane %v1503_v2, 6  ;;  %v1538_v41 = vrot.slane %v1504_v9, 5 }
 0x1c9   :  { %v1516_v10 = vsel %vm1175_vm2, %v1500_v27, %v1515_v25  ;;  %v1530_v47 = vsel %vm1171_vm0, %v1529_v46, %v1528_v23  ;;  %v1540_v43 = vrot.slane %v1505_v62, 4 }
 0x1ca   :  { %v1518_v63 = vsel %vm1177_vm3, %v1517_v32, %v1516_v10  ;;  %v1532_v45 = vsel %vm1173_vm1, %v1531_v13, %v1530_v47 }
 0x1cb   :  { %v1520_v12 = vsel %vm1179_vm4, %v1519_v18, %v1518_v63  ;;  %v1533_v59 = vsel %vm1175_vm2, %v1501_v39, %v1532_v45 }
 0x1cc   :  { %v1522_v38 = vsel %vm1181_vm5, %v1521_v0, %v1520_v12  ;;  %v1535_v34 = vsel %vm1177_vm3, %v1534_v1, %v1533_v59 }
 0x1cd   :  { %v1524_v6 = vsel %vm1183_vm6, %v1523_v54, %v1522_v38  ;;  %v1537_v37 = vsel %vm1179_vm4, %v1536_v50, %v1535_v34 }
 0x1ce   :  { %v1526_v52 = vsel %vm1202_vm8, inf, %v1524_v6  ;;  %v1539_v20 = vsel %vm1181_vm5, %v1538_v41, %v1537_v37 }
 0x1cf   :  { %v1541_v44 = vsel %vm1183_vm6, %v1540_v43, %v1539_v20 }
 0x1d0   :  { %v1543_v42 = vmin.f32 %v1526_v52, %v1541_v44 }
 0x1d2   :  { %v1544_v3 = vmin.f32 %v1543_v42, %v1463_v60 }
 0x1d4   :  { %v1546_v15 = vrot.slane %v1544_v3, 4  ;;  %v1547_v17 = vrot.slane %v1544_v3, 5  ;;  %v1548_v28 = vrot.slane %v1544_v3, 6  ;;  %v1549_v58 = vrot.slane %v1544_v3, 7 }
 0x1d5   :  { %v1550_v8 = vrot.slane %v1544_v3, 1  ;;  %v1551_v26 = vrot.slane %v1544_v3, 2  ;;  %v1552_v22 = vrot.slane %v1544_v3, 3  ;;  %v1565_v36 = vadd.f32 %v1544_v3, %v4983_v57 }
 0x1d6   :  { %v1561_v61 = vadd.f32 %v1546_v15, %v4927_v40  ;;  %v1562_v7 = vadd.f32 %v1547_v17, %v4960_v21  ;;  %v1563_v24 = vadd.f32 %v1548_v28, %v4934_v48  ;;  %v1564_v29 = vadd.f32 %v1549_v58, %v4966_v11 }
 0x1d7   :  { %v1566_v39 = vadd.f32 %v1550_v8, %v4992_v16  ;;  %v1567_v60 = vadd.f32 %v1551_v26, %v5004_v31  ;;  %v1568_v2 = vadd.f32 %v1552_v22, %v5039_v53  ;;  %v1582_v9 = vrot.slane %v1565_v36, 7 }
 0x1d8   :  { %v1576_v55 = vrot.slane %v1561_v61, 3  ;;  %v1577_v56 = vrot.slane %v1562_v7, 2  ;;  %v1579_v27 = vrot.slane %v1563_v24, 1  ;;  %v1591_v5 = vrot.slane %v1561_v61, 4 }
 0x1d9   :  { %v1592_v14 = vrot.slane %v1562_v7, 3  ;;  %v1594_v30 = vrot.slane %v1563_v24, 2  ;;  %v1584_v23 = vrot.slane %v1566_v39, 6  ;;  %v1596_v62 = vrot.slane %v1564_v29, 1 }
 0x1da   :  { %v1578_v32 = vsel %vm1173_vm1, %v1577_v56, %v1576_v55  ;;  %v1586_v46 = vrot.slane %v1567_v60, 5  ;;  %v1599_v25 = vrot.slane %v1566_v39, 7  ;;  %v1601_v10 = vrot.slane %v1567_v60, 6 }
 0x1db   :  { %v1580_v18 = vsel %vm1175_vm2, %v1579_v27, %v1578_v32  ;;  %v1593_v13 = vsel %vm1171_vm0, %v1592_v14, %v1591_v5  ;;  %v1603_v50 = vrot.slane %v1568_v2, 5 }
 0x1dc   :  { %v1581_v0 = vsel %vm1177_vm3, %v1564_v29, %v1580_v18  ;;  %v1595_v1 = vsel %vm1173_vm1, %v1594_v30, %v1593_v13 }
 0x1dd   :  { %v1583_v54 = vsel %vm1179_vm4, %v1582_v9, %v1581_v0  ;;  %v1597_v47 = vsel %vm1175_vm2, %v1596_v62, %v1595_v1 }
 0x1de   :  { %v1585_v63 = vsel %vm1181_vm5, %v1584_v23, %v1583_v54  ;;  %v1598_v45 = vsel %vm1177_vm3, %v1565_v36, %v1597_v47 }
 0x1df   :  { %v1587_v41 = vsel %vm1183_vm6, %v1586_v46, %v1585_v63  ;;  %v1600_v12 = vsel %vm1179_vm4, %v1599_v25, %v1598_v45 }
 0x1e0   :  { %v1589_v59 = vsel %vm1202_vm8, inf, %v1587_v41  ;;  %v1602_v43 = vsel %vm1181_vm5, %v1601_v10, %v1600_v12 }
 0x1e1   :  { %v1604_v38 = vsel %vm1183_vm6, %v1603_v50, %v1602_v43 }
 0x1e2   :  { %v1606_v34 = vmin.f32 %v1589_v59, %v1604_v38 }
 0x1e4   :  { %v1607_v6 = vmin.f32 %v1606_v34, %v1526_v52 }
 0x1e6   :  { %v1609_v37 = vrot.slane %v1607_v6, 3  ;;  %v1610_v20 = vrot.slane %v1607_v6, 4  ;;  %v1611_v44 = vrot.slane %v1607_v6, 5  ;;  %v1612_v42 = vrot.slane %v1607_v6, 6 }
 0x1e7   :  { %v1613_v3 = vrot.slane %v1607_v6, 7  ;;  %v1614_v15 = vrot.slane %v1607_v6, 1  ;;  %v1615_v17 = vrot.slane %v1607_v6, 2  ;;  %v1629_v28 = vadd.f32 %v1607_v6, %v4992_v16 }
 0x1e8   :  { %v1624_v58 = vadd.f32 %v1609_v37, %v4927_v40  ;;  %v1625_v8 = vadd.f32 %v1610_v20, %v4960_v21  ;;  %v1626_v26 = vadd.f32 %v1611_v44, %v4934_v48  ;;  %v1627_v22 = vadd.f32 %v1612_v42, %v4966_v11 }
 0x1e9   :  { %v1628_v36 = vadd.f32 %v1613_v3, %v4983_v57  ;;  %v1630_v52 = vadd.f32 %v1614_v15, %v5004_v31  ;;  %v1631_v39 = vadd.f32 %v1615_v17, %v5039_v53  ;;  %v1647_v5 = vrot.slane %v1629_v28, 7 }
 0x1ea   :  { %v1639_v61 = vrot.slane %v1624_v58, 4  ;;  %v1640_v7 = vrot.slane %v1625_v8, 3  ;;  %v1642_v24 = vrot.slane %v1626_v26, 2  ;;  %v1644_v29 = vrot.slane %v1627_v22, 1 }
 0x1eb   :  { %v1654_v60 = vrot.slane %v1624_v58, 5  ;;  %v1655_v55 = vrot.slane %v1625_v8, 4  ;;  %v1657_v56 = vrot.slane %v1626_v26, 3  ;;  %v1659_v2 = vrot.slane %v1627_v22, 2 }
 0x1ec   :  { %v1641_v27 = vsel %vm1173_vm1, %v1640_v7, %v1639_v61  ;;  %v1661_v9 = vrot.slane %v1628_v36, 1  ;;  %v1649_v30 = vrot.slane %v1630_v52, 6  ;;  %v1664_v18 = vrot.slane %v1630_v52, 7 }
 0x1ed   :  { %v1643_v14 = vsel %vm1175_vm2, %v1642_v24, %v1641_v27  ;;  %v1656_v32 = vsel %vm1171_vm0, %v1655_v55, %v1654_v60  ;;  %v1666_v25 = vrot.slane %v1631_v39, 6 }
 0x1ee   :  { %v1645_v23 = vsel %vm1177_vm3, %v1644_v29, %v1643_v14  ;;  %v1658_v62 = vsel %vm1173_vm1, %v1657_v56, %v1656_v32  ;;  %v6272_v14 = vld [vmem:[#allocation206_spill] sm:$0xff] }
 0x1ef   :  { %v1646_v46 = vsel %vm1179_vm4, %v1628_v36, %v1645_v23  ;;  %v1660_v13 = vsel %vm1175_vm2, %v1659_v2, %v1658_v62 }
 0x1f0   :  { %v1648_v0 = vsel %vm1181_vm5, %v1647_v5, %v1646_v46  ;;  %v1662_v1 = vsel %vm1177_vm3, %v1661_v9, %v1660_v13 }
 0x1f1   :  { %v1650_v10 = vsel %vm1183_vm6, %v1649_v30, %v1648_v0  ;;  %v1663_v54 = vsel %vm1179_vm4, %v1629_v28, %v1662_v1  ;;  %v725_v30 = vrot.slane %v6272_v14, 4 }
 0x1f2   :  { %v1652_v47 = vsel %vm1202_vm8, inf, %v1650_v10  ;;  %v1665_v50 = vsel %vm1181_vm5, %v1664_v18, %v1663_v54 }
 0x1f3   :  { %v1667_v63 = vsel %vm1183_vm6, %v1666_v25, %v1665_v50  ;;  %v726_v10 = vadd.f32 %v725_v30, %v6272_v14 }
 0x1f4   :  { %v1669_v45 = vmin.f32 %v1652_v47, %v1667_v63 }
 0x1f6   :  { %v1670_v41 = vmin.f32 %v1669_v45, %v1589_v59  ;;  %v727_v45 = vrot.slane %v726_v10, 2 }
 0x1f8   :  { %v1672_v12 = vrot.slane %v1670_v41, 2  ;;  %v1673_v43 = vrot.slane %v1670_v41, 3  ;;  %v1674_v38 = vrot.slane %v1670_v41, 4  ;;  %v1675_v34 = vrot.slane %v1670_v41, 5 }
 0x1f9   :  { %v1676_v6 = vrot.slane %v1670_v41, 6  ;;  %v1677_v37 = vrot.slane %v1670_v41, 7  ;;  %v1678_v20 = vrot.slane %v1670_v41, 1  ;;  %v1693_v59 = vadd.f32 %v1670_v41, %v5004_v31 }
 0x1fa   :  { %v1687_v44 = vadd.f32 %v1672_v12, %v4927_v40  ;;  %v1688_v42 = vadd.f32 %v1673_v43, %v4960_v21  ;;  %v1689_v3 = vadd.f32 %v1674_v38, %v4934_v48  ;;  %v1690_v15 = vadd.f32 %v1675_v34, %v4966_v11 }
 0x1fb   :  { %v1691_v17 = vadd.f32 %v1676_v6, %v4983_v57  ;;  %v1692_v28 = vadd.f32 %v1677_v37, %v4992_v16  ;;  %v1694_v58 = vadd.f32 %v1678_v20, %v5039_v53  ;;  %v1712_v56 = vrot.slane %v1693_v59, 7 }
 0x1fc   :  { %v1702_v8 = vrot.slane %v1687_v44, 5  ;;  %v1703_v26 = vrot.slane %v1688_v42, 4  ;;  %v1705_v22 = vrot.slane %v1689_v3, 3  ;;  %v1707_v36 = vrot.slane %v1690_v15, 2 }
 0x1fd   :  { %v1709_v52 = vrot.slane %v1691_v17, 1  ;;  %v1717_v61 = vrot.slane %v1687_v44, 6  ;;  %v1718_v7 = vrot.slane %v1688_v42, 5  ;;  %v1720_v24 = vrot.slane %v1689_v3, 4 }
 0x1fe   :  { %v1704_v29 = vsel %vm1173_vm1, %v1703_v26, %v1702_v8  ;;  %v1722_v39 = vrot.slane %v1690_v15, 3  ;;  %v1724_v60 = vrot.slane %v1691_v17, 2  ;;  %v1726_v5 = vrot.slane %v1692_v28, 1 }
 0x1ff   :  { %v1706_v55 = vsel %vm1175_vm2, %v1705_v22, %v1704_v29  ;;  %v1719_v27 = vsel %vm1171_vm0, %v1718_v7, %v1717_v61  ;;  %v1729_v62 = vrot.slane %v1694_v58, 7  ;;  %v728_v15 = vadd.f32 %v727_v45, %v726_v10 }
 0x200   :  { %v1708_v2 = vsel %vm1177_vm3, %v1707_v36, %v1706_v55  ;;  %v1721_v9 = vsel %vm1173_vm1, %v1720_v24, %v1719_v27 }
 0x201   :  { %v1710_v32 = vsel %vm1179_vm4, %v1709_v52, %v1708_v2  ;;  %v1723_v23 = vsel %vm1175_vm2, %v1722_v39, %v1721_v9  ;;  %v729_v39 = vrot.slane %v728_v15, 1 }
 0x202   :  { %v1711_v18 = vsel %vm1181_vm5, %v1692_v28, %v1710_v32  ;;  %v1725_v46 = vsel %vm1177_vm3, %v1724_v60, %v1723_v23 }
 0x203   :  { %v1713_v13 = vsel %vm1183_vm6, %v1712_v56, %v1711_v18  ;;  %v1727_v25 = vsel %vm1179_vm4, %v1726_v5, %v1725_v46  ;;  %v730_v32 = vadd.f32 %v729_v39, %v728_v15 }
 0x204   :  { %v1715_v0 = vsel %vm1202_vm8, inf, %v1713_v13  ;;  %v1728_v1 = vsel %vm1181_vm5, %v1693_v59, %v1727_v25 }
 0x205   :  { %v1730_v54 = vsel %vm1183_vm6, %v1729_v62, %v1728_v1  ;;  %v5215_v18 = vsel %vm1202_vm8, %v730_v32, inf }
 0x206   :  { %v1732_v50 = vmin.f32 %v1715_v0, %v1730_v54 }
 0x208   :  { %v1733_v63 = vmin.f32 %v1732_v50, %v1652_v47 }
 0x20a   :  { %v1735_v41 = vrot.slane %v1733_v63, 1  ;;  %v1736_v12 = vrot.slane %v1733_v63, 2  ;;  %v1737_v43 = vrot.slane %v1733_v63, 3  ;;  %v1738_v38 = vrot.slane %v1733_v63, 4 }
 0x20b   :  { %v1739_v34 = vrot.slane %v1733_v63, 5  ;;  %v1740_v6 = vrot.slane %v1733_v63, 6  ;;  %v1741_v37 = vrot.slane %v1733_v63, 7  ;;  %v1757_v60 = vadd.f32 %v1733_v63, %v5039_v53 }
 0x20c   :  { %v1750_v20 = vadd.f32 %v1735_v41, %v4927_v40  ;;  %v1751_v44 = vadd.f32 %v1736_v12, %v4960_v21  ;;  %v1752_v42 = vadd.f32 %v1737_v43, %v4934_v48  ;;  %v1753_v3 = vadd.f32 %v1738_v38, %v4966_v11 }
 0x20d   :  { %v1754_v17 = vadd.f32 %v1739_v34, %v4983_v57  ;;  %v1755_v47 = vadd.f32 %v1740_v6, %v4992_v16  ;;  %v1756_v28 = vadd.f32 %v1741_v37, %v5004_v31 }
 0x20e   :  { %v1765_v59 = vrot.slane %v1750_v20, 6  ;;  %v1766_v58 = vrot.slane %v1751_v44, 5  ;;  %v1768_v8 = vrot.slane %v1752_v42, 4  ;;  %v1770_v26 = vrot.slane %v1753_v3, 3 }
 0x20f   :  { %v1772_v22 = vrot.slane %v1754_v17, 2  ;;  %v1774_v36 = vrot.slane %v1755_v47, 1  ;;  %v1780_v40 = vrot.slane %v1750_v20, 7  ;;  %v1781_v52 = vrot.slane %v1751_v44, 6 }
 0x210   :  { %v1767_v21 = vsel %vm1173_vm1, %v1766_v58, %v1765_v59  ;;  %v1783_v48 = vrot.slane %v1752_v42, 5  ;;  %v1785_v61 = vrot.slane %v1753_v3, 4  ;;  %v1787_v11 = vrot.slane %v1754_v17, 3 }
 0x211   :  { %v1769_v7 = vsel %vm1175_vm2, %v1768_v8, %v1767_v21  ;;  %v1782_v57 = vsel %vm1171_vm0, %v1781_v52, %v1780_v40  ;;  %v1789_v16 = vrot.slane %v1755_v47, 2  ;;  %v1791_v29 = vrot.slane %v1756_v28, 1 }
 0x212   :  { %v1771_v31 = vsel %vm1177_vm3, %v1770_v26, %v1769_v7  ;;  %v1784_v24 = vsel %vm1173_vm1, %v1783_v48, %v1782_v57 }
 0x213   :  { %v1773_v55 = vsel %vm1179_vm4, %v1772_v22, %v1771_v31  ;;  %v1786_v56 = vsel %vm1175_vm2, %v1785_v61, %v1784_v24 }
 0x214   :  { %v1775_v27 = vsel %vm1181_vm5, %v1774_v36, %v1773_v55  ;;  %v1788_v5 = vsel %vm1177_vm3, %v1787_v11, %v1786_v56 }
 0x215   :  { %v1776_v2 = vsel %vm1183_vm6, %v1756_v28, %v1775_v27  ;;  %v1790_v9 = vsel %vm1179_vm4, %v1789_v16, %v1788_v5 }
 0x216   :  { %v1778_v14 = vsel %vm1202_vm8, inf, %v1776_v2  ;;  %v1792_v30 = vsel %vm1181_vm5, %v1791_v29, %v1790_v9 }
 0x217   :  { %v1793_v23 = vsel %vm1183_vm6, %v1757_v60, %v1792_v30 }
 0x218   :  { %v1795_v53 = vmin.f32 %v1778_v14, %v1793_v23 }
 0x21a   :  { %v1796_v62 = vmin.f32 %v1795_v53, %v1715_v0 }
 0x21c   :  { %v1798_v46 = vrot.slane %v1796_v62, 1  ;;  %v1799_v13 = vrot.slane %v1796_v62, 2  ;;  %v1800_v25 = vrot.slane %v1796_v62, 3  ;;  %v1801_v1 = vrot.slane %v1796_v62, 4 }
 0x21d   :  { %v1802_v10 = vrot.slane %v1796_v62, 5  ;;  %v1803_v54 = vrot.slane %v1796_v62, 6  ;;  %v1804_v50 = vrot.slane %v1796_v62, 7  ;;  %v1813_v63 = vadd.f32 inf, %v1796_v62 }
 0x21e   :  { %v1814_v45 = vadd.f32 %v1798_v46, %v5215_v18  ;;  %v1815_v41 = vadd.f32 %v1799_v13, %v4923_v35  ;;  %v1816_v12 = vadd.f32 %v1800_v25, %v4953_v19  ;;  %v1817_v43 = vadd.f32 %v1801_v1, %v4968_v51 }
 0x21f   :  { %v1818_v0 = vadd.f32 %v1802_v10, %v4999_v4  ;;  %v1819_v38 = vadd.f32 %v1803_v54, %v5020_v33  ;;  %v1828_v34 = vrot.slane %v1813_v63, 7  ;;  %v1820_v44 = vadd.f32 %v1804_v50, %v5028_v49 }
 0x220   :  { %v1829_v6 = vrot.slane %v1814_v45, 6  ;;  %v1831_v37 = vrot.slane %v1815_v41, 5  ;;  %v1833_v20 = vrot.slane %v1816_v12, 4  ;;  %v1835_v42 = vrot.slane %v1817_v43, 3 }
 0x221   :  { %v1844_v3 = vrot.slane %v1814_v45, 7  ;;  %v1846_v15 = vrot.slane %v1815_v41, 6  ;;  %v1837_v47 = vrot.slane %v1818_v0, 2  ;;  %v1848_v28 = vrot.slane %v1816_v12, 5 }
 0x222   :  { %v1830_v17 = vsel %vm1173_vm1, %v1829_v6, %v1828_v34  ;;  %v1850_v59 = vrot.slane %v1817_v43, 4  ;;  %v1839_v8 = vrot.slane %v1819_v38, 1  ;;  %v1852_v22 = vrot.slane %v1818_v0, 3 }
 0x223   :  { %v1832_v58 = vsel %vm1175_vm2, %v1831_v37, %v1830_v17  ;;  %v1845_v26 = vsel %vm1171_vm0, %v1844_v3, %v1813_v63  ;;  %v1854_v52 = vrot.slane %v1819_v38, 2  ;;  %v1856_v61 = vrot.slane %v1820_v44, 1 }
 0x224   :  { %v1834_v36 = vsel %vm1177_vm3, %v1833_v20, %v1832_v58  ;;  %v1847_v40 = vsel %vm1173_vm1, %v1846_v15, %v1845_v26 }
 0x225   :  { %v1836_v21 = vsel %vm1179_vm4, %v1835_v42, %v1834_v36  ;;  %v1849_v48 = vsel %vm1175_vm2, %v1848_v28, %v1847_v40 }
 0x226   :  { %v1838_v11 = vsel %vm1181_vm5, %v1837_v47, %v1836_v21  ;;  %v1851_v7 = vsel %vm1177_vm3, %v1850_v59, %v1849_v48 }
 0x227   :  { %v1840_v57 = vsel %vm1183_vm6, %v1839_v8, %v1838_v11  ;;  %v1853_v16 = vsel %vm1179_vm4, %v1852_v22, %v1851_v7 }
 0x228   :  { %v1842_v31 = vsel %vm1202_vm8, inf, %v1840_v57  ;;  %v1855_v24 = vsel %vm1181_vm5, %v1854_v52, %v1853_v16 }
 0x229   :  { %v1857_v29 = vsel %vm1183_vm6, %v1856_v61, %v1855_v24 }
 0x22a   :  { %v1859_v39 = vmin.f32 %v1842_v31, %v1857_v29 }
 0x22c   :  { %v1860_v60 = vmin.f32 %v1859_v39, %v1778_v14 }
 0x22e   :  { %v1862_v55 = vrot.slane %v1860_v60, 7  ;;  %v1863_v56 = vrot.slane %v1860_v60, 1  ;;  %v1864_v27 = vrot.slane %v1860_v60, 2  ;;  %v1865_v5 = vrot.slane %v1860_v60, 3 }
 0x22f   :  { %v1866_v2 = vrot.slane %v1860_v60, 4  ;;  %v1867_v9 = vrot.slane %v1860_v60, 5  ;;  %v1868_v30 = vrot.slane %v1860_v60, 6  ;;  %v1878_v32 = vadd.f32 %v1860_v60, %v5215_v18 }
 0x230   :  { %v1877_v23 = vadd.f32 inf, %v1862_v55  ;;  %v1879_v53 = vadd.f32 %v1863_v56, %v4923_v35  ;;  %v1880_v62 = vadd.f32 %v1864_v27, %v4953_v19  ;;  %v1881_v46 = vadd.f32 %v1865_v5, %v4968_v51 }
 0x231   :  { %v1882_v13 = vadd.f32 %v1866_v2, %v4999_v4  ;;  %v1883_v14 = vadd.f32 %v1867_v9, %v5020_v33  ;;  %v1884_v25 = vadd.f32 %v1868_v30, %v5028_v49  ;;  %v1892_v1 = vrot.slane %v1878_v32, 7 }
 0x232   :  { %v1894_v10 = vrot.slane %v1879_v53, 6  ;;  %v1896_v54 = vrot.slane %v1880_v62, 5  ;;  %v1898_v50 = vrot.slane %v1881_v46, 4  ;;  %v1907_v63 = vrot.slane %v1877_v23, 1 }
 0x233   :  { %v1893_v45 = vsel %vm1173_vm1, %v1892_v1, %v1877_v23  ;;  %v1900_v41 = vrot.slane %v1882_v13, 3  ;;  %v1902_v12 = vrot.slane %v1883_v14, 2  ;;  %v1909_v43 = vrot.slane %v1879_v53, 7 }
 0x234   :  { %v1895_v0 = vsel %vm1175_vm2, %v1894_v10, %v1893_v45  ;;  %v1908_v38 = vsel %vm1171_vm0, %v1878_v32, %v1907_v63  ;;  %v1911_v34 = vrot.slane %v1880_v62, 6  ;;  %v1913_v6 = vrot.slane %v1881_v46, 5 }
 0x235   :  { %v1897_v37 = vsel %vm1177_vm3, %v1896_v54, %v1895_v0  ;;  %v1910_v20 = vsel %vm1173_vm1, %v1909_v43, %v1908_v38  ;;  %v1915_v44 = vrot.slane %v1882_v13, 4  ;;  %v1917_v42 = vrot.slane %v1883_v14, 3 }
 0x236   :  { %v1899_v3 = vsel %vm1179_vm4, %v1898_v50, %v1897_v37  ;;  %v1912_v15 = vsel %vm1175_vm2, %v1911_v34, %v1910_v20  ;;  %v1919_v17 = vrot.slane %v1884_v25, 2 }
 0x237   :  { %v1901_v47 = vsel %vm1181_vm5, %v1900_v41, %v1899_v3  ;;  %v1914_v28 = vsel %vm1177_vm3, %v1913_v6, %v1912_v15 }
 0x238   :  { %v1903_v59 = vsel %vm1183_vm6, %v1902_v12, %v1901_v47  ;;  %v1916_v58 = vsel %vm1179_vm4, %v1915_v44, %v1914_v28 }
 0x239   :  { %v1905_v8 = vsel %vm1202_vm8, inf, %v1903_v59  ;;  %v1918_v26 = vsel %vm1181_vm5, %v1917_v42, %v1916_v58 }
 0x23a   :  { %v1920_v22 = vsel %vm1183_vm6, %v1919_v17, %v1918_v26 }
 0x23b   :  { %v1922_v36 = vmin.f32 %v1905_v8, %v1920_v22 }
 0x23d   :  { %v1923_v40 = vmin.f32 %v1922_v36, %v1842_v31 }
 0x23f   :  { %v1925_v52 = vrot.slane %v1923_v40, 6  ;;  %v1926_v21 = vrot.slane %v1923_v40, 7  ;;  %v1927_v48 = vrot.slane %v1923_v40, 1  ;;  %v1928_v61 = vrot.slane %v1923_v40, 2 }
 0x240   :  { %v1929_v11 = vrot.slane %v1923_v40, 3  ;;  %v1930_v7 = vrot.slane %v1923_v40, 4  ;;  %v1931_v57 = vrot.slane %v1923_v40, 5  ;;  %v1942_v16 = vadd.f32 %v1923_v40, %v4923_v35 }
 0x241   :  { %v1940_v24 = vadd.f32 inf, %v1925_v52  ;;  %v1941_v29 = vadd.f32 %v1926_v21, %v5215_v18  ;;  %v1943_v39 = vadd.f32 %v1927_v48, %v4953_v19  ;;  %v1944_v60 = vadd.f32 %v1928_v61, %v4968_v51 }
 0x242   :  { %v1945_v55 = vadd.f32 %v1929_v11, %v4999_v4  ;;  %v1946_v31 = vadd.f32 %v1930_v7, %v5020_v33  ;;  %v1957_v56 = vrot.slane %v1942_v16, 7  ;;  %v1947_v9 = vadd.f32 %v1931_v57, %v5028_v49 }
 0x243   :  { %v1955_v27 = vrot.slane %v1940_v24, 1  ;;  %v1959_v5 = vrot.slane %v1943_v39, 6  ;;  %v1970_v2 = vrot.slane %v1940_v24, 2  ;;  %v1961_v30 = vrot.slane %v1944_v60, 5 }
 0x244   :  { %v1971_v32 = vrot.slane %v1941_v29, 1  ;;  %v1974_v23 = vrot.slane %v1943_v39, 7  ;;  %v1963_v62 = vrot.slane %v1945_v55, 4  ;;  %v1976_v46 = vrot.slane %v1944_v60, 6 }
 0x245   :  { %v1956_v53 = vsel %vm1173_vm1, %v1941_v29, %v1955_v27  ;;  %v1965_v14 = vrot.slane %v1946_v31, 3  ;;  %v1978_v1 = vrot.slane %v1945_v55, 5  ;;  %v1980_v50 = vrot.slane %v1946_v31, 4 }
 0x246   :  { %v1958_v13 = vsel %vm1175_vm2, %v1957_v56, %v1956_v53  ;;  %v1972_v25 = vsel %vm1171_vm0, %v1971_v32, %v1970_v2  ;;  %v1982_v41 = vrot.slane %v1947_v9, 3 }
 0x247   :  { %v1960_v10 = vsel %vm1177_vm3, %v1959_v5, %v1958_v13  ;;  %v1973_v54 = vsel %vm1173_vm1, %v1942_v16, %v1972_v25 }
 0x248   :  { %v1962_v63 = vsel %vm1179_vm4, %v1961_v30, %v1960_v10  ;;  %v1975_v45 = vsel %vm1175_vm2, %v1974_v23, %v1973_v54 }
 0x249   :  { %v1964_v12 = vsel %vm1181_vm5, %v1963_v62, %v1962_v63  ;;  %v1977_v43 = vsel %vm1177_vm3, %v1976_v46, %v1975_v45 }
 0x24a   :  { %v1966_v0 = vsel %vm1183_vm6, %v1965_v14, %v1964_v12  ;;  %v1979_v38 = vsel %vm1179_vm4, %v1978_v1, %v1977_v43 }
 0x24b   :  { %v1968_v34 = vsel %vm1202_vm8, inf, %v1966_v0  ;;  %v1981_v6 = vsel %vm1181_vm5, %v1980_v50, %v1979_v38 }
 0x24c   :  { %v1983_v37 = vsel %vm1183_vm6, %v1982_v41, %v1981_v6 }
 0x24d   :  { %v1985_v20 = vmin.f32 %v1968_v34, %v1983_v37 }
 0x24f   :  { %v1986_v44 = vmin.f32 %v1985_v20, %v1905_v8 }
 0x251   :  { %v1988_v42 = vrot.slane %v1986_v44, 5  ;;  %v1989_v3 = vrot.slane %v1986_v44, 6  ;;  %v1990_v15 = vrot.slane %v1986_v44, 7  ;;  %v1991_v17 = vrot.slane %v1986_v44, 1 }
 0x252   :  { %v1992_v47 = vrot.slane %v1986_v44, 2  ;;  %v1993_v28 = vrot.slane %v1986_v44, 3  ;;  %v1994_v59 = vrot.slane %v1986_v44, 4  ;;  %v2006_v58 = vadd.f32 %v1986_v44, %v4953_v19 }
 0x253   :  { %v2003_v26 = vadd.f32 inf, %v1988_v42  ;;  %v2004_v22 = vadd.f32 %v1989_v3, %v5215_v18  ;;  %v2005_v36 = vadd.f32 %v1990_v15, %v4923_v35  ;;  %v2007_v40 = vadd.f32 %v1991_v17, %v4968_v51 }
 0x254   :  { %v2008_v52 = vadd.f32 %v1992_v47, %v4999_v4  ;;  %v2009_v8 = vadd.f32 %v1993_v28, %v5020_v33  ;;  %v2022_v61 = vrot.slane %v2006_v58, 7  ;;  %v2010_v7 = vadd.f32 %v1994_v59, %v5028_v49 }
 0x255   :  { %v2018_v21 = vrot.slane %v2003_v26, 2  ;;  %v2019_v48 = vrot.slane %v2004_v22, 1  ;;  %v2033_v11 = vrot.slane %v2003_v26, 3  ;;  %v2024_v57 = vrot.slane %v2007_v40, 6 }
 0x256   :  { %v2034_v16 = vrot.slane %v2004_v22, 2  ;;  %v2036_v24 = vrot.slane %v2005_v36, 1  ;;  %v2026_v39 = vrot.slane %v2008_v52, 5  ;;  %v2039_v60 = vrot.slane %v2007_v40, 7 }
 0x257   :  { %v2020_v29 = vsel %vm1173_vm1, %v2019_v48, %v2018_v21  ;;  %v2028_v31 = vrot.slane %v2009_v8, 4  ;;  %v2041_v27 = vrot.slane %v2008_v52, 6  ;;  %v2043_v9 = vrot.slane %v2009_v8, 5 }
 0x258   :  { %v2021_v55 = vsel %vm1175_vm2, %v2005_v36, %v2020_v29  ;;  %v2035_v56 = vsel %vm1171_vm0, %v2034_v16, %v2033_v11  ;;  %v2045_v23 = vrot.slane %v2010_v7, 4 }
 0x259   :  { %v2023_v5 = vsel %vm1177_vm3, %v2022_v61, %v2021_v55  ;;  %v2037_v2 = vsel %vm1173_vm1, %v2036_v24, %v2035_v56 }
 0x25a   :  { %v2025_v30 = vsel %vm1179_vm4, %v2024_v57, %v2023_v5  ;;  %v2038_v32 = vsel %vm1175_vm2, %v2006_v58, %v2037_v2 }
 0x25b   :  { %v2027_v53 = vsel %vm1181_vm5, %v2026_v39, %v2025_v30  ;;  %v2040_v62 = vsel %vm1177_vm3, %v2039_v60, %v2038_v32 }
 0x25c   :  { %v2029_v46 = vsel %vm1183_vm6, %v2028_v31, %v2027_v53  ;;  %v2042_v13 = vsel %vm1179_vm4, %v2041_v27, %v2040_v62 }
 0x25d   :  { %v2031_v14 = vsel %vm1202_vm8, inf, %v2029_v46  ;;  %v2044_v25 = vsel %vm1181_vm5, %v2043_v9, %v2042_v13 }
 0x25e   :  { %v2046_v1 = vsel %vm1183_vm6, %v2045_v23, %v2044_v25 }
 0x25f   :  { %v2048_v10 = vmin.f32 %v2031_v14, %v2046_v1 }
 0x261   :  { %v2049_v54 = vmin.f32 %v2048_v10, %v1968_v34 }
 0x263   :  { %v2051_v50 = vrot.slane %v2049_v54, 4  ;;  %v2052_v63 = vrot.slane %v2049_v54, 5  ;;  %v2053_v45 = vrot.slane %v2049_v54, 6  ;;  %v2054_v41 = vrot.slane %v2049_v54, 7 }
 0x264   :  { %v2055_v12 = vrot.slane %v2049_v54, 1  ;;  %v2056_v43 = vrot.slane %v2049_v54, 2  ;;  %v2057_v0 = vrot.slane %v2049_v54, 3  ;;  %v2070_v38 = vadd.f32 %v2049_v54, %v4968_v51 }
 0x265   :  { %v2066_v6 = vadd.f32 inf, %v2051_v50  ;;  %v2067_v37 = vadd.f32 %v2052_v63, %v5215_v18  ;;  %v2068_v20 = vadd.f32 %v2053_v45, %v4923_v35  ;;  %v2069_v44 = vadd.f32 %v2054_v41, %v4953_v19 }
 0x266   :  { %v2071_v42 = vadd.f32 %v2055_v12, %v4999_v4  ;;  %v2072_v34 = vadd.f32 %v2056_v43, %v5020_v33  ;;  %v2073_v28 = vadd.f32 %v2057_v0, %v5028_v49  ;;  %v2087_v59 = vrot.slane %v2070_v38, 7 }
 0x267   :  { %v2081_v3 = vrot.slane %v2066_v6, 3  ;;  %v2082_v15 = vrot.slane %v2067_v37, 2  ;;  %v2084_v17 = vrot.slane %v2068_v20, 1  ;;  %v2096_v47 = vrot.slane %v2066_v6, 4 }
 0x268   :  { %v2097_v58 = vrot.slane %v2067_v37, 3  ;;  %v2099_v26 = vrot.slane %v2068_v20, 2  ;;  %v2089_v36 = vrot.slane %v2071_v42, 6  ;;  %v2101_v40 = vrot.slane %v2069_v44, 1 }
 0x269   :  { %v2083_v22 = vsel %vm1173_vm1, %v2082_v15, %v2081_v3  ;;  %v2091_v8 = vrot.slane %v2072_v34, 5  ;;  %v2104_v48 = vrot.slane %v2071_v42, 7  ;;  %v2106_v7 = vrot.slane %v2072_v34, 6 }
 0x26a   :  { %v2085_v52 = vsel %vm1175_vm2, %v2084_v17, %v2083_v22  ;;  %v2098_v21 = vsel %vm1171_vm0, %v2097_v58, %v2096_v47  ;;  %v2108_v24 = vrot.slane %v2073_v28, 5 }
 0x26b   :  { %v2086_v61 = vsel %vm1177_vm3, %v2069_v44, %v2085_v52  ;;  %v2100_v11 = vsel %vm1173_vm1, %v2099_v26, %v2098_v21 }
 0x26c   :  { %v2088_v57 = vsel %vm1179_vm4, %v2087_v59, %v2086_v61  ;;  %v2102_v16 = vsel %vm1175_vm2, %v2101_v40, %v2100_v11 }
 0x26d   :  { %v2090_v29 = vsel %vm1181_vm5, %v2089_v36, %v2088_v57  ;;  %v2103_v39 = vsel %vm1177_vm3, %v2070_v38, %v2102_v16 }
 0x26e   :  { %v2092_v60 = vsel %vm1183_vm6, %v2091_v8, %v2090_v29  ;;  %v2105_v55 = vsel %vm1179_vm4, %v2104_v48, %v2103_v39 }
 0x26f   :  { %v2094_v31 = vsel %vm1202_vm8, inf, %v2092_v60  ;;  %v2107_v56 = vsel %vm1181_vm5, %v2106_v7, %v2105_v55 }
 0x270   :  { %v2109_v27 = vsel %vm1183_vm6, %v2108_v24, %v2107_v56 }
 0x271   :  { %v2111_v5 = vmin.f32 %v2094_v31, %v2109_v27 }
 0x273   :  { %v2112_v2 = vmin.f32 %v2111_v5, %v2031_v14 }
 0x275   :  { %v2114_v9 = vrot.slane %v2112_v2, 3  ;;  %v2115_v30 = vrot.slane %v2112_v2, 4  ;;  %v2116_v32 = vrot.slane %v2112_v2, 5  ;;  %v2117_v23 = vrot.slane %v2112_v2, 6 }
 0x276   :  { %v2118_v53 = vrot.slane %v2112_v2, 7  ;;  %v2119_v62 = vrot.slane %v2112_v2, 1  ;;  %v2120_v46 = vrot.slane %v2112_v2, 2  ;;  %v2134_v13 = vadd.f32 %v2112_v2, %v4999_v4 }
 0x277   :  { %v2129_v25 = vadd.f32 inf, %v2114_v9  ;;  %v2130_v1 = vadd.f32 %v2115_v30, %v5215_v18  ;;  %v2131_v10 = vadd.f32 %v2116_v32, %v4923_v35  ;;  %v2132_v54 = vadd.f32 %v2117_v23, %v4953_v19 }
 0x278   :  { %v2133_v50 = vadd.f32 %v2118_v53, %v4968_v51  ;;  %v2135_v14 = vadd.f32 %v2119_v62, %v5020_v33  ;;  %v2136_v43 = vadd.f32 %v2120_v46, %v5028_v49  ;;  %v2152_v18 = vrot.slane %v2134_v13, 7 }
 0x279   :  { %v2144_v63 = vrot.slane %v2129_v25, 4  ;;  %v2145_v45 = vrot.slane %v2130_v1, 3  ;;  %v2147_v41 = vrot.slane %v2131_v10, 2  ;;  %v2149_v12 = vrot.slane %v2132_v54, 1 }
 0x27a   :  { %v2159_v0 = vrot.slane %v2129_v25, 5  ;;  %v2160_v38 = vrot.slane %v2130_v1, 4  ;;  %v2162_v4 = vrot.slane %v2131_v10, 3  ;;  %v2164_v37 = vrot.slane %v2132_v54, 2 }
 0x27b   :  { %v2146_v6 = vsel %vm1173_vm1, %v2145_v45, %v2144_v63  ;;  %v2166_v35 = vrot.slane %v2133_v50, 1  ;;  %v2154_v20 = vrot.slane %v2135_v14, 6  ;;  %v2169_v42 = vrot.slane %v2135_v14, 7 }
 0x27c   :  { %v2148_v19 = vsel %vm1175_vm2, %v2147_v41, %v2146_v6  ;;  %v2161_v51 = vsel %vm1171_vm0, %v2160_v38, %v2159_v0  ;;  %v2171_v15 = vrot.slane %v2136_v43, 6 }
 0x27d   :  { %v2150_v33 = vsel %vm1177_vm3, %v2149_v12, %v2148_v19  ;;  %v2163_v44 = vsel %vm1173_vm1, %v2162_v4, %v2161_v51 }
 0x27e   :  { %v2151_v34 = vsel %vm1179_vm4, %v2133_v50, %v2150_v33  ;;  %v2165_v3 = vsel %vm1175_vm2, %v2164_v37, %v2163_v44 }
 0x27f   :  { %v2153_v17 = vsel %vm1181_vm5, %v2152_v18, %v2151_v34  ;;  %v2167_v47 = vsel %vm1177_vm3, %v2166_v35, %v2165_v3 }
 0x280   :  { %v2155_v28 = vsel %vm1183_vm6, %v2154_v20, %v2153_v17  ;;  %v2168_v59 = vsel %vm1179_vm4, %v2134_v13, %v2167_v47 }
 0x281   :  { %v2157_v58 = vsel %vm1202_vm8, inf, %v2155_v28  ;;  %v2170_v26 = vsel %vm1181_vm5, %v2169_v42, %v2168_v59 }
 0x282   :  { %v2172_v22 = vsel %vm1183_vm6, %v2171_v15, %v2170_v26 }
 0x283   :  { %v2174_v36 = vmin.f32 %v2157_v58, %v2172_v22 }
 0x285   :  { %v2175_v40 = vmin.f32 %v2174_v36, %v2094_v31 }
 0x287   :  { %v2177_v52 = vrot.slane %v2175_v40, 1 }
 0x289   :  { %v2179_v8 = vadd.f32 %v2177_v52, %v5028_v49 }
 0x28b   :  { %2192 = vrsqrt.f32 %v2179_v8  ;;  %vm2182_vm14 = vcmp.eq.f32.partialorder %v2179_v8, inf  ;;  %v2185_v48 = vand.u32 2147483648, %v2179_v8  ;;  %vm2184_vm15 = vcmp.eq.f32.partialorder %v2179_v8, 0.0 }
 0x295   :  { %v2193_v21 = vpop.eup %2192 }
 0x296   :  { %v2181_v61 = vmul.f32 %v2193_v21, %v2179_v8 }
 0x298   :  { %v2183_v11 = vsel %vm2182_vm14, %v2179_v8, %v2181_v61 }
 0x299   :  { %v2186_v7 = vsel %vm2184_vm15, %v2185_v48, %v2183_v11 }
 0x29a   :  { %2187 = vst [vmem:[%s5349_s2 - $0x6] sm:$0x40] %v2186_v7 }

</bundles_post_ra>
